<compile_context>
chip_gen: v7x
topology: tpu7x:2x2x1
jax: 0.10.0
libtpu: 0.0.40
codegen_flags: <defaults>
</compile_context>

<pallas_src>
import functools
import math

import jax
import jax.numpy as jnp
from jax import lax
from jax.experimental import pallas as pl
from jax.experimental.pallas import tpu as pltpu

HIDDEN = 32
LATENT = 32
GH = 2 * HIDDEN           # fused [x|y] hidden width (64 lanes)
NGATE = 8 * HIDDEN        # fused gate width (256 lanes): [i_xy, f_xy, o_xy, g_xy]
ROWS = 8                  # rows per timestep (padded to one sublane group)
MIN_STD = 0.01
BN_EPS = 1e-5             # BatchNormSequence(affine=False) eval with default stats
_LOG_SQRT_2PI = 0.5 * math.log(2.0 * math.pi)

# LSTM parameter-slab row offsets (slab width = NGATE)
_L_WIN0, _L_B0, _L_WHH0, _L_WIH1, _L_WHH1, _L_B1 = 0, 8, 16, 80, 144, 208
_LSTM_ROWS = 216
_ED_WIDTH = HIDDEN + LATENT   # 64


def _vmem_spec():
    return pl.BlockSpec(memory_space=pltpu.MemorySpace.VMEM)


def _ed_offsets(y_dim):
    """Row offsets (8-aligned) of the encoder/decoder parameter slab."""
    blocks = [
        ("LW1", 2 * HIDDEN, HIDDEN), ("LB1", 1, HIDDEN),
        ("LW2", HIDDEN, HIDDEN), ("LB2", 1, HIDDEN),
        ("LWP", HIDDEN, HIDDEN), ("LBP", 1, HIDDEN),
        ("LWMV", HIDDEN, 2 * LATENT), ("LBMV", 1, 2 * LATENT),
        ("DWXP", 2 * HIDDEN, HIDDEN + LATENT), ("DB1C", 1, HIDDEN + LATENT),
        ("DW1Z", LATENT, HIDDEN + LATENT),
        ("DW2", HIDDEN + LATENT, HIDDEN + LATENT), ("DB2", 1, HIDDEN + LATENT),
        ("DWMS", HIDDEN + LATENT, 2 * y_dim), ("DBMS", 1, 2 * y_dim),
    ]
    offs, row = {}, 0
    for name, nrows, ncols in blocks:
        offs[name] = (row, nrows, ncols)
        row += ((nrows + 7) // 8) * 8
    return offs, row


# ---------------------------------------------------------------------------
# Fused kernel: 2x 2-layer LSTM (x/y streams fused via block-diag weights),
# prior+posterior latent encoder, decoder, and the loss statistics.
# ---------------------------------------------------------------------------
def _np_fused_kernel(xy_ref, lstm_ref, ed_ref, yhat_ref, loss_ref,
                     *, B, Tt, Tc, x_dim, y_dim):
    f32 = jnp.float32

    # ---- parameters: a few contiguous static slab views --------------------
    W_IN0 = lstm_ref[_L_WIN0:_L_WIN0 + ROWS, :]
    B0 = lstm_ref[_L_B0:_L_B0 + 1, :]
    W_HH0 = lstm_ref[_L_WHH0:_L_WHH0 + GH, :]
    W_IH1 = lstm_ref[_L_WIH1:_L_WIH1 + GH, :]
    W_HH1 = lstm_ref[_L_WHH1:_L_WHH1 + GH, :]
    B1 = lstm_ref[_L_B1:_L_B1 + 1, :]

    offs, _ = _ed_offsets(y_dim)

    def edp(name):
        r, n, c = offs[name]
        return ed_ref[r:r + n, 0:c]

    xy = xy_ref[...]                                      # (Tt*ROWS, 8)

    # ---- layer-0 input projections hoisted out of the recurrence ----------
    in0 = jnp.dot(xy, W_IN0, preferred_element_type=f32) + B0   # (Tt*ROWS, 256)

    def lstm_cell(gates, c):
        # fused gate lane layout: [i_x|i_y, f_x|f_y, o_x|o_y, g_x|g_y]
        s = jax.nn.sigmoid(gates[:, :3 * GH])
        i, f, o = s[:, :GH], s[:, GH:2 * GH], s[:, 2 * GH:3 * GH]
        g = jnp.tanh(gates[:, 3 * GH:])
        c_new = f * c + i * g
        return o * jnp.tanh(c_new), c_new

    zero = jnp.zeros((ROWS, GH), f32)
    h0 = c0 = h1 = c1 = zero
    outs = []
    # 3 MXU pushes per timestep (vs. 8 before); fully unrolled (Tt static).
    for t in range(Tt):
        g0 = in0[t * ROWS:(t + 1) * ROWS, :] + jnp.dot(
            h0, W_HH0, preferred_element_type=f32)
        h0, c0 = lstm_cell(g0, c0)
        g1 = (jnp.dot(h0, W_IH1, preferred_element_type=f32)
              + jnp.dot(h1, W_HH1, preferred_element_type=f32) + B1)
        h1, c1 = lstm_cell(g1, c1)
        outs.append(h1)                      # kept in registers, no scratch
    hseq = jnp.concatenate(outs, axis=0)     # (Tt*ROWS, 64) = [x-hid | y-hid]
    # row layout per step: rows 0:B context pair, B:2B target pair, 2B:8 pad.

    # ---- latent encoder: prior & posterior fused in one pass --------------
    enc_h = jax.nn.relu(jnp.dot(hseq, edp("LW1"),
                                preferred_element_type=f32) + edp("LB1"))
    enc = jnp.dot(enc_h, edp("LW2"), preferred_element_type=f32) + edp("LB2")

    # sequence means via one selection matmul on the otherwise idle MXU:
    # row r<B averages the context rows over t<Tc, row B+b averages the
    # target rows over all Tt steps.
    mr = lax.broadcasted_iota(jnp.int32, (2 * B, Tt * ROWS), 0)
    mc = lax.broadcasted_iota(jnp.int32, (2 * B, Tt * ROWS), 1)
    hit = jnp.bitwise_and(mc, ROWS - 1) == mr
    tcol = jnp.right_shift(mc, 3)                         # column // ROWS
    wsel = jnp.where(mr < B, jnp.where(tcol < Tc, 1.0 / Tc, 0.0), 1.0 / Tt)
    msel = jnp.where(hit, wsel, 0.0).astype(f32)
    mean_both = jnp.dot(msel, enc, preferred_element_type=f32)   # (2B, H)

    pen = jax.nn.relu(jnp.dot(mean_both, edp("LWP"),
                              preferred_element_type=f32) + edp("LBP"))
    heads = jnp.dot(pen, edp("LWMV"), preferred_element_type=f32) + edp("LBMV")
    mu_all = heads[:, :LATENT]
    sig_all = MIN_STD + (1.0 - MIN_STD) * jax.nn.sigmoid(0.5 * heads[:, LATENT:])
    prior_mu, post_mu = mu_all[:B, :], mu_all[B:, :]
    prior_sig, post_sig = sig_all[:B, :], sig_all[B:, :]

    # ---- decoder (eval: z = prior mean); runs over all padded rows --------
    zc = jnp.dot(prior_mu, edp("DW1Z"), preferred_element_type=f32)   # (B, 64)
    pieces = [jnp.zeros((B, GH), f32), zc]
    if ROWS - 2 * B > 0:
        pieces.append(jnp.zeros((ROWS - 2 * B, GH), f32))
    zc_blk = jnp.concatenate(pieces, axis=0)              # z on the target rows
    zc_full = jnp.tile(zc_blk, (Tt, 1))                   # (Tt*ROWS, 64)

    # DWXP = [d_wt @ d_w1x ; 0] so the y-lanes of hseq contribute nothing.
    hdec = jax.nn.relu(jnp.dot(hseq, edp("DWXP"), preferred_element_type=f32)
                       + zc_full + edp("DB1C"))
    dec = jnp.dot(hdec, edp("DW2"), preferred_element_type=f32) + edp("DB2")
    ho = jnp.dot(dec, edp("DWMS"), preferred_element_type=f32) + edp("DBMS")
    mean_d = ho[:, :y_dim]
    log_sig_d = ho[:, y_dim:]
    sig_d = MIN_STD + (1.0 - MIN_STD) * jax.nn.softplus(log_sig_d)
    yhat_ref[...] = jnp.concatenate([mean_d, log_sig_d, sig_d], axis=-1)

    # ---- losses (Normal.log_prob, KL(post||prior), mse, weighted nll) -----
    y_true = xy[:, x_dim:x_dim + y_dim]        # raw target_y on the valid rows
    logprob = (-0.5 * ((y_true - mean_d) / sig_d) ** 2
               - jnp.log(sig_d) - _LOG_SQRT_2PI)
    log_p_row = jnp.mean(logprob, axis=-1, keepdims=True)    # (Tt*ROWS, 1)

    rr = lax.broadcasted_iota(jnp.int32, (Tt * ROWS, 1), 0)
    sub = jnp.bitwise_and(rr, ROWS - 1)
    tstep = jnp.right_shift(rr, 3)
    valid = jnp.logical_and(sub >= B, sub < 2 * B).astype(f32)

    inv_nt = 1.0 / (Tt * B)
    mlogp = jnp.sum(log_p_row * valid, keepdims=True) * inv_nt       # (1,1)
    wgt = (tstep + 1).astype(f32)
    loss_pw = jnp.sum(valid * (-log_p_row) * lax.rsqrt(wgt),
                      keepdims=True) * inv_nt
    se = (mean_d - y_true) ** 2
    mse_mask = valid * (tstep < Tc).astype(f32)
    mse = jnp.sum(se * mse_mask, keepdims=True) * (1.0 / (Tc * B * y_dim))

    kl = (jnp.log(prior_sig / post_sig)
          + (post_sig ** 2 + (post_mu - prior_mu) ** 2)
          / (2.0 * prior_sig ** 2) - 0.5)
    mkl = jnp.sum(kl, keepdims=True) * (1.0 / (B * LATENT))

    lane = lax.broadcasted_iota(jnp.int32, (1, 8), 1)
    loss_ref[...] = (jnp.where(lane == 0, mkl - mlogp, 0.0)
                     + jnp.where(lane == 1, -mlogp, 0.0)
                     + jnp.where(lane == 2, mkl, 0.0)
                     + jnp.where(lane == 3, mse, 0.0)
                     + jnp.where(lane == 4, loss_pw, 0.0))


# ---------------------------------------------------------------------------
# Host-side parameter packing (block-diag gate fusion + contiguous slabs).
# ---------------------------------------------------------------------------
def _fuse_gates(wx, wy):
    """(kx,4H),(ky,4H) -> (kx+ky, 8H) block-diag with per-gate lane interleave."""
    kx, ky = wx.shape[0], wy.shape[0]
    out = jnp.zeros((kx + ky, NGATE), jnp.float32)
    for g in range(4):
        out = out.at[:kx, 2 * g * HIDDEN:(2 * g + 1) * HIDDEN].set(
            wx[:, g * HIDDEN:(g + 1) * HIDDEN])
        out = out.at[kx:, (2 * g + 1) * HIDDEN:(2 * g + 2) * HIDDEN].set(
            wy[:, g * HIDDEN:(g + 1) * HIDDEN])
    return out


def _fuse_gate_bias(bx, by):
    return jnp.sum(_fuse_gates(bx, by), axis=0, keepdims=True)


def _pack_lstm_slab(px, py, bn_scale):
    x_dim = px["wih0"].shape[0]
    y_dim = py["wih0"].shape[0]
    w_in0 = _fuse_gates(px["wih0"] * bn_scale, py["wih0"] * bn_scale)
    w_in0 = jnp.pad(w_in0, ((0, ROWS - (x_dim + y_dim)), (0, 0)))
    b0 = jnp.pad(_fuse_gate_bias(px["b0"], py["b0"]), ((0, 7), (0, 0)))
    whh0 = _fuse_gates(px["whh0"], py["whh0"])
    wih1 = _fuse_gates(px["wih1"], py["wih1"])
    whh1 = _fuse_gates(px["whh1"], py["whh1"])
    b1 = jnp.pad(_fuse_gate_bias(px["b1"], py["b1"]), ((0, 7), (0, 0)))
    return jnp.concatenate([w_in0, b0, whh0, wih1, whh1, b1], axis=0)


def _pack_encdec_slab(le, dd, y_dim):
    offs, total = _ed_offsets(y_dim)
    slab = jnp.zeros((total, _ED_WIDTH), jnp.float32)

    def put(s, name, val):
        r, n, c = offs[name]
        return s.at[r:r + n, 0:c].set(val.astype(jnp.float32))

    slab = put(slab, "LW1", jnp.concatenate([le["w1x"], le["w1y"]], axis=0))
    slab = put(slab, "LB1", le["b1"])
    slab = put(slab, "LW2", le["w2"])
    slab = put(slab, "LB2", le["b2"])
    slab = put(slab, "LWP", le["wp"])
    slab = put(slab, "LBP", le["bp"])
    slab = put(slab, "LWMV", jnp.concatenate([le["wm"], le["wv"]], axis=1))
    slab = put(slab, "LBMV", jnp.concatenate([le["bm"], le["bv"]], axis=1))
    # decoder target_transform folded into the first decoder layer
    # (exact linear identity: (x@Wt+bt)@W1x + b1 = x@(Wt@W1x) + (bt@W1x+b1)).
    slab = put(slab, "DWXP",
               jnp.concatenate([dd["wt"] @ dd["wd1x"],
                                jnp.zeros_like(dd["wd1x"])], axis=0))
    slab = put(slab, "DB1C", dd["bt"] @ dd["wd1x"] + dd["bd1"])
    slab = put(slab, "DW1Z", dd["wd1z"])
    slab = put(slab, "DW2", dd["wd2"])
    slab = put(slab, "DB2", dd["bd2"])
    slab = put(slab, "DWMS", jnp.concatenate([dd["wm"], dd["ws"]], axis=1))
    slab = put(slab, "DBMS", jnp.concatenate([dd["bm"], dd["bs"]], axis=1))
    return slab


# ---------------------------------------------------------------------------
# Wrapper: packs data + parameters, one pallas_call, unpacks outputs.
# ---------------------------------------------------------------------------
def neural_process_forward(params, context_x, context_y, target_x, target_y):
    B, Tt, x_dim = target_x.shape
    Tc = context_x.shape[1]
    y_dim = target_y.shape[2]
    assert Tt >= Tc, "context is assumed to be a time-prefix of the target grid"
    assert 2 * B <= ROWS and x_dim + y_dim <= ROWS

    f32 = jnp.float32
    # BatchNormSequence(affine=False) eval with default running stats folds to
    # a single scalar scale on the layer-0 input weights.
    # TODO(synk): per-feature trained running mean/var not supported here.
    bn_scale = 1.0 / math.sqrt(1.0 + BN_EPS)

    def pad_t(a):
        return jnp.pad(a, ((0, 0), (0, Tt - Tc), (0, 0)))

    # one packed data tensor, ROWS(=8) rows per timestep:
    #   rows 0:B  -> (context_x | context_y),  rows B:2B -> (target_x | target_y)
    #   rows 2B:8 -> zeros; lanes [0:x_dim | x_dim:x_dim+y_dim | pad]
    xrows = jnp.concatenate([pad_t(context_x), target_x], axis=0)
    yrows = jnp.concatenate([pad_t(context_y), target_y], axis=0)
    lane_pieces = [xrows.astype(f32), yrows.astype(f32)]
    if ROWS - x_dim - y_dim > 0:
        lane_pieces.append(jnp.zeros((2 * B, Tt, ROWS - x_dim - y_dim), f32))
    xy = jnp.concatenate(lane_pieces, axis=-1)            # (2B, Tt, 8)
    xy = jnp.transpose(xy, (1, 0, 2))                     # (Tt, 2B, 8)
    xy_in = jnp.concatenate(
        [xy, jnp.zeros((Tt, ROWS - 2 * B, ROWS), f32)], axis=1
    ).reshape(Tt * ROWS, ROWS)

    lstm_slab = _pack_lstm_slab(params["lstm_x"], params["lstm_y"], bn_scale)
    ed_slab = _pack_encdec_slab(params["latent_enc"], params["decoder"], y_dim)

    kernel = functools.partial(_np_fused_kernel, B=B, Tt=Tt, Tc=Tc,
                               x_dim=x_dim, y_dim=y_dim)
    yhat_pad, loss_row = pl.pallas_call(
        kernel,
        out_shape=(jax.ShapeDtypeStruct((Tt * ROWS, 3 * y_dim), f32),
                   jax.ShapeDtypeStruct((1, 8), f32)),
        in_specs=[_vmem_spec()] * 3,
        out_specs=(_vmem_spec(), _vmem_spec()),
    )(xy_in, lstm_slab, ed_slab)

    # valid decoder rows are rows B:2B of each 8-row timestep block.
    yhat = jnp.transpose(
        yhat_pad.reshape(Tt, ROWS, 3 * y_dim)[:, B:2 * B, :], (1, 0, 2))
    mean = yhat[..., :y_dim]
    log_sigma = yhat[..., y_dim:2 * y_dim]
    sigma = yhat[..., 2 * y_dim:]

    losses = dict(loss=loss_row[0, 0], loss_p=loss_row[0, 1],
                  loss_kl=loss_row[0, 2], loss_mse=loss_row[0, 3],
                  loss_p_weighted=loss_row[0, 4])
    y_pred = mean                     # eval: dist.loc
    extra = dict(log_sigma=log_sigma, y_dist_loc=mean, y_dist_scale=sigma)
    return y_pred, losses, extra


# ---------------------------------------------------------------------------
# Parameters (deterministic synthetic init; shapes follow the module __init__).
# LSTM gate columns are packed (i, f, o, g) per stream — a fixed column
# permutation of PyTorch's (i, f, g, o); transparent for synthetic weights.
# ---------------------------------------------------------------------------
def init_params(key, x_dim, y_dim, hidden=HIDDEN, latent=LATENT):
    keys = iter(jax.random.split(key, 64))

    def nrm(shape, s=0.1):
        return jax.random.normal(next(keys), shape, dtype=jnp.float32) * s

    def lstm_params(d_in):
        return dict(
            wih0=nrm((d_in, 4 * hidden)), whh0=nrm((hidden, 4 * hidden)),
            b0=nrm((1, 4 * hidden)),
            wih1=nrm((hidden, 4 * hidden)), whh1=nrm((hidden, 4 * hidden)),
            b1=nrm((1, 4 * hidden)))

    lstm_x = lstm_params(x_dim)   # nn.LSTM(x_dim, hidden, num_layers=2)
    lstm_y = lstm_params(y_dim)   # nn.LSTM(y_dim, hidden, num_layers=2)

    # LatentEncoder: BatchMLP(2*hidden -> hidden, num_layers=2) + heads.
    latent_enc = dict(
        w1x=nrm((hidden, hidden)), w1y=nrm((hidden, hidden)), b1=nrm((1, hidden)),
        w2=nrm((hidden, hidden)), b2=nrm((1, hidden)),
        wp=nrm((hidden, hidden)), bp=nrm((1, hidden)),
        wm=nrm((hidden, latent)), bm=nrm((1, latent)),
        wv=nrm((hidden, latent)), bv=nrm((1, latent)))

    h2 = hidden + latent  # use_deterministic_path=False
    dec = dict(
        wt=nrm((hidden, hidden)), bt=nrm((1, hidden)),
        wd1z=nrm((latent, h2)), wd1x=nrm((hidden, h2)), bd1=nrm((1, h2)),
        wd2=nrm((h2, h2)), bd2=nrm((1, h2)),
        wm=nrm((h2, y_dim)), bm=nrm((1, y_dim)),
        ws=nrm((h2, y_dim)), bs=nrm((1, y_dim)))

    return dict(lstm_x=lstm_x, lstm_y=lstm_y, latent_enc=latent_enc,
                decoder=dec)


if __name__ == "__main__":
    key = jax.random.PRNGKey(0)
    k_cx, k_cy, k_tx, k_ty, k_par = jax.random.split(key, 5)

    B, Tc, Tt = 2, 6, 8
    x_dim, y_dim = 3, 2

    context_x = jax.random.normal(k_cx, (B, Tc, x_dim), dtype=jnp.float32)
    context_y = jax.random.normal(k_cy, (B, Tc, y_dim), dtype=jnp.float32)
    target_x = jax.random.normal(k_tx, (B, Tt, x_dim), dtype=jnp.float32)
    target_y = jax.random.normal(k_ty, (B, Tt, y_dim), dtype=jnp.float32)

    params = init_params(k_par, x_dim, y_dim)

    fwd = jax.jit(neural_process_forward)
    y_pred, losses, extra = fwd(params, context_x, context_y, target_x, target_y)
    jax.block_until_ready((y_pred, losses, extra))

    assert y_pred.shape == (B, Tt, y_dim)
    assert extra["log_sigma"].shape == (B, Tt, y_dim)
    assert extra["y_dist_scale"].shape == (B, Tt, y_dim)
    assert all(jnp.isfinite(v) for v in losses.values())
    assert bool(jnp.all(jnp.isfinite(y_pred)))
    print("KERNEL_OK")
</pallas_src>

<mosaic_0001>
module attributes {stable_mosaic.version = 11 : i64} {
  func.func @_np_fused_kernel(%arg0: memref<64x8xf32, #tpu.memory_space<vmem>>, %arg1: memref<216x256xf32, #tpu.memory_space<vmem>>, %arg2: memref<440x64xf32, #tpu.memory_space<vmem>>, %arg3: memref<64x6xf32, #tpu.memory_space<vmem>>, %arg4: memref<1x8xf32, #tpu.memory_space<vmem>>) attributes {dimension_semantics = [], scalar_prefetch = 0 : i64, scratch_operands = 0 : i64, tpu.core_type = #tpu.core_type<tc>} {
    %c0 = arith.constant 0 : index
    %c0_0 = arith.constant 0 : index
    %0 = vector.load %arg1[%c0, %c0_0] : memref<216x256xf32, #tpu.memory_space<vmem>>, vector<8x256xf32>
    %c8 = arith.constant 8 : index
    %c0_1 = arith.constant 0 : index
    %1 = vector.load %arg1[%c8, %c0_1] : memref<216x256xf32, #tpu.memory_space<vmem>>, vector<1x256xf32>
    %c16 = arith.constant 16 : index
    %c0_2 = arith.constant 0 : index
    %2 = vector.load %arg1[%c16, %c0_2] : memref<216x256xf32, #tpu.memory_space<vmem>>, vector<64x256xf32>
    %c80 = arith.constant 80 : index
    %c0_3 = arith.constant 0 : index
    %3 = vector.load %arg1[%c80, %c0_3] : memref<216x256xf32, #tpu.memory_space<vmem>>, vector<64x256xf32>
    %c144 = arith.constant 144 : index
    %c0_4 = arith.constant 0 : index
    %4 = vector.load %arg1[%c144, %c0_4] : memref<216x256xf32, #tpu.memory_space<vmem>>, vector<64x256xf32>
    %c208 = arith.constant 208 : index
    %c0_5 = arith.constant 0 : index
    %5 = vector.load %arg1[%c208, %c0_5] : memref<216x256xf32, #tpu.memory_space<vmem>>, vector<1x256xf32>
    %c0_6 = arith.constant 0 : index
    %c0_7 = arith.constant 0 : index
    %6 = vector.load %arg0[%c0_6, %c0_7] : memref<64x8xf32, #tpu.memory_space<vmem>>, vector<64x8xf32>
    %cst = arith.constant dense<0.000000e+00> : vector<64x256xf32>
    %7 = tpu.matmul %6, %0, %cst {dimension_numbers = #tpu.dot_dimension_numbers<[1], [0], [0], [1], [0, 0, 1, 1], [], []>} : vector<64x8xf32>, vector<8x256xf32>, vector<64x256xf32> -> vector<64x256xf32>
    %8 = vector.broadcast %1 : vector<1x256xf32> to vector<64x256xf32>
    %9 = arith.addf %7, %8 : vector<64x256xf32>
    %cst_8 = arith.constant 0.000000e+00 : f32
    %10 = vector.broadcast %cst_8 : f32 to vector<8x64xf32>
    %11 = vector.extract_strided_slice %9 {offsets = [0, 0], sizes = [8, 256], strides = [1, 1]} : vector<64x256xf32> to vector<8x256xf32>
    %cst_9 = arith.constant dense<0.000000e+00> : vector<8x256xf32>
    %12 = tpu.matmul %10, %2, %cst_9 {dimension_numbers = #tpu.dot_dimension_numbers<[1], [0], [0], [1], [0, 0, 1, 1], [], []>} : vector<8x64xf32>, vector<64x256xf32>, vector<8x256xf32> -> vector<8x256xf32>
    %13 = arith.addf %11, %12 : vector<8x256xf32>
    %14 = vector.extract_strided_slice %13 {offsets = [0, 0], sizes = [8, 192], strides = [1, 1]} : vector<8x256xf32> to vector<8x192xf32>
    %15 = arith.negf %14 : vector<8x192xf32>
    %16 = math.exp %15 : vector<8x192xf32>
    %cst_10 = arith.constant 1.000000e+00 : f32
    %17 = vector.broadcast %cst_10 : f32 to vector<8x192xf32>
    %18 = arith.addf %17, %16 : vector<8x192xf32>
    %19 = arith.divf %17, %18 : vector<8x192xf32>
    %20 = vector.extract_strided_slice %19 {offsets = [0, 0], sizes = [8, 64], strides = [1, 1]} : vector<8x192xf32> to vector<8x64xf32>
    %21 = vector.extract_strided_slice %19 {offsets = [0, 64], sizes = [8, 64], strides = [1, 1]} : vector<8x192xf32> to vector<8x64xf32>
    %22 = vector.extract_strided_slice %19 {offsets = [0, 128], sizes = [8, 64], strides = [1, 1]} : vector<8x192xf32> to vector<8x64xf32>
    %23 = vector.extract_strided_slice %13 {offsets = [0, 192], sizes = [8, 64], strides = [1, 1]} : vector<8x256xf32> to vector<8x64xf32>
    %24 = math.tanh %23 : vector<8x64xf32>
    %25 = arith.mulf %21, %10 : vector<8x64xf32>
    %26 = arith.mulf %20, %24 : vector<8x64xf32>
    %27 = arith.addf %25, %26 : vector<8x64xf32>
    %28 = math.tanh %27 : vector<8x64xf32>
    %29 = arith.mulf %22, %28 : vector<8x64xf32>
    %cst_11 = arith.constant dense<0.000000e+00> : vector<8x256xf32>
    %30 = tpu.matmul %29, %3, %cst_11 {dimension_numbers = #tpu.dot_dimension_numbers<[1], [0], [0], [1], [0, 0, 1, 1], [], []>} : vector<8x64xf32>, vector<64x256xf32>, vector<8x256xf32> -> vector<8x256xf32>
    %cst_12 = arith.constant dense<0.000000e+00> : vector<8x256xf32>
    %31 = tpu.matmul %10, %4, %cst_12 {dimension_numbers = #tpu.dot_dimension_numbers<[1], [0], [0], [1], [0, 0, 1, 1], [], []>} : vector<8x64xf32>, vector<64x256xf32>, vector<8x256xf32> -> vector<8x256xf32>
    %32 = arith.addf %30, %31 : vector<8x256xf32>
    %33 = vector.broadcast %5 : vector<1x256xf32> to vector<8x256xf32>
    %34 = arith.addf %32, %33 : vector<8x256xf32>
    %35 = vector.extract_strided_slice %34 {offsets = [0, 0], sizes = [8, 192], strides = [1, 1]} : vector<8x256xf32> to vector<8x192xf32>
    %36 = arith.negf %35 : vector<8x192xf32>
    %37 = math.exp %36 : vector<8x192xf32>
    %cst_13 = arith.constant 1.000000e+00 : f32
    %38 = vector.broadcast %cst_13 : f32 to vector<8x192xf32>
    %39 = arith.addf %38, %37 : vector<8x192xf32>
    %40 = arith.divf %38, %39 : vector<8x192xf32>
    %41 = vector.extract_strided_slice %40 {offsets = [0, 0], sizes = [8, 64], strides = [1, 1]} : vector<8x192xf32> to vector<8x64xf32>
    %42 = vector.extract_strided_slice %40 {offsets = [0, 64], sizes = [8, 64], strides = [1, 1]} : vector<8x192xf32> to vector<8x64xf32>
    %43 = vector.extract_strided_slice %40 {offsets = [0, 128], sizes = [8, 64], strides = [1, 1]} : vector<8x192xf32> to vector<8x64xf32>
    %44 = vector.extract_strided_slice %34 {offsets = [0, 192], sizes = [8, 64], strides = [1, 1]} : vector<8x256xf32> to vector<8x64xf32>
    %45 = math.tanh %44 : vector<8x64xf32>
    %46 = arith.mulf %42, %10 : vector<8x64xf32>
    %47 = arith.mulf %41, %45 : vector<8x64xf32>
    %48 = arith.addf %46, %47 : vector<8x64xf32>
    %49 = math.tanh %48 : vector<8x64xf32>
    %50 = arith.mulf %43, %49 : vector<8x64xf32>
    %51 = vector.extract_strided_slice %9 {offsets = [8, 0], sizes = [8, 256], strides = [1, 1]} : vector<64x256xf32> to vector<8x256xf32>
    %cst_14 = arith.constant dense<0.000000e+00> : vector<8x256xf32>
    %52 = tpu.matmul %29, %2, %cst_14 {dimension_numbers = #tpu.dot_dimension_numbers<[1], [0], [0], [1], [0, 0, 1, 1], [], []>} : vector<8x64xf32>, vector<64x256xf32>, vector<8x256xf32> -> vector<8x256xf32>
    %53 = arith.addf %51, %52 : vector<8x256xf32>
    %54 = vector.extract_strided_slice %53 {offsets = [0, 0], sizes = [8, 192], strides = [1, 1]} : vector<8x256xf32> to vector<8x192xf32>
    %55 = arith.negf %54 : vector<8x192xf32>
    %56 = math.exp %55 : vector<8x192xf32>
    %cst_15 = arith.constant 1.000000e+00 : f32
    %57 = vector.broadcast %cst_15 : f32 to vector<8x192xf32>
    %58 = arith.addf %57, %56 : vector<8x192xf32>
    %59 = arith.divf %57, %58 : vector<8x192xf32>
    %60 = vector.extract_strided_slice %59 {offsets = [0, 0], sizes = [8, 64], strides = [1, 1]} : vector<8x192xf32> to vector<8x64xf32>
    %61 = vector.extract_strided_slice %59 {offsets = [0, 64], sizes = [8, 64], strides = [1, 1]} : vector<8x192xf32> to vector<8x64xf32>
    %62 = vector.extract_strided_slice %59 {offsets = [0, 128], sizes = [8, 64], strides = [1, 1]} : vector<8x192xf32> to vector<8x64xf32>
    %63 = vector.extract_strided_slice %53 {offsets = [0, 192], sizes = [8, 64], strides = [1, 1]} : vector<8x256xf32> to vector<8x64xf32>
    %64 = math.tanh %63 : vector<8x64xf32>
    %65 = arith.mulf %61, %27 : vector<8x64xf32>
    %66 = arith.mulf %60, %64 : vector<8x64xf32>
    %67 = arith.addf %65, %66 : vector<8x64xf32>
    %68 = math.tanh %67 : vector<8x64xf32>
    %69 = arith.mulf %62, %68 : vector<8x64xf32>
    %cst_16 = arith.constant dense<0.000000e+00> : vector<8x256xf32>
    %70 = tpu.matmul %69, %3, %cst_16 {dimension_numbers = #tpu.dot_dimension_numbers<[1], [0], [0], [1], [0, 0, 1, 1], [], []>} : vector<8x64xf32>, vector<64x256xf32>, vector<8x256xf32> -> vector<8x256xf32>
    %cst_17 = arith.constant dense<0.000000e+00> : vector<8x256xf32>
    %71 = tpu.matmul %50, %4, %cst_17 {dimension_numbers = #tpu.dot_dimension_numbers<[1], [0], [0], [1], [0, 0, 1, 1], [], []>} : vector<8x64xf32>, vector<64x256xf32>, vector<8x256xf32> -> vector<8x256xf32>
    %72 = arith.addf %70, %71 : vector<8x256xf32>
    %73 = vector.broadcast %5 : vector<1x256xf32> to vector<8x256xf32>
    %74 = arith.addf %72, %73 : vector<8x256xf32>
    %75 = vector.extract_strided_slice %74 {offsets = [0, 0], sizes = [8, 192], strides = [1, 1]} : vector<8x256xf32> to vector<8x192xf32>
    %76 = arith.negf %75 : vector<8x192xf32>
    %77 = math.exp %76 : vector<8x192xf32>
    %cst_18 = arith.constant 1.000000e+00 : f32
    %78 = vector.broadcast %cst_18 : f32 to vector<8x192xf32>
    %79 = arith.addf %78, %77 : vector<8x192xf32>
    %80 = arith.divf %78, %79 : vector<8x192xf32>
    %81 = vector.extract_strided_slice %80 {offsets = [0, 0], sizes = [8, 64], strides = [1, 1]} : vector<8x192xf32> to vector<8x64xf32>
    %82 = vector.extract_strided_slice %80 {offsets = [0, 64], sizes = [8, 64], strides = [1, 1]} : vector<8x192xf32> to vector<8x64xf32>
    %83 = vector.extract_strided_slice %80 {offsets = [0, 128], sizes = [8, 64], strides = [1, 1]} : vector<8x192xf32> to vector<8x64xf32>
    %84 = vector.extract_strided_slice %74 {offsets = [0, 192], sizes = [8, 64], strides = [1, 1]} : vector<8x256xf32> to vector<8x64xf32>
    %85 = math.tanh %84 : vector<8x64xf32>
    %86 = arith.mulf %82, %48 : vector<8x64xf32>
    %87 = arith.mulf %81, %85 : vector<8x64xf32>
    %88 = arith.addf %86, %87 : vector<8x64xf32>
    %89 = math.tanh %88 : vector<8x64xf32>
    %90 = arith.mulf %83, %89 : vector<8x64xf32>
    %91 = vector.extract_strided_slice %9 {offsets = [16, 0], sizes = [8, 256], strides = [1, 1]} : vector<64x256xf32> to vector<8x256xf32>
    %cst_19 = arith.constant dense<0.000000e+00> : vector<8x256xf32>
    %92 = tpu.matmul %69, %2, %cst_19 {dimension_numbers = #tpu.dot_dimension_numbers<[1], [0], [0], [1], [0, 0, 1, 1], [], []>} : vector<8x64xf32>, vector<64x256xf32>, vector<8x256xf32> -> vector<8x256xf32>
    %93 = arith.addf %91, %92 : vector<8x256xf32>
    %94 = vector.extract_strided_slice %93 {offsets = [0, 0], sizes = [8, 192], strides = [1, 1]} : vector<8x256xf32> to vector<8x192xf32>
    %95 = arith.negf %94 : vector<8x192xf32>
    %96 = math.exp %95 : vector<8x192xf32>
    %cst_20 = arith.constant 1.000000e+00 : f32
    %97 = vector.broadcast %cst_20 : f32 to vector<8x192xf32>
    %98 = arith.addf %97, %96 : vector<8x192xf32>
    %99 = arith.divf %97, %98 : vector<8x192xf32>
    %100 = vector.extract_strided_slice %99 {offsets = [0, 0], sizes = [8, 64], strides = [1, 1]} : vector<8x192xf32> to vector<8x64xf32>
    %101 = vector.extract_strided_slice %99 {offsets = [0, 64], sizes = [8, 64], strides = [1, 1]} : vector<8x192xf32> to vector<8x64xf32>
    %102 = vector.extract_strided_slice %99 {offsets = [0, 128], sizes = [8, 64], strides = [1, 1]} : vector<8x192xf32> to vector<8x64xf32>
    %103 = vector.extract_strided_slice %93 {offsets = [0, 192], sizes = [8, 64], strides = [1, 1]} : vector<8x256xf32> to vector<8x64xf32>
    %104 = math.tanh %103 : vector<8x64xf32>
    %105 = arith.mulf %101, %67 : vector<8x64xf32>
    %106 = arith.mulf %100, %104 : vector<8x64xf32>
    %107 = arith.addf %105, %106 : vector<8x64xf32>
    %108 = math.tanh %107 : vector<8x64xf32>
    %109 = arith.mulf %102, %108 : vector<8x64xf32>
    %cst_21 = arith.constant dense<0.000000e+00> : vector<8x256xf32>
    %110 = tpu.matmul %109, %3, %cst_21 {dimension_numbers = #tpu.dot_dimension_numbers<[1], [0], [0], [1], [0, 0, 1, 1], [], []>} : vector<8x64xf32>, vector<64x256xf32>, vector<8x256xf32> -> vector<8x256xf32>
    %cst_22 = arith.constant dense<0.000000e+00> : vector<8x256xf32>
    %111 = tpu.matmul %90, %4, %cst_22 {dimension_numbers = #tpu.dot_dimension_numbers<[1], [0], [0], [1], [0, 0, 1, 1], [], []>} : vector<8x64xf32>, vector<64x256xf32>, vector<8x256xf32> -> vector<8x256xf32>
    %112 = arith.addf %110, %111 : vector<8x256xf32>
    %113 = vector.broadcast %5 : vector<1x256xf32> to vector<8x256xf32>
    %114 = arith.addf %112, %113 : vector<8x256xf32>
    %115 = vector.extract_strided_slice %114 {offsets = [0, 0], sizes = [8, 192], strides = [1, 1]} : vector<8x256xf32> to vector<8x192xf32>
    %116 = arith.negf %115 : vector<8x192xf32>
    %117 = math.exp %116 : vector<8x192xf32>
    %cst_23 = arith.constant 1.000000e+00 : f32
    %118 = vector.broadcast %cst_23 : f32 to vector<8x192xf32>
    %119 = arith.addf %118, %117 : vector<8x192xf32>
    %120 = arith.divf %118, %119 : vector<8x192xf32>
    %121 = vector.extract_strided_slice %120 {offsets = [0, 0], sizes = [8, 64], strides = [1, 1]} : vector<8x192xf32> to vector<8x64xf32>
    %122 = vector.extract_strided_slice %120 {offsets = [0, 64], sizes = [8, 64], strides = [1, 1]} : vector<8x192xf32> to vector<8x64xf32>
    %123 = vector.extract_strided_slice %120 {offsets = [0, 128], sizes = [8, 64], strides = [1, 1]} : vector<8x192xf32> to vector<8x64xf32>
    %124 = vector.extract_strided_slice %114 {offsets = [0, 192], sizes = [8, 64], strides = [1, 1]} : vector<8x256xf32> to vector<8x64xf32>
    %125 = math.tanh %124 : vector<8x64xf32>
    %126 = arith.mulf %122, %88 : vector<8x64xf32>
    %127 = arith.mulf %121, %125 : vector<8x64xf32>
    %128 = arith.addf %126, %127 : vector<8x64xf32>
    %129 = math.tanh %128 : vector<8x64xf32>
    %130 = arith.mulf %123, %129 : vector<8x64xf32>
    %131 = vector.extract_strided_slice %9 {offsets = [24, 0], sizes = [8, 256], strides = [1, 1]} : vector<64x256xf32> to vector<8x256xf32>
    %cst_24 = arith.constant dense<0.000000e+00> : vector<8x256xf32>
    %132 = tpu.matmul %109, %2, %cst_24 {dimension_numbers = #tpu.dot_dimension_numbers<[1], [0], [0], [1], [0, 0, 1, 1], [], []>} : vector<8x64xf32>, vector<64x256xf32>, vector<8x256xf32> -> vector<8x256xf32>
    %133 = arith.addf %131, %132 : vector<8x256xf32>
    %134 = vector.extract_strided_slice %133 {offsets = [0, 0], sizes = [8, 192], strides = [1, 1]} : vector<8x256xf32> to vector<8x192xf32>
    %135 = arith.negf %134 : vector<8x192xf32>
    %136 = math.exp %135 : vector<8x192xf32>
    %cst_25 = arith.constant 1.000000e+00 : f32
    %137 = vector.broadcast %cst_25 : f32 to vector<8x192xf32>
    %138 = arith.addf %137, %136 : vector<8x192xf32>
    %139 = arith.divf %137, %138 : vector<8x192xf32>
    %140 = vector.extract_strided_slice %139 {offsets = [0, 0], sizes = [8, 64], strides = [1, 1]} : vector<8x192xf32> to vector<8x64xf32>
    %141 = vector.extract_strided_slice %139 {offsets = [0, 64], sizes = [8, 64], strides = [1, 1]} : vector<8x192xf32> to vector<8x64xf32>
    %142 = vector.extract_strided_slice %139 {offsets = [0, 128], sizes = [8, 64], strides = [1, 1]} : vector<8x192xf32> to vector<8x64xf32>
    %143 = vector.extract_strided_slice %133 {offsets = [0, 192], sizes = [8, 64], strides = [1, 1]} : vector<8x256xf32> to vector<8x64xf32>
    %144 = math.tanh %143 : vector<8x64xf32>
    %145 = arith.mulf %141, %107 : vector<8x64xf32>
    %146 = arith.mulf %140, %144 : vector<8x64xf32>
    %147 = arith.addf %145, %146 : vector<8x64xf32>
    %148 = math.tanh %147 : vector<8x64xf32>
    %149 = arith.mulf %142, %148 : vector<8x64xf32>
    %cst_26 = arith.constant dense<0.000000e+00> : vector<8x256xf32>
    %150 = tpu.matmul %149, %3, %cst_26 {dimension_numbers = #tpu.dot_dimension_numbers<[1], [0], [0], [1], [0, 0, 1, 1], [], []>} : vector<8x64xf32>, vector<64x256xf32>, vector<8x256xf32> -> vector<8x256xf32>
    %cst_27 = arith.constant dense<0.000000e+00> : vector<8x256xf32>
    %151 = tpu.matmul %130, %4, %cst_27 {dimension_numbers = #tpu.dot_dimension_numbers<[1], [0], [0], [1], [0, 0, 1, 1], [], []>} : vector<8x64xf32>, vector<64x256xf32>, vector<8x256xf32> -> vector<8x256xf32>
    %152 = arith.addf %150, %151 : vector<8x256xf32>
    %153 = vector.broadcast %5 : vector<1x256xf32> to vector<8x256xf32>
    %154 = arith.addf %152, %153 : vector<8x256xf32>
    %155 = vector.extract_strided_slice %154 {offsets = [0, 0], sizes = [8, 192], strides = [1, 1]} : vector<8x256xf32> to vector<8x192xf32>
    %156 = arith.negf %155 : vector<8x192xf32>
    %157 = math.exp %156 : vector<8x192xf32>
    %cst_28 = arith.constant 1.000000e+00 : f32
    %158 = vector.broadcast %cst_28 : f32 to vector<8x192xf32>
    %159 = arith.addf %158, %157 : vector<8x192xf32>
    %160 = arith.divf %158, %159 : vector<8x192xf32>
    %161 = vector.extract_strided_slice %160 {offsets = [0, 0], sizes = [8, 64], strides = [1, 1]} : vector<8x192xf32> to vector<8x64xf32>
    %162 = vector.extract_strided_slice %160 {offsets = [0, 64], sizes = [8, 64], strides = [1, 1]} : vector<8x192xf32> to vector<8x64xf32>
    %163 = vector.extract_strided_slice %160 {offsets = [0, 128], sizes = [8, 64], strides = [1, 1]} : vector<8x192xf32> to vector<8x64xf32>
    %164 = vector.extract_strided_slice %154 {offsets = [0, 192], sizes = [8, 64], strides = [1, 1]} : vector<8x256xf32> to vector<8x64xf32>
    %165 = math.tanh %164 : vector<8x64xf32>
    %166 = arith.mulf %162, %128 : vector<8x64xf32>
    %167 = arith.mulf %161, %165 : vector<8x64xf32>
    %168 = arith.addf %166, %167 : vector<8x64xf32>
    %169 = math.tanh %168 : vector<8x64xf32>
    %170 = arith.mulf %163, %169 : vector<8x64xf32>
    %171 = vector.extract_strided_slice %9 {offsets = [32, 0], sizes = [8, 256], strides = [1, 1]} : vector<64x256xf32> to vector<8x256xf32>
    %cst_29 = arith.constant dense<0.000000e+00> : vector<8x256xf32>
    %172 = tpu.matmul %149, %2, %cst_29 {dimension_numbers = #tpu.dot_dimension_numbers<[1], [0], [0], [1], [0, 0, 1, 1], [], []>} : vector<8x64xf32>, vector<64x256xf32>, vector<8x256xf32> -> vector<8x256xf32>
    %173 = arith.addf %171, %172 : vector<8x256xf32>
    %174 = vector.extract_strided_slice %173 {offsets = [0, 0], sizes = [8, 192], strides = [1, 1]} : vector<8x256xf32> to vector<8x192xf32>
    %175 = arith.negf %174 : vector<8x192xf32>
    %176 = math.exp %175 : vector<8x192xf32>
    %cst_30 = arith.constant 1.000000e+00 : f32
    %177 = vector.broadcast %cst_30 : f32 to vector<8x192xf32>
    %178 = arith.addf %177, %176 : vector<8x192xf32>
    %179 = arith.divf %177, %178 : vector<8x192xf32>
    %180 = vector.extract_strided_slice %179 {offsets = [0, 0], sizes = [8, 64], strides = [1, 1]} : vector<8x192xf32> to vector<8x64xf32>
    %181 = vector.extract_strided_slice %179 {offsets = [0, 64], sizes = [8, 64], strides = [1, 1]} : vector<8x192xf32> to vector<8x64xf32>
    %182 = vector.extract_strided_slice %179 {offsets = [0, 128], sizes = [8, 64], strides = [1, 1]} : vector<8x192xf32> to vector<8x64xf32>
    %183 = vector.extract_strided_slice %173 {offsets = [0, 192], sizes = [8, 64], strides = [1, 1]} : vector<8x256xf32> to vector<8x64xf32>
    %184 = math.tanh %183 : vector<8x64xf32>
    %185 = arith.mulf %181, %147 : vector<8x64xf32>
    %186 = arith.mulf %180, %184 : vector<8x64xf32>
    %187 = arith.addf %185, %186 : vector<8x64xf32>
    %188 = math.tanh %187 : vector<8x64xf32>
    %189 = arith.mulf %182, %188 : vector<8x64xf32>
    %cst_31 = arith.constant dense<0.000000e+00> : vector<8x256xf32>
    %190 = tpu.matmul %189, %3, %cst_31 {dimension_numbers = #tpu.dot_dimension_numbers<[1], [0], [0], [1], [0, 0, 1, 1], [], []>} : vector<8x64xf32>, vector<64x256xf32>, vector<8x256xf32> -> vector<8x256xf32>
    %cst_32 = arith.constant dense<0.000000e+00> : vector<8x256xf32>
    %191 = tpu.matmul %170, %4, %cst_32 {dimension_numbers = #tpu.dot_dimension_numbers<[1], [0], [0], [1], [0, 0, 1, 1], [], []>} : vector<8x64xf32>, vector<64x256xf32>, vector<8x256xf32> -> vector<8x256xf32>
    %192 = arith.addf %190, %191 : vector<8x256xf32>
    %193 = vector.broadcast %5 : vector<1x256xf32> to vector<8x256xf32>
    %194 = arith.addf %192, %193 : vector<8x256xf32>
    %195 = vector.extract_strided_slice %194 {offsets = [0, 0], sizes = [8, 192], strides = [1, 1]} : vector<8x256xf32> to vector<8x192xf32>
    %196 = arith.negf %195 : vector<8x192xf32>
    %197 = math.exp %196 : vector<8x192xf32>
    %cst_33 = arith.constant 1.000000e+00 : f32
    %198 = vector.broadcast %cst_33 : f32 to vector<8x192xf32>
    %199 = arith.addf %198, %197 : vector<8x192xf32>
    %200 = arith.divf %198, %199 : vector<8x192xf32>
    %201 = vector.extract_strided_slice %200 {offsets = [0, 0], sizes = [8, 64], strides = [1, 1]} : vector<8x192xf32> to vector<8x64xf32>
    %202 = vector.extract_strided_slice %200 {offsets = [0, 64], sizes = [8, 64], strides = [1, 1]} : vector<8x192xf32> to vector<8x64xf32>
    %203 = vector.extract_strided_slice %200 {offsets = [0, 128], sizes = [8, 64], strides = [1, 1]} : vector<8x192xf32> to vector<8x64xf32>
    %204 = vector.extract_strided_slice %194 {offsets = [0, 192], sizes = [8, 64], strides = [1, 1]} : vector<8x256xf32> to vector<8x64xf32>
    %205 = math.tanh %204 : vector<8x64xf32>
    %206 = arith.mulf %202, %168 : vector<8x64xf32>
    %207 = arith.mulf %201, %205 : vector<8x64xf32>
    %208 = arith.addf %206, %207 : vector<8x64xf32>
    %209 = math.tanh %208 : vector<8x64xf32>
    %210 = arith.mulf %203, %209 : vector<8x64xf32>
    %211 = vector.extract_strided_slice %9 {offsets = [40, 0], sizes = [8, 256], strides = [1, 1]} : vector<64x256xf32> to vector<8x256xf32>
    %cst_34 = arith.constant dense<0.000000e+00> : vector<8x256xf32>
    %212 = tpu.matmul %189, %2, %cst_34 {dimension_numbers = #tpu.dot_dimension_numbers<[1], [0], [0], [1], [0, 0, 1, 1], [], []>} : vector<8x64xf32>, vector<64x256xf32>, vector<8x256xf32> -> vector<8x256xf32>
    %213 = arith.addf %211, %212 : vector<8x256xf32>
    %214 = vector.extract_strided_slice %213 {offsets = [0, 0], sizes = [8, 192], strides = [1, 1]} : vector<8x256xf32> to vector<8x192xf32>
    %215 = arith.negf %214 : vector<8x192xf32>
    %216 = math.exp %215 : vector<8x192xf32>
    %cst_35 = arith.constant 1.000000e+00 : f32
    %217 = vector.broadcast %cst_35 : f32 to vector<8x192xf32>
    %218 = arith.addf %217, %216 : vector<8x192xf32>
    %219 = arith.divf %217, %218 : vector<8x192xf32>
    %220 = vector.extract_strided_slice %219 {offsets = [0, 0], sizes = [8, 64], strides = [1, 1]} : vector<8x192xf32> to vector<8x64xf32>
    %221 = vector.extract_strided_slice %219 {offsets = [0, 64], sizes = [8, 64], strides = [1, 1]} : vector<8x192xf32> to vector<8x64xf32>
    %222 = vector.extract_strided_slice %219 {offsets = [0, 128], sizes = [8, 64], strides = [1, 1]} : vector<8x192xf32> to vector<8x64xf32>
    %223 = vector.extract_strided_slice %213 {offsets = [0, 192], sizes = [8, 64], strides = [1, 1]} : vector<8x256xf32> to vector<8x64xf32>
    %224 = math.tanh %223 : vector<8x64xf32>
    %225 = arith.mulf %221, %187 : vector<8x64xf32>
    %226 = arith.mulf %220, %224 : vector<8x64xf32>
    %227 = arith.addf %225, %226 : vector<8x64xf32>
    %228 = math.tanh %227 : vector<8x64xf32>
    %229 = arith.mulf %222, %228 : vector<8x64xf32>
    %cst_36 = arith.constant dense<0.000000e+00> : vector<8x256xf32>
    %230 = tpu.matmul %229, %3, %cst_36 {dimension_numbers = #tpu.dot_dimension_numbers<[1], [0], [0], [1], [0, 0, 1, 1], [], []>} : vector<8x64xf32>, vector<64x256xf32>, vector<8x256xf32> -> vector<8x256xf32>
    %cst_37 = arith.constant dense<0.000000e+00> : vector<8x256xf32>
    %231 = tpu.matmul %210, %4, %cst_37 {dimension_numbers = #tpu.dot_dimension_numbers<[1], [0], [0], [1], [0, 0, 1, 1], [], []>} : vector<8x64xf32>, vector<64x256xf32>, vector<8x256xf32> -> vector<8x256xf32>
    %232 = arith.addf %230, %231 : vector<8x256xf32>
    %233 = vector.broadcast %5 : vector<1x256xf32> to vector<8x256xf32>
    %234 = arith.addf %232, %233 : vector<8x256xf32>
    %235 = vector.extract_strided_slice %234 {offsets = [0, 0], sizes = [8, 192], strides = [1, 1]} : vector<8x256xf32> to vector<8x192xf32>
    %236 = arith.negf %235 : vector<8x192xf32>
    %237 = math.exp %236 : vector<8x192xf32>
    %cst_38 = arith.constant 1.000000e+00 : f32
    %238 = vector.broadcast %cst_38 : f32 to vector<8x192xf32>
    %239 = arith.addf %238, %237 : vector<8x192xf32>
    %240 = arith.divf %238, %239 : vector<8x192xf32>
    %241 = vector.extract_strided_slice %240 {offsets = [0, 0], sizes = [8, 64], strides = [1, 1]} : vector<8x192xf32> to vector<8x64xf32>
    %242 = vector.extract_strided_slice %240 {offsets = [0, 64], sizes = [8, 64], strides = [1, 1]} : vector<8x192xf32> to vector<8x64xf32>
    %243 = vector.extract_strided_slice %240 {offsets = [0, 128], sizes = [8, 64], strides = [1, 1]} : vector<8x192xf32> to vector<8x64xf32>
    %244 = vector.extract_strided_slice %234 {offsets = [0, 192], sizes = [8, 64], strides = [1, 1]} : vector<8x256xf32> to vector<8x64xf32>
    %245 = math.tanh %244 : vector<8x64xf32>
    %246 = arith.mulf %242, %208 : vector<8x64xf32>
    %247 = arith.mulf %241, %245 : vector<8x64xf32>
    %248 = arith.addf %246, %247 : vector<8x64xf32>
    %249 = math.tanh %248 : vector<8x64xf32>
    %250 = arith.mulf %243, %249 : vector<8x64xf32>
    %251 = vector.extract_strided_slice %9 {offsets = [48, 0], sizes = [8, 256], strides = [1, 1]} : vector<64x256xf32> to vector<8x256xf32>
    %cst_39 = arith.constant dense<0.000000e+00> : vector<8x256xf32>
    %252 = tpu.matmul %229, %2, %cst_39 {dimension_numbers = #tpu.dot_dimension_numbers<[1], [0], [0], [1], [0, 0, 1, 1], [], []>} : vector<8x64xf32>, vector<64x256xf32>, vector<8x256xf32> -> vector<8x256xf32>
    %253 = arith.addf %251, %252 : vector<8x256xf32>
    %254 = vector.extract_strided_slice %253 {offsets = [0, 0], sizes = [8, 192], strides = [1, 1]} : vector<8x256xf32> to vector<8x192xf32>
    %255 = arith.negf %254 : vector<8x192xf32>
    %256 = math.exp %255 : vector<8x192xf32>
    %cst_40 = arith.constant 1.000000e+00 : f32
    %257 = vector.broadcast %cst_40 : f32 to vector<8x192xf32>
    %258 = arith.addf %257, %256 : vector<8x192xf32>
    %259 = arith.divf %257, %258 : vector<8x192xf32>
    %260 = vector.extract_strided_slice %259 {offsets = [0, 0], sizes = [8, 64], strides = [1, 1]} : vector<8x192xf32> to vector<8x64xf32>
    %261 = vector.extract_strided_slice %259 {offsets = [0, 64], sizes = [8, 64], strides = [1, 1]} : vector<8x192xf32> to vector<8x64xf32>
    %262 = vector.extract_strided_slice %259 {offsets = [0, 128], sizes = [8, 64], strides = [1, 1]} : vector<8x192xf32> to vector<8x64xf32>
    %263 = vector.extract_strided_slice %253 {offsets = [0, 192], sizes = [8, 64], strides = [1, 1]} : vector<8x256xf32> to vector<8x64xf32>
    %264 = math.tanh %263 : vector<8x64xf32>
    %265 = arith.mulf %261, %227 : vector<8x64xf32>
    %266 = arith.mulf %260, %264 : vector<8x64xf32>
    %267 = arith.addf %265, %266 : vector<8x64xf32>
    %268 = math.tanh %267 : vector<8x64xf32>
    %269 = arith.mulf %262, %268 : vector<8x64xf32>
    %cst_41 = arith.constant dense<0.000000e+00> : vector<8x256xf32>
    %270 = tpu.matmul %269, %3, %cst_41 {dimension_numbers = #tpu.dot_dimension_numbers<[1], [0], [0], [1], [0, 0, 1, 1], [], []>} : vector<8x64xf32>, vector<64x256xf32>, vector<8x256xf32> -> vector<8x256xf32>
    %cst_42 = arith.constant dense<0.000000e+00> : vector<8x256xf32>
    %271 = tpu.matmul %250, %4, %cst_42 {dimension_numbers = #tpu.dot_dimension_numbers<[1], [0], [0], [1], [0, 0, 1, 1], [], []>} : vector<8x64xf32>, vector<64x256xf32>, vector<8x256xf32> -> vector<8x256xf32>
    %272 = arith.addf %270, %271 : vector<8x256xf32>
    %273 = vector.broadcast %5 : vector<1x256xf32> to vector<8x256xf32>
    %274 = arith.addf %272, %273 : vector<8x256xf32>
    %275 = vector.extract_strided_slice %274 {offsets = [0, 0], sizes = [8, 192], strides = [1, 1]} : vector<8x256xf32> to vector<8x192xf32>
    %276 = arith.negf %275 : vector<8x192xf32>
    %277 = math.exp %276 : vector<8x192xf32>
    %cst_43 = arith.constant 1.000000e+00 : f32
    %278 = vector.broadcast %cst_43 : f32 to vector<8x192xf32>
    %279 = arith.addf %278, %277 : vector<8x192xf32>
    %280 = arith.divf %278, %279 : vector<8x192xf32>
    %281 = vector.extract_strided_slice %280 {offsets = [0, 0], sizes = [8, 64], strides = [1, 1]} : vector<8x192xf32> to vector<8x64xf32>
    %282 = vector.extract_strided_slice %280 {offsets = [0, 64], sizes = [8, 64], strides = [1, 1]} : vector<8x192xf32> to vector<8x64xf32>
    %283 = vector.extract_strided_slice %280 {offsets = [0, 128], sizes = [8, 64], strides = [1, 1]} : vector<8x192xf32> to vector<8x64xf32>
    %284 = vector.extract_strided_slice %274 {offsets = [0, 192], sizes = [8, 64], strides = [1, 1]} : vector<8x256xf32> to vector<8x64xf32>
    %285 = math.tanh %284 : vector<8x64xf32>
    %286 = arith.mulf %282, %248 : vector<8x64xf32>
    %287 = arith.mulf %281, %285 : vector<8x64xf32>
    %288 = arith.addf %286, %287 : vector<8x64xf32>
    %289 = math.tanh %288 : vector<8x64xf32>
    %290 = arith.mulf %283, %289 : vector<8x64xf32>
    %291 = vector.extract_strided_slice %9 {offsets = [56, 0], sizes = [8, 256], strides = [1, 1]} : vector<64x256xf32> to vector<8x256xf32>
    %cst_44 = arith.constant dense<0.000000e+00> : vector<8x256xf32>
    %292 = tpu.matmul %269, %2, %cst_44 {dimension_numbers = #tpu.dot_dimension_numbers<[1], [0], [0], [1], [0, 0, 1, 1], [], []>} : vector<8x64xf32>, vector<64x256xf32>, vector<8x256xf32> -> vector<8x256xf32>
    %293 = arith.addf %291, %292 : vector<8x256xf32>
    %294 = vector.extract_strided_slice %293 {offsets = [0, 0], sizes = [8, 192], strides = [1, 1]} : vector<8x256xf32> to vector<8x192xf32>
    %295 = arith.negf %294 : vector<8x192xf32>
    %296 = math.exp %295 : vector<8x192xf32>
    %cst_45 = arith.constant 1.000000e+00 : f32
    %297 = vector.broadcast %cst_45 : f32 to vector<8x192xf32>
    %298 = arith.addf %297, %296 : vector<8x192xf32>
    %299 = arith.divf %297, %298 : vector<8x192xf32>
    %300 = vector.extract_strided_slice %299 {offsets = [0, 0], sizes = [8, 64], strides = [1, 1]} : vector<8x192xf32> to vector<8x64xf32>
    %301 = vector.extract_strided_slice %299 {offsets = [0, 64], sizes = [8, 64], strides = [1, 1]} : vector<8x192xf32> to vector<8x64xf32>
    %302 = vector.extract_strided_slice %299 {offsets = [0, 128], sizes = [8, 64], strides = [1, 1]} : vector<8x192xf32> to vector<8x64xf32>
    %303 = vector.extract_strided_slice %293 {offsets = [0, 192], sizes = [8, 64], strides = [1, 1]} : vector<8x256xf32> to vector<8x64xf32>
    %304 = math.tanh %303 : vector<8x64xf32>
    %305 = arith.mulf %301, %267 : vector<8x64xf32>
    %306 = arith.mulf %300, %304 : vector<8x64xf32>
    %307 = arith.addf %305, %306 : vector<8x64xf32>
    %308 = math.tanh %307 : vector<8x64xf32>
    %309 = arith.mulf %302, %308 : vector<8x64xf32>
    %cst_46 = arith.constant dense<0.000000e+00> : vector<8x256xf32>
    %310 = tpu.matmul %309, %3, %cst_46 {dimension_numbers = #tpu.dot_dimension_numbers<[1], [0], [0], [1], [0, 0, 1, 1], [], []>} : vector<8x64xf32>, vector<64x256xf32>, vector<8x256xf32> -> vector<8x256xf32>
    %cst_47 = arith.constant dense<0.000000e+00> : vector<8x256xf32>
    %311 = tpu.matmul %290, %4, %cst_47 {dimension_numbers = #tpu.dot_dimension_numbers<[1], [0], [0], [1], [0, 0, 1, 1], [], []>} : vector<8x64xf32>, vector<64x256xf32>, vector<8x256xf32> -> vector<8x256xf32>
    %312 = arith.addf %310, %311 : vector<8x256xf32>
    %313 = vector.broadcast %5 : vector<1x256xf32> to vector<8x256xf32>
    %314 = arith.addf %312, %313 : vector<8x256xf32>
    %315 = vector.extract_strided_slice %314 {offsets = [0, 0], sizes = [8, 192], strides = [1, 1]} : vector<8x256xf32> to vector<8x192xf32>
    %316 = arith.negf %315 : vector<8x192xf32>
    %317 = math.exp %316 : vector<8x192xf32>
    %cst_48 = arith.constant 1.000000e+00 : f32
    %318 = vector.broadcast %cst_48 : f32 to vector<8x192xf32>
    %319 = arith.addf %318, %317 : vector<8x192xf32>
    %320 = arith.divf %318, %319 : vector<8x192xf32>
    %321 = vector.extract_strided_slice %320 {offsets = [0, 0], sizes = [8, 64], strides = [1, 1]} : vector<8x192xf32> to vector<8x64xf32>
    %322 = vector.extract_strided_slice %320 {offsets = [0, 64], sizes = [8, 64], strides = [1, 1]} : vector<8x192xf32> to vector<8x64xf32>
    %323 = vector.extract_strided_slice %320 {offsets = [0, 128], sizes = [8, 64], strides = [1, 1]} : vector<8x192xf32> to vector<8x64xf32>
    %324 = vector.extract_strided_slice %314 {offsets = [0, 192], sizes = [8, 64], strides = [1, 1]} : vector<8x256xf32> to vector<8x64xf32>
    %325 = math.tanh %324 : vector<8x64xf32>
    %326 = arith.mulf %322, %288 : vector<8x64xf32>
    %327 = arith.mulf %321, %325 : vector<8x64xf32>
    %328 = arith.addf %326, %327 : vector<8x64xf32>
    %329 = math.tanh %328 : vector<8x64xf32>
    %330 = arith.mulf %323, %329 : vector<8x64xf32>
    %331 = tpu.concatenate %50, %90, %130, %170, %210, %250, %290, %330 in 0 : vector<8x64xf32>, vector<8x64xf32>, vector<8x64xf32>, vector<8x64xf32>, vector<8x64xf32>, vector<8x64xf32>, vector<8x64xf32>, vector<8x64xf32> -> vector<64x64xf32>
    %c0_49 = arith.constant 0 : index
    %c0_50 = arith.constant 0 : index
    %332 = vector.load %arg2[%c0_49, %c0_50] : memref<440x64xf32, #tpu.memory_space<vmem>>, vector<64x32xf32>
    %cst_51 = arith.constant dense<0.000000e+00> : vector<64x32xf32>
    %333 = tpu.matmul %331, %332, %cst_51 {dimension_numbers = #tpu.dot_dimension_numbers<[1], [0], [0], [1], [0, 0, 1, 1], [], []>} : vector<64x64xf32>, vector<64x32xf32>, vector<64x32xf32> -> vector<64x32xf32>
    %c64 = arith.constant 64 : index
    %c0_52 = arith.constant 0 : index
    %334 = vector.load %arg2[%c64, %c0_52] : memref<440x64xf32, #tpu.memory_space<vmem>>, vector<1x32xf32>
    %335 = vector.broadcast %334 : vector<1x32xf32> to vector<64x32xf32>
    %336 = arith.addf %333, %335 : vector<64x32xf32>
    %cst_53 = arith.constant 0.000000e+00 : f32
    %337 = vector.broadcast %cst_53 : f32 to vector<64x32xf32>
    %338 = arith.maximumf %336, %337 : vector<64x32xf32>
    %c72 = arith.constant 72 : index
    %c0_54 = arith.constant 0 : index
    %339 = vector.load %arg2[%c72, %c0_54] : memref<440x64xf32, #tpu.memory_space<vmem>>, vector<32x32xf32>
    %cst_55 = arith.constant dense<0.000000e+00> : vector<64x32xf32>
    %340 = tpu.matmul %338, %339, %cst_55 {dimension_numbers = #tpu.dot_dimension_numbers<[1], [0], [0], [1], [0, 0, 1, 1], [], []>} : vector<64x32xf32>, vector<32x32xf32>, vector<64x32xf32> -> vector<64x32xf32>
    %c104 = arith.constant 104 : index
    %c0_56 = arith.constant 0 : index
    %341 = vector.load %arg2[%c104, %c0_56] : memref<440x64xf32, #tpu.memory_space<vmem>>, vector<1x32xf32>
    %342 = vector.broadcast %341 : vector<1x32xf32> to vector<64x32xf32>
    %343 = arith.addf %340, %342 : vector<64x32xf32>
    %344 = tpu.iota {dimensions = array<i32: 0>} : vector<4x64xi32>
    %345 = tpu.iota {dimensions = array<i32: 1>} : vector<4x64xi32>
    %c7_i32 = arith.constant 7 : i32
    %346 = vector.broadcast %c7_i32 : i32 to vector<4x64xi32>
    %347 = arith.andi %345, %346 : vector<4x64xi32>
    %348 = arith.cmpi eq, %347, %344 : vector<4x64xi32>
    %c3_i32 = arith.constant 3 : i32
    %349 = vector.broadcast %c3_i32 : i32 to vector<4x64xi32>
    %350 = arith.shrsi %345, %349 : vector<4x64xi32>
    %c2_i32 = arith.constant 2 : i32
    %351 = vector.broadcast %c2_i32 : i32 to vector<4x64xi32>
    %352 = arith.cmpi slt, %344, %351 : vector<4x64xi32>
    %c6_i32 = arith.constant 6 : i32
    %353 = vector.broadcast %c6_i32 : i32 to vector<4x64xi32>
    %354 = arith.cmpi slt, %350, %353 : vector<4x64xi32>
    %cst_57 = arith.constant 0.166666672 : f32
    %cst_58 = arith.constant 0.000000e+00 : f32
    %355 = vector.broadcast %cst_57 : f32 to vector<4x64xf32>
    %356 = vector.broadcast %cst_58 : f32 to vector<4x64xf32>
    %357 = arith.select %354, %355, %356 : vector<4x64xi1>, vector<4x64xf32>
    %cst_59 = arith.constant 1.250000e-01 : f32
    %358 = vector.broadcast %cst_59 : f32 to vector<4x64xf32>
    %359 = arith.select %352, %357, %358 : vector<4x64xi1>, vector<4x64xf32>
    %cst_60 = arith.constant 0.000000e+00 : f32
    %360 = vector.broadcast %cst_60 : f32 to vector<4x64xf32>
    %361 = arith.select %348, %359, %360 : vector<4x64xi1>, vector<4x64xf32>
    %cst_61 = arith.constant dense<0.000000e+00> : vector<4x32xf32>
    %362 = tpu.matmul %361, %343, %cst_61 {dimension_numbers = #tpu.dot_dimension_numbers<[1], [0], [0], [1], [0, 0, 1, 1], [], []>} : vector<4x64xf32>, vector<64x32xf32>, vector<4x32xf32> -> vector<4x32xf32>
    %c112 = arith.constant 112 : index
    %c0_62 = arith.constant 0 : index
    %363 = vector.load %arg2[%c112, %c0_62] : memref<440x64xf32, #tpu.memory_space<vmem>>, vector<32x32xf32>
    %cst_63 = arith.constant dense<0.000000e+00> : vector<4x32xf32>
    %364 = tpu.matmul %362, %363, %cst_63 {dimension_numbers = #tpu.dot_dimension_numbers<[1], [0], [0], [1], [0, 0, 1, 1], [], []>} : vector<4x32xf32>, vector<32x32xf32>, vector<4x32xf32> -> vector<4x32xf32>
    %c144_64 = arith.constant 144 : index
    %c0_65 = arith.constant 0 : index
    %365 = vector.load %arg2[%c144_64, %c0_65] : memref<440x64xf32, #tpu.memory_space<vmem>>, vector<1x32xf32>
    %366 = vector.broadcast %365 : vector<1x32xf32> to vector<4x32xf32>
    %367 = arith.addf %364, %366 : vector<4x32xf32>
    %cst_66 = arith.constant 0.000000e+00 : f32
    %368 = vector.broadcast %cst_66 : f32 to vector<4x32xf32>
    %369 = arith.maximumf %367, %368 : vector<4x32xf32>
    %c152 = arith.constant 152 : index
    %c0_67 = arith.constant 0 : index
    %370 = vector.load %arg2[%c152, %c0_67] : memref<440x64xf32, #tpu.memory_space<vmem>>, vector<32x64xf32>
    %cst_68 = arith.constant dense<0.000000e+00> : vector<4x64xf32>
    %371 = tpu.matmul %369, %370, %cst_68 {dimension_numbers = #tpu.dot_dimension_numbers<[1], [0], [0], [1], [0, 0, 1, 1], [], []>} : vector<4x32xf32>, vector<32x64xf32>, vector<4x64xf32> -> vector<4x64xf32>
    %c184 = arith.constant 184 : index
    %c0_69 = arith.constant 0 : index
    %372 = vector.load %arg2[%c184, %c0_69] : memref<440x64xf32, #tpu.memory_space<vmem>>, vector<1x64xf32>
    %373 = vector.broadcast %372 : vector<1x64xf32> to vector<4x64xf32>
    %374 = arith.addf %371, %373 : vector<4x64xf32>
    %375 = vector.extract_strided_slice %374 {offsets = [0, 0], sizes = [4, 32], strides = [1, 1]} : vector<4x64xf32> to vector<4x32xf32>
    %376 = vector.extract_strided_slice %374 {offsets = [0, 32], sizes = [4, 32], strides = [1, 1]} : vector<4x64xf32> to vector<4x32xf32>
    %cst_70 = arith.constant 5.000000e-01 : f32
    %377 = vector.broadcast %cst_70 : f32 to vector<4x32xf32>
    %378 = arith.mulf %377, %376 : vector<4x32xf32>
    %379 = arith.negf %378 : vector<4x32xf32>
    %380 = math.exp %379 : vector<4x32xf32>
    %cst_71 = arith.constant 1.000000e+00 : f32
    %381 = vector.broadcast %cst_71 : f32 to vector<4x32xf32>
    %382 = arith.addf %381, %380 : vector<4x32xf32>
    %383 = arith.divf %381, %382 : vector<4x32xf32>
    %cst_72 = arith.constant 9.900000e-01 : f32
    %384 = vector.broadcast %cst_72 : f32 to vector<4x32xf32>
    %385 = arith.mulf %384, %383 : vector<4x32xf32>
    %cst_73 = arith.constant 0.00999999977 : f32
    %386 = vector.broadcast %cst_73 : f32 to vector<4x32xf32>
    %387 = arith.addf %386, %385 : vector<4x32xf32>
    %388 = vector.extract_strided_slice %375 {offsets = [0, 0], sizes = [2, 32], strides = [1, 1]} : vector<4x32xf32> to vector<2x32xf32>
    %389 = vector.extract_strided_slice %375 {offsets = [2, 0], sizes = [2, 32], strides = [1, 1]} : vector<4x32xf32> to vector<2x32xf32>
    %390 = vector.extract_strided_slice %387 {offsets = [0, 0], sizes = [2, 32], strides = [1, 1]} : vector<4x32xf32> to vector<2x32xf32>
    %391 = vector.extract_strided_slice %387 {offsets = [2, 0], sizes = [2, 32], strides = [1, 1]} : vector<4x32xf32> to vector<2x32xf32>
    %c264 = arith.constant 264 : index
    %c0_74 = arith.constant 0 : index
    %392 = vector.load %arg2[%c264, %c0_74] : memref<440x64xf32, #tpu.memory_space<vmem>>, vector<32x64xf32>
    %cst_75 = arith.constant dense<0.000000e+00> : vector<2x64xf32>
    %393 = tpu.matmul %388, %392, %cst_75 {dimension_numbers = #tpu.dot_dimension_numbers<[1], [0], [0], [1], [0, 0, 1, 1], [], []>} : vector<2x32xf32>, vector<32x64xf32>, vector<2x64xf32> -> vector<2x64xf32>
    %cst_76 = arith.constant 0.000000e+00 : f32
    %394 = vector.broadcast %cst_76 : f32 to vector<2x64xf32>
    %cst_77 = arith.constant 0.000000e+00 : f32
    %395 = vector.broadcast %cst_77 : f32 to vector<4x64xf32>
    %396 = tpu.concatenate %394, %393, %395 in 0 : vector<2x64xf32>, vector<2x64xf32>, vector<4x64xf32> -> vector<8x64xf32>
    %397 = tpu.concatenate %396, %396, %396, %396, %396, %396, %396, %396 in 0 : vector<8x64xf32>, vector<8x64xf32>, vector<8x64xf32>, vector<8x64xf32>, vector<8x64xf32>, vector<8x64xf32>, vector<8x64xf32>, vector<8x64xf32> -> vector<64x64xf32>
    %c192 = arith.constant 192 : index
    %c0_78 = arith.constant 0 : index
    %398 = vector.load %arg2[%c192, %c0_78] : memref<440x64xf32, #tpu.memory_space<vmem>>, vector<64x64xf32>
    %cst_79 = arith.constant dense<0.000000e+00> : vector<64x64xf32>
    %399 = tpu.matmul %331, %398, %cst_79 {dimension_numbers = #tpu.dot_dimension_numbers<[1], [0], [0], [1], [0, 0, 1, 1], [], []>} : vector<64x64xf32>, vector<64x64xf32>, vector<64x64xf32> -> vector<64x64xf32>
    %400 = arith.addf %399, %397 : vector<64x64xf32>
    %c256 = arith.constant 256 : index
    %c0_80 = arith.constant 0 : index
    %401 = vector.load %arg2[%c256, %c0_80] : memref<440x64xf32, #tpu.memory_space<vmem>>, vector<1x64xf32>
    %402 = vector.broadcast %401 : vector<1x64xf32> to vector<64x64xf32>
    %403 = arith.addf %400, %402 : vector<64x64xf32>
    %cst_81 = arith.constant 0.000000e+00 : f32
    %404 = vector.broadcast %cst_81 : f32 to vector<64x64xf32>
    %405 = arith.maximumf %403, %404 : vector<64x64xf32>
    %c296 = arith.constant 296 : index
    %c0_82 = arith.constant 0 : index
    %406 = vector.load %arg2[%c296, %c0_82] : memref<440x64xf32, #tpu.memory_space<vmem>>, vector<64x64xf32>
    %cst_83 = arith.constant dense<0.000000e+00> : vector<64x64xf32>
    %407 = tpu.matmul %405, %406, %cst_83 {dimension_numbers = #tpu.dot_dimension_numbers<[1], [0], [0], [1], [0, 0, 1, 1], [], []>} : vector<64x64xf32>, vector<64x64xf32>, vector<64x64xf32> -> vector<64x64xf32>
    %c360 = arith.constant 360 : index
    %c0_84 = arith.constant 0 : index
    %408 = vector.load %arg2[%c360, %c0_84] : memref<440x64xf32, #tpu.memory_space<vmem>>, vector<1x64xf32>
    %409 = vector.broadcast %408 : vector<1x64xf32> to vector<64x64xf32>
    %410 = arith.addf %407, %409 : vector<64x64xf32>
    %c368 = arith.constant 368 : index
    %c0_85 = arith.constant 0 : index
    %411 = vector.load %arg2[%c368, %c0_85] : memref<440x64xf32, #tpu.memory_space<vmem>>, vector<64x4xf32>
    %cst_86 = arith.constant dense<0.000000e+00> : vector<64x4xf32>
    %412 = tpu.matmul %410, %411, %cst_86 {dimension_numbers = #tpu.dot_dimension_numbers<[1], [0], [0], [1], [0, 0, 1, 1], [], []>} : vector<64x64xf32>, vector<64x4xf32>, vector<64x4xf32> -> vector<64x4xf32>
    %c432 = arith.constant 432 : index
    %c0_87 = arith.constant 0 : index
    %413 = vector.load %arg2[%c432, %c0_87] : memref<440x64xf32, #tpu.memory_space<vmem>>, vector<1x4xf32>
    %414 = vector.broadcast %413 : vector<1x4xf32> to vector<64x4xf32>
    %415 = arith.addf %412, %414 : vector<64x4xf32>
    %416 = vector.extract_strided_slice %415 {offsets = [0, 0], sizes = [64, 2], strides = [1, 1]} : vector<64x4xf32> to vector<64x2xf32>
    %417 = vector.extract_strided_slice %415 {offsets = [0, 2], sizes = [64, 2], strides = [1, 1]} : vector<64x4xf32> to vector<64x2xf32>
    %cst_88 = arith.constant 0.000000e+00 : f32
    %418 = vector.broadcast %cst_88 : f32 to vector<64x2xf32>
    %419 = arith.maximumf %417, %418 : vector<64x2xf32>
    %420 = vector.broadcast %cst_88 : f32 to vector<64x2xf32>
    %421 = arith.subf %417, %420 : vector<64x2xf32>
    %422 = arith.cmpf one, %421, %421 : vector<64x2xf32>
    %423 = vector.broadcast %cst_88 : f32 to vector<64x2xf32>
    %424 = arith.addf %417, %423 : vector<64x2xf32>
    %425 = math.absf %421 : vector<64x2xf32>
    %cst_89 = arith.constant 0.000000e+00 : f32
    %426 = vector.broadcast %cst_89 : f32 to vector<64x2xf32>
    %427 = arith.subf %426, %425 : vector<64x2xf32>
    %428 = math.exp %427 : vector<64x2xf32>
    %429 = math.log1p %428 : vector<64x2xf32>
    %430 = arith.addf %419, %429 : vector<64x2xf32>
    %431 = arith.select %422, %424, %430 : vector<64x2xi1>, vector<64x2xf32>
    %cst_90 = arith.constant 9.900000e-01 : f32
    %432 = vector.broadcast %cst_90 : f32 to vector<64x2xf32>
    %433 = arith.mulf %432, %431 : vector<64x2xf32>
    %cst_91 = arith.constant 0.00999999977 : f32
    %434 = vector.broadcast %cst_91 : f32 to vector<64x2xf32>
    %435 = arith.addf %434, %433 : vector<64x2xf32>
    %436 = tpu.concatenate %416, %417, %435 in 1 : vector<64x2xf32>, vector<64x2xf32>, vector<64x2xf32> -> vector<64x6xf32>
    %c0_92 = arith.constant 0 : index
    %c0_93 = arith.constant 0 : index
    %437 = vector.load %arg3[%c0_92, %c0_93] : memref<64x6xf32, #tpu.memory_space<vmem>>, vector<64x6xf32>
    tpu.vector_store %arg3[%c0_92, %c0_93], %436 {strides = array<i32>} : memref<64x6xf32, #tpu.memory_space<vmem>>, vector<64x6xf32>,
    %438 = vector.extract_strided_slice %6 {offsets = [0, 3], sizes = [64, 2], strides = [1, 1]} : vector<64x8xf32> to vector<64x2xf32>
    %439 = arith.subf %438, %416 : vector<64x2xf32>
    %440 = arith.divf %439, %435 : vector<64x2xf32>
    %441 = arith.mulf %440, %440 : vector<64x2xf32>
    %cst_94 = arith.constant -5.000000e-01 : f32
    %442 = vector.broadcast %cst_94 : f32 to vector<64x2xf32>
    %443 = arith.mulf %442, %441 : vector<64x2xf32>
    %444 = math.log %435 : vector<64x2xf32>
    %445 = arith.subf %443, %444 : vector<64x2xf32>
    %cst_95 = arith.constant 0.918938517 : f32
    %446 = vector.broadcast %cst_95 : f32 to vector<64x2xf32>
    %447 = arith.subf %445, %446 : vector<64x2xf32>
    %cst_96 = arith.constant dense<0.000000e+00> : vector<64xf32>
    %448 = vector.multi_reduction <add>, %447, %cst_96 [1] : vector<64x2xf32> to vector<64xf32>
    %449 = vector.shape_cast %448 : vector<64xf32> to vector<64x1xf32>
    %cst_97 = arith.constant 2.000000e+00 : f32
    %450 = vector.broadcast %cst_97 : f32 to vector<64x1xf32>
    %451 = arith.divf %449, %450 : vector<64x1xf32>
    %452 = tpu.iota {dimensions = array<i32: 0>} : vector<64x1xi32>
    %c7_i32_98 = arith.constant 7 : i32
    %453 = vector.broadcast %c7_i32_98 : i32 to vector<64x1xi32>
    %454 = arith.andi %452, %453 : vector<64x1xi32>
    %c3_i32_99 = arith.constant 3 : i32
    %455 = vector.broadcast %c3_i32_99 : i32 to vector<64x1xi32>
    %456 = arith.shrsi %452, %455 : vector<64x1xi32>
    %c2_i32_100 = arith.constant 2 : i32
    %457 = vector.broadcast %c2_i32_100 : i32 to vector<64x1xi32>
    %458 = arith.cmpi sge, %454, %457 : vector<64x1xi32>
    %c4_i32 = arith.constant 4 : i32
    %459 = vector.broadcast %c4_i32 : i32 to vector<64x1xi32>
    %460 = arith.cmpi slt, %454, %459 : vector<64x1xi32>
    %461 = arith.andi %458, %460 : vector<64x1xi1>
    %462 = arith.extui %461 : vector<64x1xi1> to vector<64x1xi32>
    %463 = arith.sitofp %462 : vector<64x1xi32> to vector<64x1xf32>
    %464 = arith.mulf %451, %463 : vector<64x1xf32>
    %465 = vector.shape_cast %464 : vector<64x1xf32> to vector<1x64x1xf32>
    %cst_101 = arith.constant dense<0.000000e+00> : vector<1xf32>
    %466 = vector.multi_reduction <add>, %465, %cst_101 [1, 2] : vector<1x64x1xf32> to vector<1xf32>
    %467 = vector.shape_cast %466 : vector<1xf32> to vector<1x1x1xf32>
    %468 = vector.extract %467[0, 0, 0] : f32 from vector<1x1x1xf32>
    %469 = vector.broadcast %468 : f32 to vector<1x1xf32>
    %cst_102 = arith.constant 6.250000e-02 : f32
    %470 = vector.broadcast %cst_102 : f32 to vector<1x1xf32>
    %471 = arith.mulf %469, %470 : vector<1x1xf32>
    %c1_i32 = arith.constant 1 : i32
    %472 = vector.broadcast %c1_i32 : i32 to vector<64x1xi32>
    %473 = arith.addi %456, %472 : vector<64x1xi32>
    %474 = arith.sitofp %473 : vector<64x1xi32> to vector<64x1xf32>
    %cst_103 = arith.constant 0.000000e+00 : f32
    %475 = vector.broadcast %cst_103 : f32 to vector<64x1xf32>
    %476 = arith.subf %475, %451 : vector<64x1xf32>
    %477 = arith.mulf %463, %476 : vector<64x1xf32>
    %478 = math.rsqrt %474 : vector<64x1xf32>
    %479 = arith.mulf %477, %478 : vector<64x1xf32>
    %480 = vector.shape_cast %479 : vector<64x1xf32> to vector<1x64x1xf32>
    %cst_104 = arith.constant dense<0.000000e+00> : vector<1xf32>
    %481 = vector.multi_reduction <add>, %480, %cst_104 [1, 2] : vector<1x64x1xf32> to vector<1xf32>
    %482 = vector.shape_cast %481 : vector<1xf32> to vector<1x1x1xf32>
    %483 = vector.extract %482[0, 0, 0] : f32 from vector<1x1x1xf32>
    %484 = vector.broadcast %483 : f32 to vector<1x1xf32>
    %cst_105 = arith.constant 6.250000e-02 : f32
    %485 = vector.broadcast %cst_105 : f32 to vector<1x1xf32>
    %486 = arith.mulf %484, %485 : vector<1x1xf32>
    %487 = arith.subf %416, %438 : vector<64x2xf32>
    %488 = arith.mulf %487, %487 : vector<64x2xf32>
    %c6_i32_106 = arith.constant 6 : i32
    %489 = vector.broadcast %c6_i32_106 : i32 to vector<64x1xi32>
    %490 = arith.cmpi slt, %456, %489 : vector<64x1xi32>
    %491 = arith.extui %490 : vector<64x1xi1> to vector<64x1xi32>
    %492 = arith.sitofp %491 : vector<64x1xi32> to vector<64x1xf32>
    %493 = arith.mulf %463, %492 : vector<64x1xf32>
    %494 = vector.broadcast %493 : vector<64x1xf32> to vector<64x2xf32>
    %495 = arith.mulf %488, %494 : vector<64x2xf32>
    %496 = vector.shape_cast %495 : vector<64x2xf32> to vector<1x64x2xf32>
    %cst_107 = arith.constant dense<0.000000e+00> : vector<1xf32>
    %497 = vector.multi_reduction <add>, %496, %cst_107 [1, 2] : vector<1x64x2xf32> to vector<1xf32>
    %498 = vector.shape_cast %497 : vector<1xf32> to vector<1x1x1xf32>
    %499 = vector.extract %498[0, 0, 0] : f32 from vector<1x1x1xf32>
    %500 = vector.broadcast %499 : f32 to vector<1x1xf32>
    %cst_108 = arith.constant 0.0416666679 : f32
    %501 = vector.broadcast %cst_108 : f32 to vector<1x1xf32>
    %502 = arith.mulf %500, %501 : vector<1x1xf32>
    %503 = arith.divf %390, %391 : vector<2x32xf32>
    %504 = math.log %503 : vector<2x32xf32>
    %505 = arith.mulf %391, %391 : vector<2x32xf32>
    %506 = arith.subf %389, %388 : vector<2x32xf32>
    %507 = arith.mulf %506, %506 : vector<2x32xf32>
    %508 = arith.addf %505, %507 : vector<2x32xf32>
    %509 = arith.mulf %390, %390 : vector<2x32xf32>
    %cst_109 = arith.constant 2.000000e+00 : f32
    %510 = vector.broadcast %cst_109 : f32 to vector<2x32xf32>
    %511 = arith.mulf %510, %509 : vector<2x32xf32>
    %512 = arith.divf %508, %511 : vector<2x32xf32>
    %513 = arith.addf %504, %512 : vector<2x32xf32>
    %cst_110 = arith.constant 5.000000e-01 : f32
    %514 = vector.broadcast %cst_110 : f32 to vector<2x32xf32>
    %515 = arith.subf %513, %514 : vector<2x32xf32>
    %516 = vector.shape_cast %515 : vector<2x32xf32> to vector<1x2x32xf32>
    %cst_111 = arith.constant dense<0.000000e+00> : vector<1xf32>
    %517 = vector.multi_reduction <add>, %516, %cst_111 [1, 2] : vector<1x2x32xf32> to vector<1xf32>
    %518 = vector.shape_cast %517 : vector<1xf32> to vector<1x1x1xf32>
    %519 = vector.extract %518[0, 0, 0] : f32 from vector<1x1x1xf32>
    %520 = vector.broadcast %519 : f32 to vector<1x1xf32>
    %cst_112 = arith.constant 1.562500e-02 : f32
    %521 = vector.broadcast %cst_112 : f32 to vector<1x1xf32>
    %522 = arith.mulf %520, %521 : vector<1x1xf32>
    %523 = tpu.iota {dimensions = array<i32: 1>} : vector<1x8xi32>
    %c0_i32 = arith.constant 0 : i32
    %524 = vector.broadcast %c0_i32 : i32 to vector<1x8xi32>
    %525 = arith.cmpi eq, %523, %524 : vector<1x8xi32>
    %526 = arith.subf %522, %471 : vector<1x1xf32>
    %cst_113 = arith.constant 0.000000e+00 : f32
    %527 = vector.shape_cast %526 : vector<1x1xf32> to vector<1x1xf32>
    %528 = vector.broadcast %527 : vector<1x1xf32> to vector<1x8xf32>
    %529 = vector.broadcast %cst_113 : f32 to vector<1x8xf32>
    %530 = arith.select %525, %528, %529 : vector<1x8xi1>, vector<1x8xf32>
    %c1_i32_114 = arith.constant 1 : i32
    %531 = vector.broadcast %c1_i32_114 : i32 to vector<1x8xi32>
    %532 = arith.cmpi eq, %523, %531 : vector<1x8xi32>
    %cst_115 = arith.constant 0.000000e+00 : f32
    %533 = vector.broadcast %cst_115 : f32 to vector<1x1xf32>
    %534 = arith.subf %533, %471 : vector<1x1xf32>
    %cst_116 = arith.constant 0.000000e+00 : f32
    %535 = vector.shape_cast %534 : vector<1x1xf32> to vector<1x1xf32>
    %536 = vector.broadcast %535 : vector<1x1xf32> to vector<1x8xf32>
    %537 = vector.broadcast %cst_116 : f32 to vector<1x8xf32>
    %538 = arith.select %532, %536, %537 : vector<1x8xi1>, vector<1x8xf32>
    %539 = arith.addf %530, %538 : vector<1x8xf32>
    %c2_i32_117 = arith.constant 2 : i32
    %540 = vector.broadcast %c2_i32_117 : i32 to vector<1x8xi32>
    %541 = arith.cmpi eq, %523, %540 : vector<1x8xi32>
    %cst_118 = arith.constant 0.000000e+00 : f32
    %542 = vector.shape_cast %522 : vector<1x1xf32> to vector<1x1xf32>
    %543 = vector.broadcast %542 : vector<1x1xf32> to vector<1x8xf32>
    %544 = vector.broadcast %cst_118 : f32 to vector<1x8xf32>
    %545 = arith.select %541, %543, %544 : vector<1x8xi1>, vector<1x8xf32>
    %546 = arith.addf %539, %545 : vector<1x8xf32>
    %c3_i32_119 = arith.constant 3 : i32
    %547 = vector.broadcast %c3_i32_119 : i32 to vector<1x8xi32>
    %548 = arith.cmpi eq, %523, %547 : vector<1x8xi32>
    %cst_120 = arith.constant 0.000000e+00 : f32
    %549 = vector.shape_cast %502 : vector<1x1xf32> to vector<1x1xf32>
    %550 = vector.broadcast %549 : vector<1x1xf32> to vector<1x8xf32>
    %551 = vector.broadcast %cst_120 : f32 to vector<1x8xf32>
    %552 = arith.select %548, %550, %551 : vector<1x8xi1>, vector<1x8xf32>
    %553 = arith.addf %546, %552 : vector<1x8xf32>
    %c4_i32_121 = arith.constant 4 : i32
    %554 = vector.broadcast %c4_i32_121 : i32 to vector<1x8xi32>
    %555 = arith.cmpi eq, %523, %554 : vector<1x8xi32>
    %cst_122 = arith.constant 0.000000e+00 : f32
    %556 = vector.shape_cast %486 : vector<1x1xf32> to vector<1x1xf32>
    %557 = vector.broadcast %556 : vector<1x1xf32> to vector<1x8xf32>
    %558 = vector.broadcast %cst_122 : f32 to vector<1x8xf32>
    %559 = arith.select %555, %557, %558 : vector<1x8xi1>, vector<1x8xf32>
    %560 = arith.addf %553, %559 : vector<1x8xf32>
    %c0_123 = arith.constant 0 : index
    %c0_124 = arith.constant 0 : index
    %561 = vector.load %arg4[%c0_123, %c0_124] : memref<1x8xf32, #tpu.memory_space<vmem>>, vector<1x8xf32>
    tpu.vector_store %arg4[%c0_123, %c0_124], %560 {strides = array<i32>} : memref<1x8xf32, #tpu.memory_space<vmem>>, vector<1x8xf32>,
    return
  }
}

</mosaic_0001>

<bundles_post_ra>
// kernel: neural_process_forward.1
= control target key start
LH: loop header
LB: loop body
LE: loop exit
PB: predicated region body
PF: predicated region fallthrough
CT: control target
= control target key end

     0   :  { %v5586_v2 = vmov 0.0   ;;  %vm89_vm0 = vcmask 64512   ;;  %v79_v31 = vlaneseq  ;;  %s5587_s9 = smov 64   ;;  %vm227_vm1 = vcmask 523264   ;;  %s5590_s10 = smov 3   ;;  %s7195_s1 = inlined_call_operand.vmem [shape: f32[216,256], index: 1, kind: input, shape index: {}]   ;;  %s7196_s0 = inlined_call_operand.vmem [shape: f32[64,8], index: 0, kind: input, shape index: {}]   ;;  %s7197_s2 = inlined_call_operand.vmem [shape: f32[440,64], index: 2, kind: input, shape index: {}]   ;;  %s7198_s3 = inlined_call_operand.vmem [shape: f32[64,6], index: 3, kind: output, shape index: {0}]   ;;  %s7199_s4 = inlined_call_operand.vmem [shape: f32[1,8], index: 4, kind: output, shape index: {1}]  }
   0x1   :  { %v17_v0 = vld [vmem:[%s7195_s1 + $0x8] sm:$0xff]  ;;  %v16_v1 = vld [vmem:[%s7195_s1] sm:$0xff]  ;;  %178 = vmatprep.mubr.f32.mxu0 %v5586_v2  ;;  %202 = vmatprep.mubr.f32.mxu1 %v5586_v2  ;;  %v23_v5 = vld [vmem:[%s7195_s1 + $0x38] sm:$0xff]  ;;  %vm2641_vm2 = vcmask 261120   ;;  %vm5589_vm3 = vmmov 0   ;;  %vm3110_vm7 = vcmask 1041408  }
   0x2   :  { %v70_v3 = vld [vmem:[%s7196_s0] sm:$0xff]  ;;  %114 = vmatprep.subr.mxu0 %v17_v0  ;;  %v21_v4 = vld [vmem:[%s7195_s1 + $0x28] sm:$0xff]  ;;  %5228 = vmatprep.subr.mxu1 %v17_v0  ;;  %v22_v8 = vld [vmem:[%s7195_s1 + $0x30] sm:$0xff]  ;;  %v5733_v32 = vshrl.u32 %v79_v31, 7  ;;  %vm3112_vm8 = vcmask 1043456   ;;  %s5592_s23 = smov 125  }
   0x3   :  { %v20_v6 = vld [vmem:[%s7195_s1 + $0x20] sm:$0xff]  ;;  %115 = vmatpush1.msra.mxu0 %v16_v1  ;;  %v5641_v7 = vpack.c.bf16 %v23_v5, %v21_v4  ;;  %v25_v9 = vld [vmem:[%s7195_s1 + $0x48] sm:$0xff]  ;;  %5229 = vmatpush1.msra.mxu1 %v16_v1  ;;  %v27_v11 = vld [vmem:[%s7195_s1 + $0x58] sm:$0xff]  ;;  %s5594_s28 = smov 96   ;;  %s5595_s29 = smov 2  }
   0x4   :  { %4319 = vmatmul.mubr.msk.f32.vlgmr.msra.gmra.mrb[0].mxu0 %vm89_vm0, %v70_v3  ;;  %v5650_v10 = vpack.c.bf16 %v22_v8, %v20_v6  ;;  %v24_v12 = vld [vmem:[%s7195_s1 + $0x40] sm:$0xff]  ;;  %v26_v13 = vld [vmem:[%s7195_s1 + $0x50] sm:$0xff]  ;;  %v71_v14 = vld [vmem:[%s7196_s0 + $0x8] sm:$0xff]  ;;  %v5666_v15 = vpack.c.bf16 %v27_v11, %v25_v9  ;;  %v85_v33 = vsub.s32 1, %v5733_v32  ;;  %v81_v40 = vsub.s32 0, %v5733_v32 }
   0x5   :  { %4743 = vmatprep.subr.bf16.mxu0 %v5641_v7  ;;  %184 = vmatprep.mubr.f32.mxu0 %v5586_v2  ;;  %v29_v16 = vld [vmem:[%s7195_s1 + $0x68] sm:$0xff]  ;;  %v31_v17 = vld [vmem:[%s7195_s1 + $0x78] sm:$0xff]  ;;  %v5675_v18 = vpack.c.bf16 %v26_v13, %v24_v12  ;;  %v28_v20 = vld [vmem:[%s7195_s1 + $0x60] sm:$0xff]  ;;  %vm2778_vm5 = vcmp.lt.s32.totalorder %v5733_v32, 2 }
   0x6   :  { %4745 = vmatpush1.bf16.msra.mxu0 %v5650_v10  ;;  %v5678_v19 = vpack.c.bf16 %v31_v17, %v29_v16  ;;  %v30_v21 = vld [vmem:[%s7195_s1 + $0x70] sm:$0xff]  ;;  %v33_v22 = vld [vmem:[%s7195_s1 + $0x88] sm:$0xff]  ;;  %v35_v23 = vld [vmem:[%s7195_s1 + $0x98] sm:$0xff] }
   0x7   :  { %4747 = vmatprep.subr.bf16.mxu0 %v5666_v15  ;;  %v72_v24 = vld [vmem:[%s7196_s0 + $0x10] sm:$0xff]  ;;  %v5698_v25 = vpack.c.bf16 %v30_v21, %v28_v20  ;;  %v5701_v26 = vpack.c.bf16 %v35_v23, %v33_v22  ;;  %v32_v27 = vld [vmem:[%s7195_s1 + $0x80] sm:$0xff]  ;;  %v73_v29 = vld [vmem:[%s7196_s0 + $0x18] sm:$0xff] }
   0x8   :  { %4320 = vmatmul.mubr.msk.f32.gmra.mrb[2].mxu0 %vm89_vm0, %v71_v14  ;;  %v34_v28 = vld [vmem:[%s7195_s1 + $0x90] sm:$0xff]  ;;  %v74_v49 = vld [vmem:[%s7196_s0 + $0x20] sm:$0xff]  ;;  %v53_v50 = vld [vmem:[%s7195_s1 + $0x128] sm:$0xff] }
   0x9   :  { %190 = vmatprep.mubr.f32.mxu0 %v5586_v2  ;;  %v5715_v30 = vpack.c.bf16 %v34_v28, %v32_v27  ;;  %v4317_v34 = vld [vmem:[%s7195_s1 + $0x10] ss:$8 sm:$0x3]  ;;  %4323 = vmatmul.mubr.msk.f32.vlgmr.msra.gmra.mrb[0].mxu1 %vm89_vm0, %v74_v49  ;;  %v52_v53 = vld [vmem:[%s7195_s1 + $0x120] sm:$0xff]  ;;  %v75_v55 = vld [vmem:[%s7196_s0 + $0x28] sm:$0xff] }
   0xa   :  { %4749 = vmatpush1.bf16.msra.mxu0 %v5675_v18  ;;  %v5741_v35 = vrot.slane %v4317_v34, %v85_v33  ;;  %v5751_v41 = vrot.slane %v4317_v34, %v81_v40  ;;  %v55_v51 = vld [vmem:[%s7195_s1 + $0x138] sm:$0xff]  ;;  %v54_v54 = vld [vmem:[%s7195_s1 + $0x130] sm:$0xff]  ;;  %208 = vmatprep.mubr.f32.mxu1 %v5586_v2  ;;  %v57_v57 = vld [vmem:[%s7195_s1 + $0x148] sm:$0xff] }
   0xb   :  { %4751 = vmatprep.subr.bf16.mxu0 %v5678_v19  ;;  %v5768_v52 = vpack.c.bf16 %v55_v51, %v53_v50  ;;  %v5779_v56 = vpack.c.bf16 %v54_v54, %v52_v53  ;;  %v59_v58 = vld [vmem:[%s7195_s1 + $0x158] sm:$0xff]  ;;  %v56_v59 = vld [vmem:[%s7195_s1 + $0x140] sm:$0xff]  ;;  %v58_v61 = vld [vmem:[%s7195_s1 + $0x150] sm:$0xff] }
   0xc   :  { %4321 = vmatmul.mubr.msk.f32.gmra.mrb[4].mxu0 %vm89_vm0, %v72_v24  ;;  %v5792_v60 = vpack.c.bf16 %v59_v58, %v57_v57  ;;  %v61_v62 = vld [vmem:[%s7195_s1 + $0x168] sm:$0xff]  ;;  %v5801_v63 = vpack.c.bf16 %v58_v61, %v56_v59  ;;  %v63_v0 = vld [vmem:[%s7195_s1 + $0x178] sm:$0xff]  ;;  %v60_v3 = vld [vmem:[%s7195_s1 + $0x160] sm:$0xff] }
   0xd   :  { %196 = vmatprep.mubr.f32.mxu0 %v5586_v2  ;;  %4759 = vmatprep.subr.bf16.mxu1 %v5768_v52  ;;  %v5808_v1 = vpack.c.bf16 %v63_v0, %v61_v62  ;;  %v62_v4 = vld [vmem:[%s7195_s1 + $0x170] sm:$0xff]  ;;  %v65_v6 = vld [vmem:[%s7195_s1 + $0x188] sm:$0xff]  ;;  %v67_v8 = vld [vmem:[%s7195_s1 + $0x198] sm:$0xff] }
   0xe   :  { %4753 = vmatpush1.bf16.msra.mxu0 %v5698_v25  ;;  %4761 = vmatpush1.bf16.msra.mxu1 %v5779_v56  ;;  %v76_v5 = vld [vmem:[%s7196_s0 + $0x30] sm:$0xff]  ;;  %v5827_v9 = vpack.c.bf16 %v62_v4, %v60_v3  ;;  %v5831_v11 = vpack.c.bf16 %v67_v8, %v65_v6  ;;  %v64_v12 = vld [vmem:[%s7195_s1 + $0x180] sm:$0xff]  ;;  %v77_v14 = vld [vmem:[%s7196_s0 + $0x38] sm:$0xff] }
   0xf   :  { %4755 = vmatprep.subr.bf16.mxu0 %v5701_v26  ;;  %4324 = vmatmul.mubr.msk.f32.gmra.mrb[2].mxu1 %vm89_vm0, %v75_v55  ;;  %v66_v13 = vld [vmem:[%s7195_s1 + $0x190] sm:$0xff]  ;;  %v37_v16 = vld [vmem:[%s7195_s1 + $0xa8] sm:$0xff]  ;;  %v39_v17 = vld [vmem:[%s7195_s1 + $0xb8] sm:$0xff] }
  0x10   :  { %4322 = vmatmul.mubr.msk.f32.gmra.mrb[6].mxu0 %vm89_vm0, %v73_v29  ;;  %4763 = vmatprep.subr.bf16.mxu1 %v5792_v60  ;;  %v5850_v20 = vpack.c.bf16 %v66_v13, %v64_v12  ;;  %v5854_v21 = vpack.c.bf16 %v39_v17, %v37_v16  ;;  %v36_v22 = vld [vmem:[%s7195_s1 + $0xa0] sm:$0xff]  ;;  %v38_v23 = vld [vmem:[%s7195_s1 + $0xb0] sm:$0xff]  ;;  %v41_v24 = vld [vmem:[%s7195_s1 + $0xc8] sm:$0xff] }
  0x11   :  { %295 = vmatprep.mubr.f32.mxu0 %v5586_v2  ;;  %214 = vmatprep.mubr.f32.mxu1 %v5586_v2  ;;  %v43_v27 = vld [vmem:[%s7195_s1 + $0xd8] sm:$0xff]  ;;  %v5870_v28 = vpack.c.bf16 %v38_v23, %v36_v22  ;;  %v40_v34 = vld [vmem:[%s7195_s1 + $0xc0] sm:$0xff]  ;;  %v50_v53 = vld [vmem:[%s7195_s1 + $0x110] sm:$0xff] }
  0x12   :  { %4757 = vmatpush1.bf16.msra.mxu0 %v5715_v30  ;;  %4765 = vmatpush1.bf16.msra.mxu1 %v5801_v63  ;;  %v5873_v29 = vpack.c.bf16 %v43_v27, %v41_v24  ;;  %v48_v51 = vld [vmem:[%s7195_s1 + $0x100] sm:$0xff] }
  0x13   :  { %4791 = vmatprep.subr.bf16.mxu0 %v5641_v7  ;;  %4325 = vmatmul.mubr.msk.f32.gmra.mrb[4].mxu1 %vm89_vm0, %v76_v5  ;;  %v5920_v54 = vpack.c.bf16 %v50_v53, %v48_v51  ;;  %v4318_v17 = vld [vmem:[%s7195_s1 + $0x1a0] ss:$8 sm:$0x3] }
  0x14   :  { %4767 = vmatprep.subr.bf16.mxu1 %v5808_v1  ;;  %220 = vmatprep.mubr.f32.mxu1 %v5586_v2  ;;  %v5972_v22 = vrot.slane %v4318_v17, %v85_v33  ;;  %v5980_v33 = vrot.slane %v4318_v17, %v81_v40 }
  0x15   :  { %296 = vmatmul.mubr.f32.vlgmr.msra.gmra.mrb[0].mxu0 %v5586_v2 }
  0x16   :  { %4793 = vmatpush1.bf16.msra.mxu0 %v5650_v10  ;;  %586 = vmatprep.mubr.f32.mxu0 %v5586_v2 }
  0x17   :  { %4795 = vmatprep.subr.bf16.mxu0 %v5666_v15  ;;  %4769 = vmatpush1.bf16.msra.mxu1 %v5827_v9 }
  0x18   :  { %4326 = vmatmul.mubr.msk.f32.gmra.mrb[6].mxu1 %vm89_vm0, %v77_v14  ;;  %4771 = vmatprep.subr.bf16.mxu1 %v5831_v11 }
  0x19   :  { %398 = vmatprep.mubr.f32.mxu1 %v5586_v2 }
  0x1a   :  { %4797 = vmatpush1.bf16.msra.mxu0 %v5675_v18 }
  0x1b   :  { %4799 = vmatprep.subr.bf16.mxu0 %v5678_v19  ;;  %4773 = vmatpush1.bf16.msra.mxu1 %v5850_v20 }
  0x1c   :  { %4775 = vmatprep.subr.bf16.mxu1 %v5854_v21 }
  0x1e   :  { %4801 = vmatpush1.bf16.msra.mxu0 %v5698_v25  ;;  %399 = vmatmul.mubr.f32.vlgmr.msra.gmra.mrb[8].mxu1 %v5586_v2 }
  0x1f   :  { %4803 = vmatprep.subr.bf16.mxu0 %v5701_v26  ;;  %4777 = vmatpush1.bf16.msra.mxu1 %v5870_v28 }
  0x20   :  { %472 = vmatprep.mubr.f32.mxu1 %v5586_v2  ;;  %4779 = vmatprep.subr.bf16.mxu1 %v5873_v29 }
  0x22   :  { %4805 = vmatpush1.bf16.msra.mxu0 %v5715_v30 }
  0x23   :  { %4839 = vmatprep.subr.bf16.mxu0 %v5641_v7 }
  0xdc   :  { %v5931_v62 = vpop.f32.mrb[0].mxu1 }
  0xdd   :  { %v5933_v0 = vpop.f32.mrb[1].mxu1 }
  0xe2   :  { %v5935_v3 = vpop.f32.mrb[2].mxu1 }
  0xe3   :  { %v5937_v4 = vpop.f32.mrb[3].mxu1 }
  0xe8   :  { %v297_v36 = vpop.f32.mrb[0].mxu0 }
  0xe9   :  { %v299_v37 = vpop.f32.mrb[1].mxu0  ;;  %v5230_v42 = vadd.f32 %v297_v36, %v5751_v41  ;;  %v42_v36 = vld [vmem:[%s7195_s1 + $0xd0] sm:$0xff] }
  0xea   :  { %v5744_v38 = vadd.f32 %v299_v37, %v5741_v35  ;;  %v45_v37 = vld [vmem:[%s7195_s1 + $0xe8] sm:$0xff] }
  0xeb   :  { %v4327_v43 = vmul.f32 -1.442695, %v5230_v42  ;;  %v5889_v42 = vpack.c.bf16 %v42_v36, %v40_v34 }
  0xec   :  { %5296 = vtanh.f32 %v5744_v38  ;;  %v4328_v61 = vmul.f32 -1.442695, %v5744_v38 }
  0xed   :  { %5298 = vpow2.f32 %v4327_v43  ;;  %4781 = vmatpush1.bf16.msra.mxu1 %v5889_v42 }
  0xf6   :  { %v5297_v39 = vpop.eup %5296 }
  0xf7   :  { %319 = vrot.lane.b32.xlu0 %v5297_v39, %s5587_s9  ;;  %v5299_v44 = vpop.eup %5298  ;;  %v47_v39 = vld [vmem:[%s7195_s1 + $0xf8] sm:$0xff] }
  0xf8   :  { %v310_v45 = vadd.f32 1.0, %v5299_v44  ;;  %v5893_v43 = vpack.c.bf16 %v47_v39, %v45_v37  ;;  %v44_v44 = vld [vmem:[%s7195_s1 + $0xe0] sm:$0xff] }
  0xfa   :  { %5300 = vrcp.f32 %v310_v45  ;;  %v46_v45 = vld [vmem:[%s7195_s1 + $0xf0] sm:$0xff]  ;;  %4783 = vmatprep.subr.bf16.mxu1 %v5893_v43 }
  0xfb   :  { %v5908_v49 = vpack.c.bf16 %v46_v45, %v44_v44 }
  0xfd   :  { %4785 = vmatpush1.bf16.msra.mxu1 %v5908_v49 }
 0x104   :  { %v5754_v46 = vpop.eup %5300 }
 0x105   :  { %v317_v55 = vmul.f32 0.0, %v5754_v46 }
 0x169   :  { %v320_v47 = vpop.permute.xlu0 %319 }
 0x16a   :  { %v322_v48 = vmul.f32 %v5754_v46, %v320_v47  ;;  %v49_v47 = vld [vmem:[%s7195_s1 + $0x108] sm:$0xff]  ;;  %v5939_v46 = vpop.f32.mrb[4].mxu1 }
 0x16b   :  { %v5941_v5 = vpop.f32.mrb[5].mxu1 }
 0x16c   :  { %324 = vrot.lane.b32.xlu0 %v322_v48, %s5587_s9  ;;  %v51_v48 = vld [vmem:[%s7195_s1 + $0x118] sm:$0xff]  ;;  %v5943_v6 = vpop.f32.mrb[6].mxu1 }
 0x16d   :  { %v5911_v50 = vpack.c.bf16 %v51_v48, %v49_v47  ;;  %v5945_v12 = vpop.f32.mrb[7].mxu1 }
 0x16f   :  { %4787 = vmatprep.subr.bf16.mxu1 %v5911_v50 }
 0x170   :  { %4789 = vmatpush1.bf16.msra.mxu1 %v5920_v54 }
 0x171   :  { %4807 = vmatprep.subr.bf16.mxu1 %v5768_v52 }
 0x1de   :  { %v325_v57 = vpop.permute.xlu0 %324 }
 0x1df   :  { %v5926_v58 = vadd.f32 %v325_v57, %v317_v55 }
 0x1e1   :  { %5302 = vtanh.f32 %v5926_v58 }
 0x1e2   :  { %5304 = vpow2.f32 %v4328_v61 }
 0x1eb   :  { %v5303_v59 = vpop.eup %5302 }
 0x1ec   :  { %330 = vrot.lane.b32.xlu1 %v5303_v59, %s5587_s9  ;;  %v5305_v8 = vpop.eup %5304 }
 0x1ed   :  { %v311_v13 = vadd.f32 1.0, %v5305_v8 }
 0x1ef   :  { %5306 = vrcp.f32 %v311_v13 }
 0x1f9   :  { %v5307_v38 = vpop.eup %5306 }
 0x25e   :  { %v331_v14 = vpop.permute.xlu1 %330 }
 0x25f   :  { %v333_v16 = vmul.f32 %v5307_v38, %v331_v14 }
 0x261   :  { %4329 = vmatmul.mubr.msk.f32.vlgmr.msra.gmra.mrb[8].mxu1 %vm227_vm1, %v333_v16  ;;  %4332 = vmatmul.mubr.msk.f32.vlgmr.msra.gmra.mrb[2].mxu0 %vm227_vm1, %v333_v16 }
 0x262   :  { %4809 = vmatpush1.bf16.msra.mxu1 %v5779_v56  ;;  %4841 = vmatpush1.bf16.msra.mxu0 %v5650_v10 }
 0x263   :  { %4811 = vmatprep.subr.bf16.mxu1 %v5792_v60  ;;  %4843 = vmatprep.subr.bf16.mxu0 %v5666_v15 }
 0x264   :  { %692 = vmatprep.mubr.f32.mxu1 %v5586_v2  ;;  %869 = vmatprep.mubr.f32.mxu0 %v5586_v2 }
 0x266   :  { %4813 = vmatpush1.bf16.msra.mxu1 %v5801_v63  ;;  %4845 = vmatpush1.bf16.msra.mxu0 %v5675_v18 }
 0x267   :  { %4815 = vmatprep.subr.bf16.mxu1 %v5808_v1  ;;  %4847 = vmatprep.subr.bf16.mxu0 %v5678_v19 }
 0x26a   :  { %4817 = vmatpush1.bf16.msra.mxu1 %v5827_v9  ;;  %4849 = vmatpush1.bf16.msra.mxu0 %v5698_v25 }
 0x26b   :  { %4819 = vmatprep.subr.bf16.mxu1 %v5831_v11  ;;  %4851 = vmatprep.subr.bf16.mxu0 %v5701_v26 }
 0x26e   :  { %4821 = vmatpush1.bf16.msra.mxu1 %v5850_v20  ;;  %4853 = vmatpush1.bf16.msra.mxu0 %v5715_v30 }
 0x26f   :  { %4823 = vmatprep.subr.bf16.mxu1 %v5854_v21  ;;  %4887 = vmatprep.subr.bf16.mxu0 %v5641_v7 }
 0x334   :  { %v474_v23 = vpop.f32.mrb[8].mxu1  ;;  %v588_v24 = vpop.f32.mrb[2].mxu0 }
 0x335   :  { %v476_v27 = vpop.f32.mrb[9].mxu1  ;;  %v590_v34 = vpop.f32.mrb[3].mxu0  ;;  %v490_v45 = vadd.f32 %v5980_v33, %v474_v23  ;;  %v5232_v48 = vadd.f32 %v588_v24, %v5751_v41 }
 0x336   :  { %v491_v36 = vadd.f32 %v5972_v22, %v476_v27  ;;  %v5233_v37 = vadd.f32 %v590_v34, %v5741_v35 }
 0x337   :  { %v4330_v47 = vmul.f32 -1.442695, %v490_v45  ;;  %v4333_v51 = vmul.f32 -1.442695, %v5232_v48 }
 0x338   :  { %5308 = vtanh.f32 %v491_v36  ;;  %v4331_v45 = vmul.f32 -1.442695, %v491_v36 }
 0x339   :  { %5310 = vtanh.f32 %v5233_v37 }
 0x33a   :  { %5312 = vpow2.f32 %v4330_v47  ;;  %v4334_v47 = vmul.f32 -1.442695, %v5233_v37 }
 0x33b   :  { %5314 = vpow2.f32 %v4333_v51 }
 0x342   :  { %v5309_v39 = vpop.eup %5308 }
 0x343   :  { %507 = vrot.lane.b32.xlu1 %v5309_v39, %s5587_s9  ;;  %v5311_v44 = vpop.eup %5310 }
 0x344   :  { %610 = vrot.lane.b32.xlu0 %v5311_v44, %s5587_s9  ;;  %v5313_v53 = vpop.eup %5312 }
 0x345   :  { %v498_v55 = vadd.f32 1.0, %v5313_v53  ;;  %v5315_v57 = vpop.eup %5314 }
 0x346   :  { %v601_v59 = vadd.f32 1.0, %v5315_v57 }
 0x347   :  { %5316 = vrcp.f32 %v498_v55 }
 0x348   :  { %5318 = vrcp.f32 %v601_v59 }
 0x351   :  { %v5317_v61 = vpop.eup %5316 }
 0x352   :  { %v5319_v40 = vpop.eup %5318  ;;  %v505_v16 = vmul.f32 0.0, %v5317_v61 }
 0x353   :  { %v608_v24 = vmul.f32 %v5319_v40, %v5926_v58 }
 0x3b5   :  { %v508_v8 = vpop.permute.xlu1 %507 }
 0x3b6   :  { %v510_v13 = vmul.f32 %v5317_v61, %v508_v8  ;;  %v611_v38 = vpop.permute.xlu0 %610 }
 0x3b7   :  { %v613_v14 = vmul.f32 %v5319_v40, %v611_v38 }
 0x3b8   :  { %512 = vrot.lane.b32.xlu1 %v510_v13, %s5587_s9 }
 0x3b9   :  { %615 = vrot.lane.b32.xlu0 %v613_v14, %s5587_s9 }
 0x42a   :  { %v513_v17 = vpop.permute.xlu1 %512 }
 0x42b   :  { %v5986_v23 = vadd.f32 %v513_v17, %v505_v16  ;;  %v616_v27 = vpop.permute.xlu0 %615 }
 0x42c   :  { %v5990_v34 = vadd.f32 %v616_v27, %v608_v24 }
 0x42d   :  { %5320 = vtanh.f32 %v5986_v23 }
 0x42e   :  { %5322 = vtanh.f32 %v5990_v34 }
 0x42f   :  { %5324 = vpow2.f32 %v4331_v45 }
 0x430   :  { %5326 = vpow2.f32 %v4334_v47 }
 0x437   :  { %v5321_v39 = vpop.eup %5320 }
 0x438   :  { %518 = vrot.lane.b32.xlu1 %v5321_v39, %s5587_s9  ;;  %v5323_v44 = vpop.eup %5322 }
 0x439   :  { %621 = vrot.lane.b32.xlu0 %v5323_v44, %s5587_s9  ;;  %v5325_v48 = vpop.eup %5324 }
 0x43a   :  { %v499_v51 = vadd.f32 1.0, %v5325_v48  ;;  %v5327_v53 = vpop.eup %5326 }
 0x43b   :  { %v602_v58 = vadd.f32 1.0, %v5327_v53 }
 0x43c   :  { %5328 = vrcp.f32 %v499_v51 }
 0x43d   :  { %5330 = vrcp.f32 %v602_v58 }
 0x446   :  { %v5329_v55 = vpop.eup %5328 }
 0x447   :  { %v5331_v36 = vpop.eup %5330 }
 0x4aa   :  { %v519_v57 = vpop.permute.xlu1 %518 }
 0x4ab   :  { %v5995_v59 = vmul.f32 %v5329_v55, %v519_v57  ;;  %v622_v37 = vpop.permute.xlu0 %621 }
 0x4ac   :  { %v624_v61 = vmul.f32 %v5331_v36, %v622_v37 }
 0x4ad   :  { %4335 = vmatmul.mubr.msk.f32.vlgmr.msra.gmra.mrb[10].mxu1 %vm227_vm1, %v5995_v59 }
 0x4ae   :  { %4825 = vmatpush1.bf16.msra.mxu1 %v5870_v28  ;;  %766 = vmatprep.mubr.f32.mxu1 %v5586_v2 }
 0x4af   :  { %4827 = vmatprep.subr.bf16.mxu1 %v5873_v29  ;;  %4339 = vmatmul.mubr.msk.f32.vlgmr.msra.gmra.mrb[4].mxu0 %vm227_vm1, %v624_v61 }
 0x4b0   :  { %4889 = vmatpush1.bf16.msra.mxu0 %v5650_v10  ;;  %1152 = vmatprep.mubr.f32.mxu0 %v5586_v2 }
 0x4b1   :  { %4891 = vmatprep.subr.bf16.mxu0 %v5666_v15 }
 0x4b2   :  { %4829 = vmatpush1.bf16.msra.mxu1 %v5889_v42 }
 0x4b3   :  { %4831 = vmatprep.subr.bf16.mxu1 %v5893_v43 }
 0x4b4   :  { %4893 = vmatpush1.bf16.msra.mxu0 %v5675_v18 }
 0x4b5   :  { %4895 = vmatprep.subr.bf16.mxu0 %v5678_v19 }
 0x4b6   :  { %4833 = vmatpush1.bf16.msra.mxu1 %v5908_v49 }
 0x4b7   :  { %4835 = vmatprep.subr.bf16.mxu1 %v5911_v50 }
 0x4b8   :  { %4897 = vmatpush1.bf16.msra.mxu0 %v5698_v25 }
 0x4b9   :  { %4899 = vmatprep.subr.bf16.mxu0 %v5701_v26 }
 0x4ba   :  { %4837 = vmatpush1.bf16.msra.mxu1 %v5920_v54 }
 0x4bb   :  { %4855 = vmatprep.subr.bf16.mxu1 %v5768_v52 }
 0x4bc   :  { %4901 = vmatpush1.bf16.msra.mxu0 %v5715_v30 }
 0x4bd   :  { %4336 = vmatmul.mubr.msk.f32.vlgmr.msra.gmra.mrb[10].mxu1 %vm227_vm1, %v624_v61  ;;  %4903 = vmatprep.subr.bf16.mxu0 %v5768_v52 }
 0x4be   :  { %4857 = vmatpush1.bf16.msra.mxu1 %v5779_v56  ;;  %975 = vmatprep.mubr.f32.mxu1 %v5586_v2 }
 0x4bf   :  { %4859 = vmatprep.subr.bf16.mxu1 %v5792_v60 }
 0x4c2   :  { %4861 = vmatpush1.bf16.msra.mxu1 %v5801_v63 }
 0x4c3   :  { %4863 = vmatprep.subr.bf16.mxu1 %v5808_v1 }
 0x4c6   :  { %4865 = vmatpush1.bf16.msra.mxu1 %v5827_v9 }
 0x4c7   :  { %4867 = vmatprep.subr.bf16.mxu1 %v5831_v11 }
 0x4ca   :  { %4869 = vmatpush1.bf16.msra.mxu1 %v5850_v20 }
 0x4cb   :  { %4871 = vmatprep.subr.bf16.mxu1 %v5854_v21 }
 0x582   :  { %v871_v8 = vpop.f32.mrb[4].mxu0 }
 0x583   :  { %v873_v13 = vpop.f32.mrb[5].mxu0  ;;  %v5234_v27 = vadd.f32 %v871_v8, %v5751_v41 }
 0x584   :  { %v5235_v40 = vadd.f32 %v873_v13, %v5741_v35 }
 0x585   :  { %v4340_v39 = vmul.f32 -1.442695, %v5234_v27 }
 0x586   :  { %5332 = vtanh.f32 %v5235_v40 }
 0x590   :  { %v768_v38 = vpop.f32.mrb[10].mxu1  ;;  %v5333_v17 = vpop.eup %5332 }
 0x591   :  { %v770_v14 = vpop.f32.mrb[11].mxu1  ;;  %893 = vrot.lane.b32.xlu0 %v5333_v17, %s5587_s9  ;;  %v773_v44 = vadd.f32 %v768_v38, %v5980_v33 }
 0x592   :  { %v774_v16 = vadd.f32 %v770_v14, %v5972_v22 }
 0x593   :  { %v4337_v45 = vmul.f32 -1.442695, %v773_v44  ;;  %v4341_v44 = vmul.f32 -1.442695, %v5235_v40 }
 0x594   :  { %5334 = vtanh.f32 %v774_v16 }
 0x595   :  { %5336 = vpow2.f32 %v4340_v39 }
 0x596   :  { %5338 = vpow2.f32 %v4337_v45 }
 0x59e   :  { %v5335_v24 = vpop.eup %5334 }
 0x59f   :  { %790 = vrot.lane.b32.xlu1 %v5335_v24, %s5587_s9  ;;  %v5337_v47 = vpop.eup %5336 }
 0x5a0   :  { %v884_v48 = vadd.f32 1.0, %v5337_v47  ;;  %v5339_v51 = vpop.eup %5338 }
 0x5a1   :  { %v781_v53 = vadd.f32 1.0, %v5339_v51 }
 0x5a2   :  { %5340 = vrcp.f32 %v884_v48 }
 0x5a3   :  { %5342 = vrcp.f32 %v781_v53 }
 0x5ac   :  { %v5341_v58 = vpop.eup %5340 }
 0x5ad   :  { %v5343_v36 = vpop.eup %5342  ;;  %v891_v8 = vmul.f32 %v5341_v58, %v5990_v34  ;;  %v4338_v34 = vmul.f32 -1.442695, %v774_v16 }
 0x5ae   :  { %v788_v14 = vmul.f32 %v5343_v36, %v5986_v23 }
 0x603   :  { %v894_v55 = vpop.permute.xlu0 %893 }
 0x604   :  { %v896_v57 = vmul.f32 %v5341_v58, %v894_v55 }
 0x606   :  { %898 = vrot.lane.b32.xlu0 %v896_v57, %s5587_s9 }
 0x611   :  { %v791_v37 = vpop.permute.xlu1 %790 }
 0x612   :  { %v793_v61 = vmul.f32 %v5343_v36, %v791_v37 }
 0x614   :  { %795 = vrot.lane.b32.xlu1 %v793_v61, %s5587_s9 }
 0x678   :  { %v899_v13 = vpop.permute.xlu0 %898 }
 0x679   :  { %v6037_v38 = vadd.f32 %v899_v13, %v891_v8 }
 0x67b   :  { %5344 = vtanh.f32 %v6037_v38 }
 0x685   :  { %v5345_v27 = vpop.eup %5344 }
 0x686   :  { %v796_v17 = vpop.permute.xlu1 %795  ;;  %904 = vrot.lane.b32.xlu0 %v5345_v27, %s5587_s9 }
 0x687   :  { %v6041_v24 = vadd.f32 %v796_v17, %v788_v14 }
 0x689   :  { %5346 = vtanh.f32 %v6041_v24 }
 0x68a   :  { %5348 = vpow2.f32 %v4341_v44 }
 0x68b   :  { %5350 = vpow2.f32 %v4338_v34 }
 0x693   :  { %v5347_v39 = vpop.eup %5346 }
 0x694   :  { %801 = vrot.lane.b32.xlu1 %v5347_v39, %s5587_s9  ;;  %v5349_v45 = vpop.eup %5348 }
 0x695   :  { %v885_v47 = vadd.f32 1.0, %v5349_v45  ;;  %v5351_v48 = vpop.eup %5350 }
 0x696   :  { %v782_v23 = vadd.f32 1.0, %v5351_v48 }
 0x697   :  { %5352 = vrcp.f32 %v885_v47 }
 0x698   :  { %5354 = vrcp.f32 %v782_v23 }
 0x6a1   :  { %v5353_v51 = vpop.eup %5352 }
 0x6a2   :  { %v5355_v40 = vpop.eup %5354 }
 0x6f8   :  { %v905_v53 = vpop.permute.xlu0 %904 }
 0x6f9   :  { %v907_v58 = vmul.f32 %v5353_v51, %v905_v53 }
 0x6fb   :  { %4346 = vmatmul.mubr.msk.f32.vlgmr.msra.gmra.mrb[6].mxu0 %vm227_vm1, %v907_v58 }
 0x6fc   :  { %4905 = vmatpush1.bf16.msra.mxu0 %v5779_v56  ;;  %1258 = vmatprep.mubr.f32.mxu0 %v5586_v2 }
 0x6fd   :  { %4907 = vmatprep.subr.bf16.mxu0 %v5792_v60 }
 0x700   :  { %4909 = vmatpush1.bf16.msra.mxu0 %v5801_v63 }
 0x701   :  { %4911 = vmatprep.subr.bf16.mxu0 %v5808_v1 }
 0x704   :  { %4913 = vmatpush1.bf16.msra.mxu0 %v5827_v9 }
 0x705   :  { %4915 = vmatprep.subr.bf16.mxu0 %v5831_v11 }
 0x706   :  { %v802_v16 = vpop.permute.xlu1 %801 }
 0x707   :  { %v6052_v55 = vmul.f32 %v5355_v40, %v802_v16 }
 0x708   :  { %4917 = vmatpush1.bf16.msra.mxu0 %v5850_v20 }
 0x709   :  { %4342 = vmatmul.mubr.msk.f32.vlgmr.msra.gmra.mrb[12].mxu1 %vm227_vm1, %v6052_v55  ;;  %4919 = vmatprep.subr.bf16.mxu0 %v5854_v21 }
 0x70a   :  { %4873 = vmatpush1.bf16.msra.mxu1 %v5870_v28  ;;  %1049 = vmatprep.mubr.f32.mxu1 %v5586_v2 }
 0x70b   :  { %4875 = vmatprep.subr.bf16.mxu1 %v5873_v29 }
 0x70e   :  { %4877 = vmatpush1.bf16.msra.mxu1 %v5889_v42 }
 0x70f   :  { %4879 = vmatprep.subr.bf16.mxu1 %v5893_v43 }
 0x712   :  { %4881 = vmatpush1.bf16.msra.mxu1 %v5908_v49 }
 0x713   :  { %4883 = vmatprep.subr.bf16.mxu1 %v5911_v50 }
 0x716   :  { %4885 = vmatpush1.bf16.msra.mxu1 %v5920_v54 }
 0x717   :  { %4951 = vmatprep.subr.bf16.mxu1 %v5768_v52 }
 0x719   :  { %4343 = vmatmul.mubr.msk.f32.vlgmr.msra.gmra.mrb[12].mxu1 %vm227_vm1, %v907_v58 }
 0x71a   :  { %4953 = vmatpush1.bf16.msra.mxu1 %v5779_v56  ;;  %1541 = vmatprep.mubr.f32.mxu1 %v5586_v2 }
 0x71b   :  { %4955 = vmatprep.subr.bf16.mxu1 %v5792_v60 }
 0x71e   :  { %4957 = vmatpush1.bf16.msra.mxu1 %v5801_v63 }
 0x71f   :  { %4959 = vmatprep.subr.bf16.mxu1 %v5808_v1 }
 0x722   :  { %4961 = vmatpush1.bf16.msra.mxu1 %v5827_v9 }
 0x723   :  { %4963 = vmatprep.subr.bf16.mxu1 %v5831_v11 }
 0x726   :  { %4965 = vmatpush1.bf16.msra.mxu1 %v5850_v20 }
 0x727   :  { %4967 = vmatprep.subr.bf16.mxu1 %v5854_v21 }
 0x7ce   :  { %v1154_v57 = vpop.f32.mrb[6].mxu0 }
 0x7cf   :  { %v1156_v36 = vpop.f32.mrb[7].mxu0  ;;  %v5236_v27 = vadd.f32 %v1154_v57, %v5751_v41 }
 0x7d0   :  { %v5237_v37 = vadd.f32 %v1156_v36, %v5741_v35 }
 0x7d1   :  { %v4347_v39 = vmul.f32 -1.442695, %v5236_v27 }
 0x7d2   :  { %5356 = vtanh.f32 %v5237_v37 }
 0x7dc   :  { %v5357_v61 = vpop.eup %5356 }
 0x7dd   :  { %1176 = vrot.lane.b32.xlu0 %v5357_v61, %s5587_s9 }
 0x7ec   :  { %v1051_v8 = vpop.f32.mrb[12].mxu1 }
 0x7ed   :  { %v1053_v13 = vpop.f32.mrb[13].mxu1  ;;  %v1056_v45 = vadd.f32 %v1051_v8, %v5980_v33 }
 0x7ee   :  { %v1057_v14 = vadd.f32 %v1053_v13, %v5972_v22 }
 0x7ef   :  { %v4344_v47 = vmul.f32 -1.442695, %v1056_v45  ;;  %v4348_v45 = vmul.f32 -1.442695, %v5237_v37 }
 0x7f0   :  { %5358 = vtanh.f32 %v1057_v14 }
 0x7f1   :  { %5360 = vpow2.f32 %v4347_v39 }
 0x7fa   :  { %v5359_v17 = vpop.eup %5358 }
 0x7fb   :  { %1073 = vrot.lane.b32.xlu1 %v5359_v17, %s5587_s9  ;;  %v5361_v44 = vpop.eup %5360 }
 0x7fc   :  { %v1167_v34 = vadd.f32 1.0, %v5361_v44 }
 0x7fe   :  { %5362 = vrcp.f32 %v1167_v34  ;;  %v4345_v34 = vmul.f32 -1.442695, %v1057_v14 }
 0x7ff   :  { %5364 = vpow2.f32 %v4344_v47 }
 0x808   :  { %v5363_v48 = vpop.eup %5362 }
 0x809   :  { %v5365_v53 = vpop.eup %5364  ;;  %v1174_v36 = vmul.f32 %v5363_v48, %v6037_v38 }
 0x80a   :  { %v1064_v58 = vadd.f32 1.0, %v5365_v53 }
 0x80c   :  { %5366 = vrcp.f32 %v1064_v58 }
 0x816   :  { %v5367_v40 = vpop.eup %5366 }
 0x817   :  { %v1071_v17 = vmul.f32 %v5367_v40, %v6041_v24 }
 0x84f   :  { %v1177_v23 = vpop.permute.xlu0 %1176 }
 0x850   :  { %v1179_v51 = vmul.f32 %v5363_v48, %v1177_v23 }
 0x852   :  { %1181 = vrot.lane.b32.xlu0 %v1179_v51, %s5587_s9 }
 0x86d   :  { %v1074_v16 = vpop.permute.xlu1 %1073 }
 0x86e   :  { %v1076_v57 = vmul.f32 %v5367_v40, %v1074_v16 }
 0x870   :  { %1078 = vrot.lane.b32.xlu1 %v1076_v57, %s5587_s9 }
 0x8c4   :  { %v1182_v61 = vpop.permute.xlu0 %1181 }
 0x8c5   :  { %v6088_v13 = vadd.f32 %v1182_v61, %v1174_v36  ;;  %v205_v61 = vadd.f32 %v5931_v62, %v5751_v41 }
 0x8c7   :  { %5368 = vtanh.f32 %v6088_v13 }
 0x8d1   :  { %v5369_v8 = vpop.eup %5368 }
 0x8d2   :  { %1187 = vrot.lane.b32.xlu0 %v5369_v8, %s5587_s9  ;;  %v207_v8 = vadd.f32 %v5933_v0, %v5741_v35 }
 0x8e2   :  { %v1079_v27 = vpop.permute.xlu1 %1078 }
 0x8e3   :  { %v6093_v39 = vadd.f32 %v1079_v27, %v1071_v17 }
 0x8e5   :  { %5370 = vtanh.f32 %v6093_v39 }
 0x8e6   :  { %5372 = vpow2.f32 %v4345_v34 }
 0x8e7   :  { %5374 = vpow2.f32 %v4348_v45 }
 0x8ef   :  { %v5371_v44 = vpop.eup %5370 }
 0x8f0   :  { %1084 = vrot.lane.b32.xlu1 %v5371_v44, %s5587_s9  ;;  %v5373_v38 = vpop.eup %5372 }
 0x8f1   :  { %v1065_v47 = vadd.f32 1.0, %v5373_v38  ;;  %v5375_v48 = vpop.eup %5374 }
 0x8f2   :  { %v1168_v24 = vadd.f32 1.0, %v5375_v48 }
 0x8f3   :  { %5376 = vrcp.f32 %v1065_v47 }
 0x8f4   :  { %5378 = vrcp.f32 %v1168_v24 }
 0x8fd   :  { %v5377_v23 = vpop.eup %5376 }
 0x8fe   :  { %v5379_v14 = vpop.eup %5378 }
 0x944   :  { %v1188_v37 = vpop.permute.xlu0 %1187 }
 0x945   :  { %v1190_v58 = vmul.f32 %v5379_v14, %v1188_v37 }
 0x962   :  { %v1085_v51 = vpop.permute.xlu1 %1084 }
 0x963   :  { %v6097_v53 = vmul.f32 %v5377_v23, %v1085_v51 }
 0x965   :  { %4349 = vmatmul.mubr.msk.f32.vlgmr.msra.gmra.mrb[8].mxu0 %vm227_vm1, %v6097_v53 }
 0x966   :  { %4921 = vmatpush1.bf16.msra.mxu0 %v5870_v28  ;;  %1332 = vmatprep.mubr.f32.mxu0 %v5586_v2 }
 0x967   :  { %4923 = vmatprep.subr.bf16.mxu0 %v5873_v29 }
 0x96a   :  { %4925 = vmatpush1.bf16.msra.mxu0 %v5889_v42 }
 0x96b   :  { %4927 = vmatprep.subr.bf16.mxu0 %v5893_v43 }
 0x96e   :  { %4929 = vmatpush1.bf16.msra.mxu0 %v5908_v49 }
 0x96f   :  { %4931 = vmatprep.subr.bf16.mxu0 %v5911_v50 }
 0x972   :  { %4933 = vmatpush1.bf16.msra.mxu0 %v5920_v54 }
 0x973   :  { %4935 = vmatprep.subr.bf16.mxu0 %v5641_v7 }
 0x975   :  { %4350 = vmatmul.mubr.msk.f32.vlgmr.msra.gmra.mrb[8].mxu0 %vm227_vm1, %v1190_v58 }
 0x976   :  { %4937 = vmatpush1.bf16.msra.mxu0 %v5650_v10  ;;  %1435 = vmatprep.mubr.f32.mxu0 %v5586_v2 }
 0x977   :  { %4939 = vmatprep.subr.bf16.mxu0 %v5666_v15 }
 0x97a   :  { %4941 = vmatpush1.bf16.msra.mxu0 %v5675_v18 }
 0x97b   :  { %4943 = vmatprep.subr.bf16.mxu0 %v5678_v19 }
 0x97e   :  { %4945 = vmatpush1.bf16.msra.mxu0 %v5698_v25 }
 0x97f   :  { %4947 = vmatprep.subr.bf16.mxu0 %v5701_v26 }
 0x982   :  { %4949 = vmatpush1.bf16.msra.mxu0 %v5715_v30 }
 0x983   :  { %4983 = vmatprep.subr.bf16.mxu0 %v5641_v7 }
 0x985   :  { %4353 = vmatmul.mubr.msk.f32.vlgmr.msra.gmra.mrb[10].mxu0 %vm227_vm1, %v1190_v58 }
 0x986   :  { %4985 = vmatpush1.bf16.msra.mxu0 %v5650_v10  ;;  %1718 = vmatprep.mubr.f32.mxu0 %v5586_v2 }
 0x987   :  { %4987 = vmatprep.subr.bf16.mxu0 %v5666_v15 }
 0x98a   :  { %4989 = vmatpush1.bf16.msra.mxu0 %v5675_v18 }
 0x98b   :  { %4991 = vmatprep.subr.bf16.mxu0 %v5678_v19 }
 0x98e   :  { %4993 = vmatpush1.bf16.msra.mxu0 %v5698_v25 }
 0x98f   :  { %4995 = vmatprep.subr.bf16.mxu0 %v5701_v26 }
 0x992   :  { %4997 = vmatpush1.bf16.msra.mxu0 %v5715_v30 }
 0x993   :  { %5031 = vmatprep.subr.bf16.mxu0 %v5641_v7 }
 0xa48   :  { %v1334_v40 = vpop.f32.mrb[8].mxu0 }
 0xa49   :  { %v1336_v16 = vpop.f32.mrb[9].mxu0  ;;  %v1339_v45 = vadd.f32 %v1334_v40, %v5980_v33 }
 0xa4a   :  { %v1340_v57 = vadd.f32 %v1336_v16, %v5972_v22 }
 0xa4b   :  { %v4351_v47 = vmul.f32 -1.442695, %v1339_v45 }
 0xa4c   :  { %5380 = vtanh.f32 %v1340_v57 }
 0xa56   :  { %v5381_v36 = vpop.eup %5380 }
 0xa57   :  { %1356 = vrot.lane.b32.xlu1 %v5381_v36, %s5587_s9 }
 0xa58   :  { %v1437_v17 = vpop.f32.mrb[10].mxu0 }
 0xa59   :  { %v1442_v27 = vadd.f32 %v1437_v17, %v205_v61  ;;  %v1439_v44 = vpop.f32.mrb[11].mxu0 }
 0xa5a   :  { %v1443_v34 = vadd.f32 %v1439_v44, %v207_v8 }
 0xa5b   :  { %v4354_v23 = vmul.f32 -1.442695, %v1442_v27 }
 0xa5c   :  { %5382 = vtanh.f32 %v1443_v34 }
 0xa5d   :  { %5384 = vpow2.f32 %v4351_v47  ;;  %v4352_v47 = vmul.f32 -1.442695, %v1340_v57 }
 0xa5e   :  { %5386 = vpow2.f32 %v4354_v23 }
 0xa66   :  { %v5383_v38 = vpop.eup %5382 }
 0xa67   :  { %1459 = vrot.lane.b32.xlu0 %v5383_v38, %s5587_s9  ;;  %v5385_v48 = vpop.eup %5384 }
 0xa68   :  { %v1347_v62 = vadd.f32 1.0, %v5385_v48  ;;  %v5387_v51 = vpop.eup %5386  ;;  %v4355_v48 = vmul.f32 -1.442695, %v1443_v34 }
 0xa69   :  { %v1450_v14 = vadd.f32 1.0, %v5387_v51 }
 0xa6a   :  { %5388 = vrcp.f32 %v1347_v62 }
 0xa6b   :  { %5390 = vrcp.f32 %v1450_v14  ;;  %v211_v14 = vadd.f32 %v5935_v3, %v5751_v41 }
 0xa74   :  { %v5389_v24 = vpop.eup %5388 }
 0xa75   :  { %v5391_v58 = vpop.eup %5390  ;;  %v1354_v40 = vmul.f32 %v5389_v24, %v6093_v39 }
 0xa76   :  { %v1457_v27 = vmul.f32 %v5391_v58, %v6088_v13 }
 0xac9   :  { %v1357_v0 = vpop.permute.xlu1 %1356 }
 0xaca   :  { %v1359_v37 = vmul.f32 %v5389_v24, %v1357_v0 }
 0xacc   :  { %1361 = vrot.lane.b32.xlu1 %v1359_v37, %s5587_s9 }
 0xad9   :  { %v1460_v16 = vpop.permute.xlu0 %1459 }
 0xada   :  { %v1462_v36 = vmul.f32 %v5391_v58, %v1460_v16  ;;  %v213_v58 = vadd.f32 %v5937_v4, %v5741_v35 }
 0xadc   :  { %1464 = vrot.lane.b32.xlu0 %v1462_v36, %s5587_s9 }
 0xb3e   :  { %v1362_v61 = vpop.permute.xlu1 %1361 }
 0xb3f   :  { %v6141_v8 = vadd.f32 %v1362_v61, %v1354_v40 }
 0xb41   :  { %5392 = vtanh.f32 %v6141_v8 }
 0xb4b   :  { %v5393_v17 = vpop.eup %5392 }
 0xb4c   :  { %1367 = vrot.lane.b32.xlu1 %v5393_v17, %s5587_s9 }
 0xb4e   :  { %v1465_v44 = vpop.permute.xlu0 %1464 }
 0xb4f   :  { %v6146_v38 = vadd.f32 %v1465_v44, %v1457_v27 }
 0xb51   :  { %5394 = vtanh.f32 %v6146_v38 }
 0xb52   :  { %5396 = vpow2.f32 %v4352_v47 }
 0xb53   :  { %5398 = vpow2.f32 %v4355_v48 }
 0xb5b   :  { %v5395_v45 = vpop.eup %5394 }
 0xb5c   :  { %1470 = vrot.lane.b32.xlu0 %v5395_v45, %s5587_s9  ;;  %v5397_v39 = vpop.eup %5396 }
 0xb5d   :  { %v1348_v23 = vadd.f32 1.0, %v5397_v39  ;;  %v5399_v62 = vpop.eup %5398 }
 0xb5e   :  { %v1451_v13 = vadd.f32 1.0, %v5399_v62 }
 0xb5f   :  { %5400 = vrcp.f32 %v1348_v23 }
 0xb60   :  { %5402 = vrcp.f32 %v1451_v13 }
 0xb69   :  { %v5401_v51 = vpop.eup %5400 }
 0xb6a   :  { %v5403_v57 = vpop.eup %5402 }
 0xbbe   :  { %v1368_v24 = vpop.permute.xlu1 %1367 }
 0xbbf   :  { %v6150_v0 = vmul.f32 %v5401_v51, %v1368_v24 }
 0xbc1   :  { %4356 = vmatmul.mubr.msk.f32.vlgmr.msra.gmra.mrb[14].mxu1 %vm227_vm1, %v6150_v0 }
 0xbc2   :  { %4969 = vmatpush1.bf16.msra.mxu1 %v5870_v28  ;;  %1615 = vmatprep.mubr.f32.mxu1 %v5586_v2 }
 0xbc3   :  { %4971 = vmatprep.subr.bf16.mxu1 %v5873_v29 }
 0xbc6   :  { %4973 = vmatpush1.bf16.msra.mxu1 %v5889_v42 }
 0xbc7   :  { %4975 = vmatprep.subr.bf16.mxu1 %v5893_v43 }
 0xbca   :  { %4977 = vmatpush1.bf16.msra.mxu1 %v5908_v49 }
 0xbcb   :  { %4979 = vmatprep.subr.bf16.mxu1 %v5911_v50 }
 0xbce   :  { %v1471_v34 = vpop.permute.xlu0 %1470  ;;  %4981 = vmatpush1.bf16.msra.mxu1 %v5920_v54 }
 0xbcf   :  { %v1473_v37 = vmul.f32 %v5403_v57, %v1471_v34  ;;  %4999 = vmatprep.subr.bf16.mxu1 %v5768_v52 }
 0xbd1   :  { %4357 = vmatmul.mubr.msk.f32.vlgmr.msra.gmra.mrb[14].mxu1 %vm227_vm1, %v1473_v37  ;;  %4360 = vmatmul.mubr.msk.f32.vlgmr.msra.gmra.mrb[12].mxu0 %vm227_vm1, %v1473_v37 }
 0xbd2   :  { %5001 = vmatpush1.bf16.msra.mxu1 %v5779_v56  ;;  %5033 = vmatpush1.bf16.msra.mxu0 %v5650_v10 }
 0xbd3   :  { %5003 = vmatprep.subr.bf16.mxu1 %v5792_v60  ;;  %5035 = vmatprep.subr.bf16.mxu0 %v5666_v15 }
 0xbd4   :  { %1824 = vmatprep.mubr.f32.mxu1 %v5586_v2  ;;  %2001 = vmatprep.mubr.f32.mxu0 %v5586_v2 }
 0xbd6   :  { %5005 = vmatpush1.bf16.msra.mxu1 %v5801_v63  ;;  %5037 = vmatpush1.bf16.msra.mxu0 %v5675_v18 }
 0xbd7   :  { %5007 = vmatprep.subr.bf16.mxu1 %v5808_v1  ;;  %5039 = vmatprep.subr.bf16.mxu0 %v5678_v19 }
 0xbda   :  { %5009 = vmatpush1.bf16.msra.mxu1 %v5827_v9  ;;  %5041 = vmatpush1.bf16.msra.mxu0 %v5698_v25 }
 0xbdb   :  { %5011 = vmatprep.subr.bf16.mxu1 %v5831_v11  ;;  %5043 = vmatprep.subr.bf16.mxu0 %v5701_v26 }
 0xbde   :  { %5013 = vmatpush1.bf16.msra.mxu1 %v5850_v20  ;;  %5045 = vmatpush1.bf16.msra.mxu0 %v5715_v30 }
 0xbdf   :  { %5015 = vmatprep.subr.bf16.mxu1 %v5854_v21  ;;  %5079 = vmatprep.subr.bf16.mxu0 %v5641_v7 }
 0xca4   :  { %v1617_v16 = vpop.f32.mrb[14].mxu1  ;;  %v1720_v36 = vpop.f32.mrb[12].mxu0 }
 0xca5   :  { %v1725_v40 = vadd.f32 %v1720_v36, %v211_v14  ;;  %v1619_v61 = vpop.f32.mrb[15].mxu1  ;;  %v1722_v17 = vpop.f32.mrb[13].mxu0  ;;  %v1622_v3 = vadd.f32 %v1617_v16, %v5980_v33 }
 0xca6   :  { %v1623_v27 = vadd.f32 %v1619_v61, %v5972_v22  ;;  %v1726_v44 = vadd.f32 %v1722_v17, %v213_v58 }
 0xca7   :  { %v4358_v47 = vmul.f32 -1.442695, %v1622_v3  ;;  %v4361_v4 = vmul.f32 -1.442695, %v1725_v40 }
 0xca8   :  { %5404 = vtanh.f32 %v1623_v27 }
 0xca9   :  { %5406 = vtanh.f32 %v1726_v44 }
 0xcaa   :  { %5408 = vpow2.f32 %v4358_v47 }
 0xcab   :  { %5410 = vpow2.f32 %v4361_v4 }
 0xcb2   :  { %v5405_v45 = vpop.eup %5404 }
 0xcb3   :  { %1639 = vrot.lane.b32.xlu1 %v5405_v45, %s5587_s9  ;;  %v5407_v7 = vpop.eup %5406 }
 0xcb4   :  { %1742 = vrot.lane.b32.xlu0 %v5407_v7, %s5587_s9  ;;  %v5409_v39 = vpop.eup %5408  ;;  %v4359_v7 = vmul.f32 -1.442695, %v1623_v27 }
 0xcb5   :  { %v1630_v48 = vadd.f32 1.0, %v5409_v39  ;;  %v5411_v23 = vpop.eup %5410 }
 0xcb6   :  { %v1733_v62 = vadd.f32 1.0, %v5411_v23 }
 0xcb7   :  { %5412 = vrcp.f32 %v1630_v48 }
 0xcb8   :  { %5414 = vrcp.f32 %v1733_v62 }
 0xcc1   :  { %v5413_v51 = vpop.eup %5412 }
 0xcc2   :  { %v5415_v57 = vpop.eup %5414  ;;  %v1637_v14 = vmul.f32 %v5413_v51, %v6141_v8  ;;  %v4362_v8 = vmul.f32 -1.442695, %v1726_v44 }
 0xcc3   :  { %v1740_v36 = vmul.f32 %v5415_v57, %v6146_v38 }
 0xd25   :  { %v1640_v24 = vpop.permute.xlu1 %1639 }
 0xd26   :  { %v1642_v13 = vmul.f32 %v5413_v51, %v1640_v24  ;;  %v1743_v34 = vpop.permute.xlu0 %1742 }
 0xd27   :  { %v1745_v37 = vmul.f32 %v5415_v57, %v1743_v34 }
 0xd28   :  { %1644 = vrot.lane.b32.xlu1 %v1642_v13, %s5587_s9 }
 0xd29   :  { %1747 = vrot.lane.b32.xlu0 %v1745_v37, %s5587_s9 }
 0xd9a   :  { %v1645_v58 = vpop.permute.xlu1 %1644 }
 0xd9b   :  { %v6194_v16 = vadd.f32 %v1645_v58, %v1637_v14  ;;  %v1748_v40 = vpop.permute.xlu0 %1747 }
 0xd9c   :  { %v6198_v61 = vadd.f32 %v1748_v40, %v1740_v36 }
 0xd9d   :  { %5416 = vtanh.f32 %v6194_v16 }
 0xd9e   :  { %5418 = vtanh.f32 %v6198_v61 }
 0xd9f   :  { %5420 = vpow2.f32 %v4359_v7 }
 0xda0   :  { %5422 = vpow2.f32 %v4362_v8 }
 0xda7   :  { %v5417_v17 = vpop.eup %5416 }
 0xda8   :  { %1650 = vrot.lane.b32.xlu1 %v5417_v17, %s5587_s9  ;;  %v5419_v45 = vpop.eup %5418 }
 0xda9   :  { %1753 = vrot.lane.b32.xlu0 %v5419_v45, %s5587_s9  ;;  %v5421_v3 = vpop.eup %5420 }
 0xdaa   :  { %v1631_v47 = vadd.f32 1.0, %v5421_v3  ;;  %v5423_v4 = vpop.eup %5422 }
 0xdab   :  { %v1734_v38 = vadd.f32 1.0, %v5423_v4 }
 0xdac   :  { %5424 = vrcp.f32 %v1631_v47 }
 0xdad   :  { %5426 = vrcp.f32 %v1734_v38 }
 0xdb6   :  { %v5425_v39 = vpop.eup %5424 }
 0xdb7   :  { %v5427_v27 = vpop.eup %5426 }
 0xe1a   :  { %v1651_v48 = vpop.permute.xlu1 %1650 }
 0xe1b   :  { %v6203_v23 = vmul.f32 %v5425_v39, %v1651_v48  ;;  %v1754_v44 = vpop.permute.xlu0 %1753 }
 0xe1c   :  { %v1756_v62 = vmul.f32 %v5427_v27, %v1754_v44 }
 0xe1d   :  { %4363 = vmatmul.mubr.msk.f32.vlgmr.msra.gmra.mrb[16].mxu1 %vm227_vm1, %v6203_v23 }
 0xe1e   :  { %5017 = vmatpush1.bf16.msra.mxu1 %v5870_v28  ;;  %1898 = vmatprep.mubr.f32.mxu1 %v5586_v2 }
 0xe1f   :  { %5019 = vmatprep.subr.bf16.mxu1 %v5873_v29  ;;  %4367 = vmatmul.mubr.msk.f32.vlgmr.msra.gmra.mrb[14].mxu0 %vm227_vm1, %v1756_v62 }
 0xe20   :  { %5081 = vmatpush1.bf16.msra.mxu0 %v5650_v10  ;;  %2284 = vmatprep.mubr.f32.mxu0 %v5586_v2  ;;  %v217_v10 = vadd.f32 %v5939_v46, %v5751_v41 }
 0xe21   :  { %5083 = vmatprep.subr.bf16.mxu0 %v5666_v15  ;;  %v219_v15 = vadd.f32 %v5941_v5, %v5741_v35 }
 0xe22   :  { %5021 = vmatpush1.bf16.msra.mxu1 %v5889_v42 }
 0xe23   :  { %5023 = vmatprep.subr.bf16.mxu1 %v5893_v43 }
 0xe24   :  { %5085 = vmatpush1.bf16.msra.mxu0 %v5675_v18 }
 0xe25   :  { %5087 = vmatprep.subr.bf16.mxu0 %v5678_v19 }
 0xe26   :  { %5025 = vmatpush1.bf16.msra.mxu1 %v5908_v49 }
 0xe27   :  { %5027 = vmatprep.subr.bf16.mxu1 %v5911_v50 }
 0xe28   :  { %5089 = vmatpush1.bf16.msra.mxu0 %v5698_v25 }
 0xe29   :  { %5091 = vmatprep.subr.bf16.mxu0 %v5701_v26 }
 0xe2a   :  { %5029 = vmatpush1.bf16.msra.mxu1 %v5920_v54 }
 0xe2b   :  { %5047 = vmatprep.subr.bf16.mxu1 %v5768_v52 }
 0xe2c   :  { %5093 = vmatpush1.bf16.msra.mxu0 %v5715_v30 }
 0xe2d   :  { %4364 = vmatmul.mubr.msk.f32.vlgmr.msra.gmra.mrb[16].mxu1 %vm227_vm1, %v1756_v62  ;;  %5095 = vmatprep.subr.bf16.mxu0 %v5768_v52 }
 0xe2e   :  { %5049 = vmatpush1.bf16.msra.mxu1 %v5779_v56  ;;  %2107 = vmatprep.mubr.f32.mxu1 %v5586_v2 }
 0xe2f   :  { %5051 = vmatprep.subr.bf16.mxu1 %v5792_v60 }
 0xe32   :  { %5053 = vmatpush1.bf16.msra.mxu1 %v5801_v63 }
 0xe33   :  { %5055 = vmatprep.subr.bf16.mxu1 %v5808_v1 }
 0xe36   :  { %5057 = vmatpush1.bf16.msra.mxu1 %v5827_v9 }
 0xe37   :  { %5059 = vmatprep.subr.bf16.mxu1 %v5831_v11 }
 0xe3a   :  { %5061 = vmatpush1.bf16.msra.mxu1 %v5850_v20 }
 0xe3b   :  { %5063 = vmatprep.subr.bf16.mxu1 %v5854_v21 }
 0xef2   :  { %v2003_v18 = vpop.f32.mrb[14].mxu0 }
 0xef3   :  { %v2008_v19 = vadd.f32 %v2003_v18, %v217_v10  ;;  %v2005_v25 = vpop.f32.mrb[15].mxu0 }
 0xef4   :  { %v2009_v26 = vadd.f32 %v2005_v25, %v219_v15 }
 0xef5   :  { %v4368_v46 = vmul.f32 -1.442695, %v2008_v19 }
 0xef6   :  { %5428 = vtanh.f32 %v2009_v26  ;;  %v4369_v62 = vmul.f32 -1.442695, %v2009_v26 }
 0xf00   :  { %v1900_v30 = vpop.f32.mrb[16].mxu1  ;;  %v5429_v24 = vpop.eup %5428 }
 0xf01   :  { %v1902_v52 = vpop.f32.mrb[17].mxu1  ;;  %2025 = vrot.lane.b32.xlu0 %v5429_v24, %s5587_s9  ;;  %v1905_v5 = vadd.f32 %v1900_v30, %v5980_v33 }
 0xf02   :  { %v1906_v51 = vadd.f32 %v1902_v52, %v5972_v22 }
 0xf03   :  { %v4365_v57 = vmul.f32 -1.442695, %v1905_v5 }
 0xf04   :  { %5430 = vtanh.f32 %v1906_v51 }
 0xf05   :  { %5432 = vpow2.f32 %v4368_v46  ;;  %v2510_v46 = vld [vmem:[%s7197_s2 + $0x38] sm:$0xff] }
 0xf06   :  { %5434 = vpow2.f32 %v4365_v57  ;;  %v223_v57 = vadd.f32 %v5943_v6, %v5751_v41 }
 0xf0e   :  { %v5431_v13 = vpop.eup %5430 }
 0xf0f   :  { %1922 = vrot.lane.b32.xlu1 %v5431_v13, %s5587_s9  ;;  %v5433_v34 = vpop.eup %5432  ;;  %v2509_v13 = vld [vmem:[%s7197_s2 + $0x30] sm:$0xff] }
 0xf10   :  { %v2016_v37 = vadd.f32 1.0, %v5433_v34  ;;  %v5435_v14 = vpop.eup %5434  ;;  %v5138_v5 = vpack.c.bf16 %v2510_v46, %v2509_v13  ;;  %v225_v34 = vadd.f32 %v5945_v12, %v5741_v35 }
 0xf11   :  { %v1913_v58 = vadd.f32 1.0, %v5435_v14 }
 0xf12   :  { %5436 = vrcp.f32 %v2016_v37 }
 0xf13   :  { %5438 = vrcp.f32 %v1913_v58 }
 0xf1c   :  { %v5437_v36 = vpop.eup %5436 }
 0xf1d   :  { %v5439_v45 = vpop.eup %5438  ;;  %v2023_v3 = vmul.f32 %v5437_v36, %v6198_v61  ;;  %v4366_v61 = vmul.f32 -1.442695, %v1906_v51 }
 0xf1e   :  { %v1920_v38 = vmul.f32 %v5439_v45, %v6194_v16 }
 0xf73   :  { %v2026_v40 = vpop.permute.xlu0 %2025 }
 0xf74   :  { %v2028_v17 = vmul.f32 %v5437_v36, %v2026_v40 }
 0xf76   :  { %2030 = vrot.lane.b32.xlu0 %v2028_v17, %s5587_s9 }
 0xf81   :  { %v1923_v7 = vpop.permute.xlu1 %1922 }
 0xf82   :  { %v1925_v8 = vmul.f32 %v5439_v45, %v1923_v7 }
 0xf84   :  { %1927 = vrot.lane.b32.xlu1 %v1925_v8, %s5587_s9 }
 0xfe8   :  { %v2031_v47 = vpop.permute.xlu0 %2030 }
 0xfe9   :  { %v6247_v4 = vadd.f32 %v2031_v47, %v2023_v3 }
 0xfeb   :  { %5440 = vtanh.f32 %v6247_v4 }
 0xff5   :  { %v5441_v27 = vpop.eup %5440 }
 0xff6   :  { %v1928_v39 = vpop.permute.xlu1 %1927  ;;  %2036 = vrot.lane.b32.xlu0 %v5441_v27, %s5587_s9 }
 0xff7   :  { %v6251_v48 = vadd.f32 %v1928_v39, %v1920_v38 }
 0xff9   :  { %5442 = vtanh.f32 %v6251_v48 }
 0xffa   :  { %5444 = vpow2.f32 %v4369_v62 }
 0xffb   :  { %5446 = vpow2.f32 %v4366_v61 }
0x1003   :  { %v5443_v44 = vpop.eup %5442 }
0x1004   :  { %1933 = vrot.lane.b32.xlu1 %v5443_v44, %s5587_s9  ;;  %v5445_v10 = vpop.eup %5444 }
0x1005   :  { %v2017_v15 = vadd.f32 1.0, %v5445_v10  ;;  %v5447_v18 = vpop.eup %5446 }
0x1006   :  { %v1914_v16 = vadd.f32 1.0, %v5447_v18 }
0x1007   :  { %5448 = vrcp.f32 %v2017_v15 }
0x1008   :  { %5450 = vrcp.f32 %v1914_v16 }
0x1011   :  { %v5449_v19 = vpop.eup %5448 }
0x1012   :  { %v5451_v26 = vpop.eup %5450 }
0x1068   :  { %v2037_v25 = vpop.permute.xlu0 %2036 }
0x1069   :  { %v2039_v30 = vmul.f32 %v5449_v19, %v2037_v25 }
0x106b   :  { %4374 = vmatmul.mubr.msk.f32.vlgmr.msra.gmra.mrb[16].mxu0 %vm227_vm1, %v2039_v30 }
0x106c   :  { %5097 = vmatpush1.bf16.msra.mxu0 %v5779_v56  ;;  %2390 = vmatprep.mubr.f32.mxu0 %v5586_v2  ;;  %v2503_v56 = vld [vmem:[%s7197_s2] sm:$0xff] }
0x106d   :  { %5099 = vmatprep.subr.bf16.mxu0 %v5792_v60  ;;  %v2504_v60 = vld [vmem:[%s7197_s2 + $0x8] sm:$0xff] }
0x1070   :  { %5101 = vmatpush1.bf16.msra.mxu0 %v5801_v63  ;;  %v5126_v63 = vpack.c.bf16 %v2504_v60, %v2503_v56 }
0x1071   :  { %5103 = vmatprep.subr.bf16.mxu0 %v5808_v1  ;;  %v2505_v1 = vld [vmem:[%s7197_s2 + $0x10] sm:$0xff] }
0x1074   :  { %5105 = vmatpush1.bf16.msra.mxu0 %v5827_v9  ;;  %v2506_v9 = vld [vmem:[%s7197_s2 + $0x18] sm:$0xff] }
0x1075   :  { %5107 = vmatprep.subr.bf16.mxu0 %v5831_v11  ;;  %v5130_v11 = vpack.c.bf16 %v2506_v9, %v2505_v1 }
0x1076   :  { %v1934_v52 = vpop.permute.xlu1 %1933 }
0x1077   :  { %v6262_v51 = vmul.f32 %v5451_v26, %v1934_v52 }
0x1078   :  { %5109 = vmatpush1.bf16.msra.mxu0 %v5850_v20  ;;  %v2507_v20 = vld [vmem:[%s7197_s2 + $0x20] sm:$0xff] }
0x1079   :  { %4370 = vmatmul.mubr.msk.f32.vlgmr.msra.gmra.mrb[18].mxu1 %vm227_vm1, %v6262_v51  ;;  %5111 = vmatprep.subr.bf16.mxu0 %v5854_v21  ;;  %v2508_v21 = vld [vmem:[%s7197_s2 + $0x28] sm:$0xff] }
0x107a   :  { %5065 = vmatpush1.bf16.msra.mxu1 %v5870_v28  ;;  %2181 = vmatprep.mubr.f32.mxu1 %v5586_v2  ;;  %v5134_v24 = vpack.c.bf16 %v2508_v21, %v2507_v20 }
0x107b   :  { %5067 = vmatprep.subr.bf16.mxu1 %v5873_v29 }
0x107e   :  { %5069 = vmatpush1.bf16.msra.mxu1 %v5889_v42 }
0x107f   :  { %5071 = vmatprep.subr.bf16.mxu1 %v5893_v43 }
0x1082   :  { %5073 = vmatpush1.bf16.msra.mxu1 %v5908_v49 }
0x1083   :  { %5075 = vmatprep.subr.bf16.mxu1 %v5911_v50 }
0x1086   :  { %5077 = vmatpush1.bf16.msra.mxu1 %v5920_v54 }
0x1087   :  { %5127 = vmatprep.subr.bf16.mxu1 %v5126_v63 }
0x1089   :  { %4371 = vmatmul.mubr.msk.f32.vlgmr.msra.gmra.mrb[18].mxu1 %vm227_vm1, %v2039_v30 }
0x108a   :  { %5129 = vmatpush3.bf16.msra.mxu1 %v5126_v63  ;;  %4574 = vmatprep.mubr.msk.f32.mxu1 %vm227_vm1, %v5995_v59 }
0x108b   :  { %5131 = vmatprep.subr.bf16.mxu1 %v5130_v11 }
0x108e   :  { %5133 = vmatpush3.bf16.msra.mxu1 %v5130_v11 }
0x108f   :  { %5135 = vmatprep.subr.bf16.mxu1 %v5134_v24 }
0x1092   :  { %5137 = vmatpush3.bf16.msra.mxu1 %v5134_v24 }
0x1093   :  { %5139 = vmatprep.subr.bf16.mxu1 %v5138_v5 }
0x1096   :  { %5141 = vmatpush3.bf16.msra.mxu1 %v5138_v5 }
0x1099   :  { %4575 = vmatmul.mubr.msk.f32.vlgmr.msra.gmra.mrb[20].mxu1 %vm227_vm1, %v6052_v55 }
0x109a   :  { %4577 = vmatprep.mubr.msk.f32.mxu1 %vm227_vm1, %v6097_v53 }
0x109d   :  { %4578 = vmatmul.mubr.msk.f32.gmra.mrb[22].mxu1 %vm227_vm1, %v6150_v0 }
0x109e   :  { %4580 = vmatprep.mubr.msk.f32.mxu1 %vm227_vm1, %v6203_v23 }
0x10a1   :  { %4581 = vmatmul.mubr.msk.f32.gmra.mrb[24].mxu1 %vm227_vm1, %v6262_v51 }
0x113e   :  { %v2286_v37 = vpop.f32.mrb[16].mxu0 }
0x113f   :  { %v2291_v14 = vadd.f32 %v2286_v37, %v223_v57  ;;  %v2288_v58 = vpop.f32.mrb[17].mxu0  ;;  %v2633_v37 = vld [vmem:[%s7197_s2 + $0x50] sm:$0xff] }
0x1140   :  { %v2292_v36 = vadd.f32 %v2288_v58, %v225_v34  ;;  %v2632_v34 = vld [vmem:[%s7197_s2 + $0x48] sm:$0xff]  ;;  %v2635_v58 = vld [vmem:[%s7197_s2 + $0x60] sm:$0xff] }
0x1141   :  { %v4375_v38 = vmul.f32 -1.442695, %v2291_v14  ;;  %v2634_v14 = vld [vmem:[%s7197_s2 + $0x58] sm:$0xff] }
0x1142   :  { %5452 = vtanh.f32 %v2292_v36 }
0x114c   :  { %v5453_v40 = vpop.eup %5452 }
0x114d   :  { %2308 = vrot.lane.b32.xlu0 %v5453_v40, %s5587_s9 }
0x115c   :  { %v2183_v17 = vpop.f32.mrb[18].mxu1 }
0x115d   :  { %v2185_v45 = vpop.f32.mrb[19].mxu1  ;;  %v2188_v44 = vadd.f32 %v2183_v17, %v5980_v33 }
0x115e   :  { %v2189_v7 = vadd.f32 %v2185_v45, %v5972_v22 }
0x115f   :  { %v4372_v62 = vmul.f32 -1.442695, %v2188_v44 }
0x1160   :  { %5454 = vtanh.f32 %v2189_v7  ;;  %v4373_v20 = vmul.f32 -1.442695, %v2189_v7 }
0x1161   :  { %5456 = vpow2.f32 %v4375_v38 }
0x116a   :  { %v5455_v8 = vpop.eup %5454 }
0x116b   :  { %2205 = vrot.lane.b32.xlu1 %v5455_v8, %s5587_s9  ;;  %v5457_v39 = vpop.eup %5456 }
0x116c   :  { %v6322_v41 = vpop.f32.mrb[20].mxu1  ;;  %v2299_v27 = vadd.f32 1.0, %v5457_v39 }
0x116d   :  { %v2585_v6 = vpop.f32.mrb[21].mxu1 }
0x116e   :  { %5458 = vrcp.f32 %v2299_v27 }
0x116f   :  { %5460 = vpow2.f32 %v4372_v62 }
0x1170   :  { %v6324_v35 = vpop.f32.mrb[22].mxu1 }
0x1171   :  { %v6326_v12 = vpop.f32.mrb[23].mxu1 }
0x1174   :  { %v6328_v3 = vpop.f32.mrb[24].mxu1 }
0x1175   :  { %v6330_v47 = vpop.f32.mrb[25].mxu1 }
0x1178   :  { %v5459_v61 = vpop.eup %5458 }
0x1179   :  { %v5461_v18 = vpop.eup %5460  ;;  %v2306_v26 = vmul.f32 %v5459_v61, %v6247_v4  ;;  %v4376_v4 = vmul.f32 -1.442695, %v2292_v36 }
0x117a   :  { %v2196_v16 = vadd.f32 1.0, %v5461_v18 }
0x117c   :  { %5462 = vrcp.f32 %v2196_v16 }
0x1186   :  { %v5463_v19 = vpop.eup %5462 }
0x1187   :  { %v2203_v63 = vmul.f32 %v5463_v19, %v6251_v48 }
0x11bf   :  { %v2309_v10 = vpop.permute.xlu0 %2308 }
0x11c0   :  { %v2311_v15 = vmul.f32 %v5459_v61, %v2309_v10 }
0x11c2   :  { %2313 = vrot.lane.b32.xlu0 %v2311_v15, %s5587_s9 }
0x11dd   :  { %v2206_v25 = vpop.permute.xlu1 %2205 }
0x11de   :  { %v2208_v30 = vmul.f32 %v5463_v19, %v2206_v25 }
0x11e0   :  { %2210 = vrot.lane.b32.xlu1 %v2208_v30, %s5587_s9 }
0x1234   :  { %v2314_v52 = vpop.permute.xlu0 %2313 }
0x1235   :  { %v2316_v56 = vadd.f32 %v2314_v52, %v2306_v26 }
0x1237   :  { %5464 = vtanh.f32 %v2316_v56 }
0x1241   :  { %v5465_v60 = vpop.eup %5464 }
0x1242   :  { %2319 = vrot.lane.b32.xlu0 %v5465_v60, %s5587_s9 }
0x1252   :  { %v2211_v1 = vpop.permute.xlu1 %2210 }
0x1253   :  { %v6338_v9 = vadd.f32 %v2211_v1, %v2203_v63 }
0x1255   :  { %5466 = vtanh.f32 %v6338_v9 }
0x1256   :  { %5468 = vpow2.f32 %v4373_v20 }
0x1257   :  { %5470 = vpow2.f32 %v4376_v4 }
0x125f   :  { %v5467_v11 = vpop.eup %5466 }
0x1260   :  { %2216 = vrot.lane.b32.xlu1 %v5467_v11, %s5587_s9  ;;  %v5469_v21 = vpop.eup %5468 }
0x1261   :  { %v2197_v24 = vadd.f32 1.0, %v5469_v21  ;;  %v5471_v13 = vpop.eup %5470 }
0x1262   :  { %v2300_v48 = vadd.f32 1.0, %v5471_v13 }
0x1263   :  { %5472 = vrcp.f32 %v2197_v24 }
0x1264   :  { %5474 = vrcp.f32 %v2300_v48 }
0x126d   :  { %v5473_v46 = vpop.eup %5472 }
0x126e   :  { %v5475_v36 = vpop.eup %5474 }
0x12d2   :  { %v2217_v5 = vpop.permute.xlu1 %2216 }
0x12d3   :  { %v6342_v57 = vmul.f32 %v5473_v46, %v2217_v5 }
0x12d5   :  { %4377 = vmatmul.mubr.msk.f32.vlgmr.msra.gmra.mrb[18].mxu0 %vm227_vm1, %v6342_v57  ;;  %4583 = vmatprep.mubr.msk.f32.mxu1 %vm227_vm1, %v6342_v57 }
0x12d6   :  { %5113 = vmatpush1.bf16.msra.mxu0 %v5870_v28  ;;  %2464 = vmatprep.mubr.f32.mxu0 %v5586_v2  ;;  %v6362_v28 = vld [vmem:[%s7197_s2 + $0x40] ss:$0 sm:$0xff] }
0x12d7   :  { %5115 = vmatprep.subr.bf16.mxu0 %v5873_v29  ;;  %v5142_v29 = vpack.c.bf16 %v2633_v37, %v2632_v34  ;;  %v2591_v17 = vadd.f32 %v6322_v41, %v6362_v28  ;;  %v2596_v45 = vadd.f32 %v6362_v28, %v6326_v12  ;;  %v2611_v41 = vadd.f32 %v6328_v3, %v6362_v28  ;;  %v6397_v3 = vld [vmem:[%s7197_s2 + $0x68] ss:$0 sm:$0xff] }
0x12d9   :  { %v2625_v7 = vmax.f32 %v2591_v17, 0.0  ;;  %v2626_v8 = vmax.f32 %v2596_v45, 0.0  ;;  %v2629_v12 = vmax.f32 %v2611_v41, 0.0  ;;  %v6426_v45 = vand.u32 127, %v79_v31  ;;  %v2856_v31 = vld [vmem:[%s7197_s2 + $0x70] sm:$0xff] }
0x12da   :  { %5117 = vmatpush1.bf16.msra.mxu0 %v5889_v42  ;;  %v2586_v42 = vadd.f32 %v6362_v28, %v2585_v6  ;;  %v2606_v6 = vadd.f32 %v6362_v28, %v6330_v47 }
0x12db   :  { %5119 = vmatprep.subr.bf16.mxu0 %v5893_v43  ;;  %v2320_v43 = vpop.permute.xlu0 %2319 }
0x12dc   :  { %v2322_v40 = vmul.f32 %v5475_v36, %v2320_v43  ;;  %v2628_v39 = vmax.f32 %v2606_v6, 0.0 }
0x12de   :  { %5121 = vmatpush1.bf16.msra.mxu0 %v5908_v49  ;;  %v5146_v49 = vpack.c.bf16 %v2635_v58, %v2634_v14 }
0x12df   :  { %5123 = vmatprep.subr.bf16.mxu0 %v5911_v50  ;;  %v2624_v50 = vmax.f32 %v2586_v42, 0.0 }
0x12e2   :  { %5125 = vmatpush1.bf16.msra.mxu0 %v5920_v54  ;;  %v2601_v54 = vadd.f32 %v6324_v35, %v6362_v28  ;;  %v5588_v35 = vmov 0.0|0.0  }
0x12e3   :  { %5143 = vmatprep.subr.bf16.mxu0 %v5142_v29  ;;  %5150 = vmatprep.subr.bf16.mxu1 %v5588_v35 }
0x12e4   :  { %v2627_v38 = vmax.f32 %v2601_v54, 0.0 }
0x12e5   :  { %4378 = vmatmul.mubr.msk.f32.vlgmr.msra.gmra.mrb[18].mxu0 %vm227_vm1, %v2322_v40 }
0x12e6   :  { %5145 = vmatpush3.bf16.msra.mxu0 %v5142_v29  ;;  %4594 = vmatprep.mubr.msk.f32.mxu0 %vm2641_vm2, %v2624_v50 }
0x12e7   :  { %5147 = vmatprep.subr.bf16.mxu0 %v5146_v49 }
0x12ea   :  { %5149 = vmatpush3.bf16.msra.mxu0 %v5146_v49 }
0x12eb   :  { %5168 = vmatprep.subr.bf16.mxu0 %v5588_v35 }
0x12ed   :  { %4595 = vmatmul.mubr.msk.f32.vlgmr.msra.gmra.mrb[20].mxu0 %vm2641_vm2, %v2625_v7  ;;  %v2777_v7 = vshra.s32 %v6426_v45, 3 }
0x12ee   :  { %4597 = vmatprep.mubr.msk.f32.mxu0 %vm2641_vm2, %v2626_v8 }
0x12ef   :  { %vm2779_vm4 = vcmp.lt.s32.totalorder %v2777_v7, 6 }
0x12f0   :  { %v2780_v8 = vsel %vm2779_vm4, 0.16666667, %v5586_v2 }
0x12f1   :  { %4598 = vmatmul.mubr.msk.f32.gmra.mrb[22].mxu0 %vm2641_vm2, %v2627_v38 }
0x12f2   :  { %4600 = vmatprep.mubr.msk.f32.mxu0 %vm2641_vm2, %v2628_v39  ;;  %v2781_v39 = vsel %vm2778_vm5, %v2780_v8, 0.125 }
0x12f5   :  { %4601 = vmatmul.mubr.msk.f32.gmra.mrb[24].mxu0 %vm2641_vm2, %v2629_v12  ;;  %v2857_v12 = vld [vmem:[%s7197_s2 + $0x78] sm:$0xff] }
0x13b8   :  { %v2466_v47 = vpop.f32.mrb[18].mxu0 }
0x13b9   :  { %v2468_v27 = vpop.f32.mrb[19].mxu0  ;;  %v2471_v11 = vadd.f32 %v2466_v47, %v5980_v33 }
0x13ba   :  { %v2472_v44 = vadd.f32 %v2468_v27, %v5972_v22 }
0x13bb   :  { %v4379_v20 = vmul.f32 -1.442695, %v2471_v11  ;;  %v4400_v11 = vld [vmem:[%s7197_s2 + $0x90] ss:$0 sm:$0xff] }
0x13bc   :  { %5476 = vtanh.f32 %v2472_v44  ;;  %v4380_v29 = vmul.f32 -1.442695, %v2472_v44  ;;  %v5163_v44 = vpack.c.bf16 %v2857_v12, %v2856_v31  ;;  %v3255_v31 = vld [vmem:[%s7197_s2 + $0x160] sm:$0xff] }
0x13bd   :  { %5478 = vpow2.f32 %v4379_v20 }
0x13c0   :  { %v4596_v62 = vpop.f32.mrb[20].mxu0 }
0x13c1   :  { %v2738_v61 = vadd.f32 %v4596_v62, %v6397_v3  ;;  %v2732_v10 = vpop.f32.mrb[21].mxu0  ;;  %v2859_v62 = vld [vmem:[%s7197_s2 + $0x88] sm:$0xff] }
0x13c2   :  { %v2733_v15 = vadd.f32 %v6397_v3, %v2732_v10  ;;  %v2939_v10 = vld [vmem:[%s7197_s2 + $0x98] sm:$0xff] }
0x13c4   :  { %v5151_v18 = vpack.c.bf16 %v2738_v61, %v2733_v15  ;;  %v4599_v16 = vpop.f32.mrb[22].mxu0  ;;  %v2940_v15 = vld [vmem:[%s7197_s2 + $0xa0] sm:$0xff] }
0x13c5   :  { %v2748_v19 = vadd.f32 %v4599_v16, %v6397_v3  ;;  %v2742_v25 = vpop.f32.mrb[23].mxu0  ;;  %v5169_v16 = vpack.c.bf16 %v2940_v15, %v2939_v10  ;;  %v3394_v10 = vld [vmem:[%s7197_s2 + $0x190] sm:$0xff]  ;;  %v3395_v15 = vld [vmem:[%s7197_s2 + $0x198] sm:$0xff] }
0x13c6   :  { %v5477_v30 = vpop.eup %5476  ;;  %v2743_v22 = vadd.f32 %v6397_v3, %v2742_v25  ;;  %5152 = vmatpush3.bf16.msra.mxu1 %v5151_v18  ;;  %v2941_v18 = vld [vmem:[%s7197_s2 + $0xa8] sm:$0xff] }
0x13c7   :  { %2488 = vrot.lane.b32.xlu1 %v5477_v30, %s5587_s9  ;;  %5153 = vmatprep.subr.bf16.mxu1 %v5588_v35  ;;  %v5479_v21 = vpop.eup %5478 }
0x13c8   :  { %v5154_v26 = vpack.c.bf16 %v2748_v19, %v2743_v22  ;;  %v4602_v52 = vpop.f32.mrb[24].mxu0  ;;  %v2479_v4 = vadd.f32 1.0, %v5479_v21  ;;  %v2942_v19 = vld [vmem:[%s7197_s2 + $0xb0] sm:$0xff]  ;;  %5170 = vmatpush3.bf16.msra.mxu0 %v5169_v16 }
0x13c9   :  { %v2758_v56 = vadd.f32 %v4602_v52, %v6397_v3  ;;  %v2752_v60 = vpop.f32.mrb[25].mxu0  ;;  %v5172_v25 = vpack.c.bf16 %v2942_v19, %v2941_v18  ;;  %5171 = vmatprep.subr.bf16.mxu0 %v5588_v35  ;;  %v3115_v52 = vld [vmem:[%s7197_s2 + $0xc8] sm:$0xff]  ;;  %v3116_v21 = vld [vmem:[%s7197_s2 + $0xd0] sm:$0xff]  ;;  %v5220_v18 = vpack.c.bf16 %v3395_v15, %v3394_v10 }
0x13ca   :  { %v2753_v63 = vadd.f32 %v6397_v3, %v2752_v60  ;;  %5155 = vmatpush3.bf16.msra.mxu1 %v5154_v26  ;;  %5480 = vrcp.f32 %v2479_v4  ;;  %v3114_v26 = vld [vmem:[%s7197_s2 + $0xc0] sm:$0xff]  ;;  %v3030_v60 = vld [vmem:[%s7197_s2 + $0x108] sm:$0xff]  ;;  %v3117_v4 = vld [vmem:[%s7197_s2 + $0xd8] sm:$0xff] }
0x13cb   :  { %5156 = vmatprep.subr.bf16.mxu1 %v5588_v35 }
0x13cc   :  { %v5157_v1 = vpack.c.bf16 %v2758_v56, %v2753_v63  ;;  %5173 = vmatpush3.bf16.msra.mxu0 %v5172_v25  ;;  %v5180_v56 = vpack.c.bf16 %v3115_v52, %v3114_v26  ;;  %v3031_v63 = vld [vmem:[%s7197_s2 + $0x110] sm:$0xff]  ;;  %v4414_v26 = vld [vmem:[%s7197_s2 + $0x100] ss:$0 sm:$0xff] }
0x13ce   :  { %5158 = vmatpush3.bf16.msra.mxu1 %v5157_v1  ;;  %5181 = vmatprep.subr.bf16.mxu0 %v5180_v56  ;;  %v5175_v1 = vpack.c.bf16 %v3031_v63, %v3030_v60 }
0x13cf   :  { %5159 = vmatprep.subr.bf16.mxu1 %v5588_v35 }
0x13d4   :  { %v5481_v24 = vpop.eup %5480 }
0x13d5   :  { %v2486_v5 = vmul.f32 %v5481_v24, %v6338_v9 }
0x1439   :  { %v2489_v13 = vpop.permute.xlu1 %2488 }
0x143a   :  { %v2491_v46 = vmul.f32 %v5481_v24, %v2489_v13 }
0x143c   :  { %2493 = vrot.lane.b32.xlu0 %v2491_v46, %s5587_s9 }
0x14ae   :  { %v2494_v48 = vpop.permute.xlu0 %2493 }
0x14af   :  { %v2496_v34 = vadd.f32 %v2494_v48, %v2486_v5  ;;  %v5184_v5 = vpack.c.bf16 %v3117_v4, %v3116_v21  ;;  %v3119_v48 = vld [vmem:[%s7197_s2 + $0xe8] sm:$0xff] }
0x14b1   :  { %5482 = vtanh.f32 %v2496_v34 }
0x14b2   :  { %5484 = vpow2.f32 %v4380_v29  ;;  %v3121_v29 = vld [vmem:[%s7197_s2 + $0xf8] sm:$0xff] }
0x14bb   :  { %v5483_v37 = vpop.eup %5482 }
0x14bc   :  { %2499 = vrot.lane.b32.xlu1 %v5483_v37, %s5587_s9  ;;  %v5485_v33 = vpop.eup %5484  ;;  %v3120_v37 = vld [vmem:[%s7197_s2 + $0xf0] sm:$0xff] }
0x14bd   :  { %v2480_v42 = vadd.f32 1.0, %v5485_v33  ;;  %v5192_v33 = vpack.c.bf16 %v3121_v29, %v3120_v37 }
0x14bf   :  { %5486 = vrcp.f32 %v2480_v42 }
0x14c9   :  { %v5487_v43 = vpop.eup %5486 }
0x152e   :  { %v2500_v14 = vpop.permute.xlu1 %2499 }
0x152f   :  { %v6413_v58 = vmul.f32 %v5487_v43, %v2500_v14 }
0x1531   :  { %4584 = vmatmul.mubr.msk.f32.gmra.mrb[26].mxu1 %vm227_vm1, %v6413_v58 }
0x1532   :  { %4622 = vmatprep.mubr.msk.f32.mxu1 %vm5589_vm3, %v5586_v2 }
0x1604   :  { %v4585_v36 = vpop.f32.mrb[26].mxu1 }
0x1605   :  { %v2621_v9 = vadd.f32 %v4585_v36, %v6362_v28  ;;  %v2615_v40 = vpop.f32.mrb[27].mxu1 }
0x1606   :  { %v2616_v49 = vadd.f32 %v6362_v28, %v2615_v40  ;;  %v2775_v28 = vand.u32 7, %v6426_v45 }
0x1607   :  { %v2631_v17 = vmax.f32 %v2621_v9, 0.0 }
0x1608   :  { %v2630_v50 = vmax.f32 %v2616_v49, 0.0  ;;  %vm2776_vm6 = vcmp.eq.s32.totalorder %v2775_v28, %v5733_v32  ;;  %v3250_v28 = vld [vmem:[%s7197_s2 + $0x138] sm:$0xff] }
0x1609   :  { %v2782_v27 = vsel %vm2776_vm6, %v2781_v39, 0.0  ;;  %v3254_v39 = vld [vmem:[%s7197_s2 + $0x158] sm:$0xff] }
0x160a   :  { %4603 = vmatprep.mubr.msk.f32.mxu0 %vm2641_vm2, %v2630_v50  ;;  %v5208_v12 = vpack.c.bf16 %v3255_v31, %v3254_v39 }
0x160b   :  { %4604 = vmatmul.mubr.msk.f32.gmra.mrb[26].mxu0 %vm2641_vm2, %v2631_v17 }
0x160c   :  { %4644 = vmatprep.mubr.msk.f32.mxu0 %vm5589_vm3, %v5586_v2 }
0x16de   :  { %v4605_v54 = vpop.f32.mrb[26].mxu0 }
0x16df   :  { %v2768_v6 = vadd.f32 %v4605_v54, %v6397_v3  ;;  %v2762_v38 = vpop.f32.mrb[27].mxu0  ;;  %v3251_v54 = vld [vmem:[%s7197_s2 + $0x140] sm:$0xff] }
0x16e0   :  { %v2763_v41 = vadd.f32 %v6397_v3, %v2762_v38  ;;  %v2858_v3 = vld [vmem:[%s7197_s2 + $0x80] sm:$0xff]  ;;  %v5200_v8 = vpack.c.bf16 %v3251_v54, %v3250_v28  ;;  %v3253_v38 = vld [vmem:[%s7197_s2 + $0x150] sm:$0xff] }
0x16e1   :  { %v5166_v61 = vpack.c.bf16 %v2859_v62, %v2858_v3  ;;  %v3393_v62 = vld [vmem:[%s7197_s2 + $0x188] sm:$0xff] }
0x16e2   :  { %v5160_v47 = vpack.c.bf16 %v2768_v6, %v2763_v41  ;;  %v3252_v6 = vld [vmem:[%s7197_s2 + $0x148] sm:$0xff] }
0x16e3   :  { %v5204_v41 = vpack.c.bf16 %v3253_v38, %v3252_v6 }
0x16e4   :  { %5161 = vmatpush3.bf16.msra.mxu1 %v5160_v47  ;;  %v3390_v47 = vld [vmem:[%s7197_s2 + $0x170] sm:$0xff] }
0x16e5   :  { %5162 = vmatprep.subr.bf16.mxu1 %v5588_v35 }
0x16e7   :  { %4623 = vmatmul.mubr.msk.f32.vlgmr.msra.gmra.mrb[28].mxu1 %vm227_vm1, %v2782_v27  ;;  %v3391_v27 = vld [vmem:[%s7197_s2 + $0x178] sm:$0xff] }
0x16e8   :  { %5164 = vmatpush3.bf16.msra.mxu1 %v5163_v44  ;;  %4633 = vmatprep.mubr.msk.f32.mxu1 %vm5589_vm3, %v5586_v2  ;;  %v3392_v44 = vld [vmem:[%s7197_s2 + $0x180] sm:$0xff]  ;;  %v5212_v3 = vpack.c.bf16 %v3391_v27, %v3390_v47 }
0x16e9   :  { %5165 = vmatprep.subr.bf16.mxu1 %v5588_v35 }
0x16ec   :  { %5167 = vmatpush3.bf16.msra.mxu1 %v5166_v61  ;;  %v5216_v61 = vpack.c.bf16 %v3393_v62, %v3392_v44 }
0x16ed   :  { %5174 = vmatprep.subr.bf16.mxu1 %v5588_v35 }
0x17ba   :  { %v2852_v30 = vpop.f32.mrb[28].mxu1 }
0x17bb   :  { %v4624_v22 = vpop.f32.mrb[29].mxu1  ;;  %4634 = vmatmul.mubr.msk.f32.vlgmr.msra.gmra.mrb[30].mxu1 %vm2641_vm2, %v2852_v30 }
0x17bc   :  { %4655 = vmatprep.mubr.msk.f32.mxu1 %vm5589_vm3, %v5586_v2  ;;  %5176 = vmatpush3.bf16.msra.mxu1 %v5175_v1 }
0x17bd   :  { %5177 = vmatprep.subr.bf16.mxu1 %v5588_v35  ;;  %v3118_v35 = vld [vmem:[%s7197_s2 + $0xe0] sm:$0xff] }
0x17be   :  { %v5188_v34 = vpack.c.bf16 %v3119_v48, %v3118_v35 }
0x188e   :  { %v2934_v20 = vpop.f32.mrb[30].mxu1 }
0x188f   :  { %v2935_v24 = vadd.f32 %v4400_v11, %v2934_v20  ;;  %v4635_v13 = vpop.f32.mrb[31].mxu1 }
0x1891   :  { %v2938_v46 = vmax.f32 %v2935_v24, 0.0 }
0x1893   :  { %4645 = vmatmul.mubr.msk.f32.vlgmr.msra.gmra.mrb[28].mxu0 %vm2641_vm2, %v2938_v46 }
0x1894   :  { %5183 = vmatpush3.bf16.msra.mxu0 %v5180_v56  ;;  %4674 = vmatprep.mubr.msk.f32.mxu0 %vm227_vm1, %v5995_v59  ;;  %v3032_v59 = vld [vmem:[%s7197_s2 + $0x118] sm:$0xff] }
0x1895   :  { %5185 = vmatprep.subr.bf16.mxu0 %v5184_v5 }
0x1898   :  { %5187 = vmatpush3.bf16.msra.mxu0 %v5184_v5 }
0x1899   :  { %5189 = vmatprep.subr.bf16.mxu0 %v5188_v34 }
0x189c   :  { %5191 = vmatpush3.bf16.msra.mxu0 %v5188_v34 }
0x189d   :  { %5193 = vmatprep.subr.bf16.mxu0 %v5192_v33 }
0x18a0   :  { %5195 = vmatpush3.bf16.msra.mxu0 %v5192_v33 }
0x18a1   :  { %5213 = vmatprep.subr.bf16.mxu0 %v5212_v3 }
0x18a3   :  { %4675 = vmatmul.mubr.msk.f32.vlgmr.msra.gmra.mrb[30].mxu0 %vm227_vm1, %v6052_v55  ;;  %v3033_v55 = vld [vmem:[%s7197_s2 + $0x120] sm:$0xff] }
0x18a4   :  { %4677 = vmatprep.mubr.msk.f32.mxu0 %vm227_vm1, %v6097_v53  ;;  %v5178_v53 = vpack.c.bf16 %v3033_v55, %v3032_v59  ;;  %5215 = vmatpush3.bf16.msra.mxu0 %v5212_v3 }
0x18a5   :  { %5217 = vmatprep.subr.bf16.mxu0 %v5216_v61 }
0x18a6   :  { %5179 = vmatpush3.bf16.msra.mxu1 %v5178_v53 }
0x18a7   :  { %4678 = vmatmul.mubr.msk.f32.gmra.mrb[32].mxu0 %vm227_vm1, %v6150_v0  ;;  %v3248_v0 = vld [vmem:[%s7197_s2 + $0x128] sm:$0xff] }
0x18a8   :  { %4680 = vmatprep.mubr.msk.f32.mxu0 %vm227_vm1, %v6203_v23  ;;  %v3249_v23 = vld [vmem:[%s7197_s2 + $0x130] sm:$0xff]  ;;  %5219 = vmatpush3.bf16.msra.mxu0 %v5216_v61 }
0x18a9   :  { %5221 = vmatprep.subr.bf16.mxu0 %v5220_v18 }
0x18ab   :  { %4681 = vmatmul.mubr.msk.f32.gmra.mrb[34].mxu0 %vm227_vm1, %v6262_v51  ;;  %v5196_v51 = vpack.c.bf16 %v3249_v23, %v3248_v0 }
0x18ac   :  { %4683 = vmatprep.mubr.msk.f32.mxu0 %vm227_vm1, %v6342_v57  ;;  %v4402_v57 = vld [vmem:[%s7197_s2 + $0xb8] ss:$0 sm:$0xff]  ;;  %5223 = vmatpush3.bf16.msra.mxu0 %v5220_v18 }
0x18ad   :  { %5197 = vmatprep.subr.bf16.mxu1 %v5196_v51 }
0x18af   :  { %4684 = vmatmul.mubr.msk.f32.gmra.mrb[36].mxu0 %vm227_vm1, %v6413_v58 }
0x1966   :  { %v3017_v42 = vpop.f32.mrb[28].mxu0 }
0x1967   :  { %v6535_v43 = vadd.f32 %v4402_v57, %v3017_v42  ;;  %v4646_v14 = vpop.f32.mrb[29].mxu0  ;;  %v3397_v57 = vld [vmem:[%s7197_s2 + $0x1a8] sm:$0xff] }
0x1968   :  { %v4415_v14 = vld [vmem:[%s7197_s2 + $0x168] ss:$0 sm:$0xff] }
0x1969   :  { %4656 = vmatmul.mubr.msk.f32.vlgmr.msra.gmra.mrb[32].mxu1 %vm2641_vm2, %v6535_v43 }
0x196a   :  { %5199 = vmatpush3.bf16.msra.mxu1 %v5196_v51  ;;  %v3396_v51 = vld [vmem:[%s7197_s2 + $0x1a0] sm:$0xff] }
0x196b   :  { %5201 = vmatprep.subr.bf16.mxu1 %v5200_v8  ;;  %v5224_v42 = vpack.c.bf16 %v3397_v57, %v3396_v51 }
0x196d   :  { %5225 = vmatprep.subr.bf16.mxu0 %v5224_v42 }
0x196e   :  { %5203 = vmatpush3.bf16.msra.mxu1 %v5200_v8  ;;  %5227 = vmatpush3.bf16.msra.mxu0 %v5224_v42 }
0x196f   :  { %5205 = vmatprep.subr.bf16.mxu1 %v5204_v41 }
0x1972   :  { %5207 = vmatpush3.bf16.msra.mxu1 %v5204_v41 }
0x1973   :  { %5209 = vmatprep.subr.bf16.mxu1 %v5208_v12 }
0x1976   :  { %v4676_v58 = vpop.f32.mrb[30].mxu0  ;;  %5211 = vmatpush3.bf16.msra.mxu1 %v5208_v12  ;;  %v4424_v12 = vld [vmem:[%s7197_s2 + $0x1b0] ss:$0 sm:$0xff]  ;;  %s5591_s2 = smov 1  }
0x1977   :  { %v3188_v36 = vpop.f32.mrb[31].mxu0 }
0x197a   :  { %v4679_v9 = vpop.f32.mrb[32].mxu0 }
0x197b   :  { %v3198_v40 = vpop.f32.mrb[33].mxu0 }
0x197e   :  { %v4682_v49 = vpop.f32.mrb[34].mxu0 }
0x197f   :  { %v3208_v50 = vpop.f32.mrb[35].mxu0 }
0x1982   :  { %v4685_v17 = vpop.f32.mrb[36].mxu0 }
0x1983   :  { %v3218_v7 = vpop.f32.mrb[37].mxu0 }
0x1a3c   :  { %v3103_v16 = vpop.f32.mrb[32].mxu1 }
0x1a3d   :  { %v3108_v19 = vrot.slane %v3103_v16, 6  ;;  %v4657_v25 = vpop.f32.mrb[33].mxu1 }
0x1a3f   :  { %v3111_v30 = vsel %vm3110_vm7, 0.0, %v3108_v19 }
0x1a40   :  { %v3113_v22 = vsel %vm3112_vm8, %v3111_v30, 0.0 }
0x1a41   :  { %v3189_v52 = vadd.f32 %v3188_v36, %v3113_v22  ;;  %v3194_v56 = vadd.f32 %v4676_v58, %v3113_v22  ;;  %v3199_v60 = vadd.f32 %v3198_v40, %v3113_v22  ;;  %v3204_v63 = vadd.f32 %v4679_v9, %v3113_v22 }
0x1a42   :  { %v3209_v1 = vadd.f32 %v3208_v50, %v3113_v22  ;;  %v3214_v11 = vadd.f32 %v4682_v49, %v3113_v22  ;;  %v3219_v20 = vadd.f32 %v3218_v7, %v3113_v22  ;;  %v3224_v21 = vadd.f32 %v4685_v17, %v3113_v22 }
0x1a43   :  { %v3232_v4 = vadd.f32 %v4414_v26, %v3189_v52  ;;  %v3233_v24 = vadd.f32 %v4414_v26, %v3194_v56  ;;  %v3234_v13 = vadd.f32 %v4414_v26, %v3199_v60  ;;  %v3235_v35 = vadd.f32 %v4414_v26, %v3204_v63 }
0x1a44   :  { %v3236_v34 = vadd.f32 %v4414_v26, %v3209_v1  ;;  %v3237_v29 = vadd.f32 %v4414_v26, %v3214_v11  ;;  %v3238_v59 = vadd.f32 %v4414_v26, %v3219_v20  ;;  %v3239_v53 = vadd.f32 %v4414_v26, %v3224_v21 }
0x1a45   :  { %v3240_v46 = vmax.f32 %v3232_v4, 0.0  ;;  %v3241_v5 = vmax.f32 %v3233_v24, 0.0  ;;  %v3242_v48 = vmax.f32 %v3234_v13, 0.0  ;;  %v3243_v37 = vmax.f32 %v3235_v35, 0.0 }
0x1a46   :  { %v3244_v33 = vmax.f32 %v3236_v34, 0.0  ;;  %v3245_v55 = vmax.f32 %v3237_v29, 0.0  ;;  %v3246_v0 = vmax.f32 %v3238_v59, 0.0  ;;  %v3247_v23 = vmax.f32 %v3239_v53, 0.0 }
0x1a47   :  { %4702 = vmatprep.mubr.msk.f32.mxu1 %vm227_vm1, %v3240_v46 }
0x1a48   :  { %4703 = vmatmul.mubr.msk.f32.vlgmr.msra.gmra.mrb[34].mxu1 %vm227_vm1, %v3241_v5 }
0x1a49   :  { %4705 = vmatprep.mubr.msk.f32.mxu1 %vm227_vm1, %v3242_v48 }
0x1a4c   :  { %4706 = vmatmul.mubr.msk.f32.gmra.mrb[36].mxu1 %vm227_vm1, %v3243_v37 }
0x1a4d   :  { %4708 = vmatprep.mubr.msk.f32.mxu1 %vm227_vm1, %v3244_v33 }
0x1a50   :  { %4709 = vmatmul.mubr.msk.f32.gmra.mrb[38].mxu1 %vm227_vm1, %v3245_v55 }
0x1a51   :  { %4711 = vmatprep.mubr.msk.f32.mxu1 %vm227_vm1, %v3246_v0 }
0x1a54   :  { %4712 = vmatmul.mubr.msk.f32.gmra.mrb[40].mxu1 %vm227_vm1, %v3247_v23 }
0x1b1b   :  { %v4704_v58 = vpop.f32.mrb[34].mxu1 }
0x1b1c   :  { %v3351_v36 = vpop.f32.mrb[35].mxu1  ;;  %v3357_v40 = vadd.f32 %v4704_v58, %v4415_v14 }
0x1b1d   :  { %v3352_v9 = vadd.f32 %v4415_v14, %v3351_v36 }
0x1b1f   :  { %v4707_v49 = vpop.f32.mrb[36].mxu1  ;;  %4730 = vmatprep.mubr.msk.f32.mxu0 %vm227_vm1, %v3352_v9 }
0x1b20   :  { %v3361_v50 = vpop.f32.mrb[37].mxu1  ;;  %4731 = vmatmul.mubr.msk.f32.vlgmr.msra.gmra.mrb[38].mxu0 %vm227_vm1, %v3357_v40  ;;  %v3367_v7 = vadd.f32 %v4707_v49, %v4415_v14 }
0x1b21   :  { %v3362_v17 = vadd.f32 %v4415_v14, %v3361_v50 }
0x1b23   :  { %v4710_v28 = vpop.f32.mrb[38].mxu1  ;;  %4733 = vmatprep.mubr.msk.f32.mxu0 %vm227_vm1, %v3362_v17 }
0x1b24   :  { %v3371_v54 = vpop.f32.mrb[39].mxu1  ;;  %4734 = vmatmul.mubr.msk.f32.gmra.mrb[40].mxu0 %vm227_vm1, %v3367_v7  ;;  %v3377_v6 = vadd.f32 %v4710_v28, %v4415_v14 }
0x1b25   :  { %v3372_v8 = vadd.f32 %v4415_v14, %v3371_v54 }
0x1b27   :  { %v4713_v38 = vpop.f32.mrb[40].mxu1  ;;  %4736 = vmatprep.mubr.msk.f32.mxu0 %vm227_vm1, %v3372_v8 }
0x1b28   :  { %v3381_v41 = vpop.f32.mrb[41].mxu1  ;;  %4737 = vmatmul.mubr.msk.f32.gmra.mrb[42].mxu0 %vm227_vm1, %v3377_v6  ;;  %v3387_v31 = vadd.f32 %v4713_v38, %v4415_v14 }
0x1b29   :  { %v3382_v39 = vadd.f32 %v4415_v14, %v3381_v41 }
0x1b2b   :  { %4739 = vmatprep.mubr.msk.f32.mxu0 %vm227_vm1, %v3382_v39 }
0x1b2c   :  { %4740 = vmatmul.mubr.msk.f32.gmra.mrb[44].mxu0 %vm227_vm1, %v3387_v31 }
0x1bf3   :  { %v4732_v47 = vpop.f32.mrb[38].mxu0 }
0x1bf4   :  { %v6606_v27 = vadd.f32 %v4732_v47, %v4424_v12  ;;  %v3493_v44 = vpop.f32.mrb[39].mxu0 }
0x1bf5   :  { %v6608_v3 = vadd.f32 %v4424_v12, %v3493_v44 }
0x1bf6   :  { %v3557_v62 = vand.u32 2147483647, %v6606_v27  ;;  %3752 = vrot.lane.b32.xlu1 %v6606_v27, %s5590_s10  ;;  %v3533_v9 = vmax.f32 %v6606_v27, 0.0  ;;  %vm3541_vm9 = vcmp.ne.f32.partialorder %v6606_v27, %v6606_v27 }
0x1bf7   :  { %v3556_v61 = vand.u32 2147483647, %v6608_v3  ;;  %v4735_v10 = vpop.f32.mrb[40].mxu0  ;;  %3750 = vrot.lane.b32.xlu0 %v6608_v3, %s5590_s10  ;;  %v3532_v50 = vmax.f32 %v6608_v3, 0.0  ;;  %vm3540_vm11 = vcmp.ne.f32.partialorder %v6608_v3, %v6608_v3 }
0x1bf8   :  { %v3565_v15 = vsub.f32 0.0, %v3557_v62  ;;  %v6616_v18 = vadd.f32 %v4735_v10, %v4424_v12  ;;  %v3503_v16 = vpop.f32.mrb[41].mxu0 }
0x1bf9   :  { %v3564_v19 = vsub.f32 0.0, %v3556_v61  ;;  %v6618_v25 = vadd.f32 %v4424_v12, %v3503_v16 }
0x1bfa   :  { %v3574_v30 = vmul.f32 1.442695, %v3565_v15  ;;  %v3559_v22 = vand.u32 2147483647, %v6616_v18  ;;  %3756 = vrot.lane.b32.xlu1 %v6616_v18, %s5590_s10  ;;  %v3535_v17 = vmax.f32 %v6616_v18, 0.0  ;;  %vm3543_vm13 = vcmp.ne.f32.partialorder %v6616_v18, %v6616_v18 }
0x1bfb   :  { %v3572_v26 = vmul.f32 1.442695, %v3564_v19  ;;  %v3558_v52 = vand.u32 2147483647, %v6618_v25  ;;  %v4738_v56 = vpop.f32.mrb[42].mxu0  ;;  %v3534_v8 = vmax.f32 %v6618_v25, 0.0  ;;  %vm3542_vm15 = vcmp.ne.f32.partialorder %v6618_v25, %v6618_v25 }
0x1bfc   :  { %5488 = vpow2.f32 %v3574_v30  ;;  %v3567_v60 = vsub.f32 0.0, %v3559_v22  ;;  %v6624_v63 = vadd.f32 %v4738_v56, %v4424_v12  ;;  %v3513_v1 = vpop.f32.mrb[43].mxu0 }
0x1bfd   :  { %5490 = vpow2.f32 %v3572_v26  ;;  %v3566_v11 = vsub.f32 0.0, %v3558_v52  ;;  %v6626_v20 = vadd.f32 %v4424_v12, %v3513_v1 }
0x1bfe   :  { %v3578_v21 = vmul.f32 1.442695, %v3567_v60  ;;  %v3561_v4 = vand.u32 2147483647, %v6624_v63  ;;  %3754 = vrot.lane.b32.xlu1 %v6618_v25, %s5590_s10  ;;  %v3537_v41 = vmax.f32 %v6624_v63, 0.0  ;;  %vm3545_vm3 = vcmp.ne.f32.partialorder %v6624_v63, %v6624_v63 }
0x1bff   :  { %v3576_v24 = vmul.f32 1.442695, %v3566_v11  ;;  %v3560_v13 = vand.u32 2147483647, %v6626_v20  ;;  %v4741_v46 = vpop.f32.mrb[44].mxu0  ;;  %3758 = vrot.lane.b32.xlu0 %v6626_v20, %s5590_s10  ;;  %v3536_v39 = vmax.f32 %v6626_v20, 0.0  ;;  %vm3544_vm4 = vcmp.ne.f32.partialorder %v6626_v20, %v6626_v20 }
0x1c00   :  { %5492 = vpow2.f32 %v3578_v21  ;;  %v3569_v5 = vsub.f32 0.0, %v3561_v4  ;;  %v6634_v35 = vadd.f32 %v4741_v46, %v4424_v12  ;;  %v3523_v48 = vpop.f32.mrb[45].mxu0 }
0x1c01   :  { %5494 = vpow2.f32 %v3576_v24  ;;  %v3568_v34 = vsub.f32 0.0, %v3560_v13  ;;  %v6636_v37 = vadd.f32 %v4424_v12, %v3523_v48 }
0x1c02   :  { %v3582_v29 = vmul.f32 1.442695, %v3569_v5  ;;  %v3563_v33 = vand.u32 2147483647, %v6634_v35  ;;  %v3539_v15 = vmax.f32 %v6634_v35, 0.0  ;;  %vm3547_vm7 = vcmp.ne.f32.partialorder %v6634_v35, %v6634_v35 }
0x1c03   :  { %v3580_v59 = vmul.f32 1.442695, %v3568_v34  ;;  %v3562_v55 = vand.u32 2147483647, %v6636_v37  ;;  %v3538_v16 = vmax.f32 %v6636_v37, 0.0  ;;  %vm3546_vm8 = vcmp.ne.f32.partialorder %v6636_v37, %v6636_v37 }
0x1c04   :  { %5496 = vpow2.f32 %v3582_v29  ;;  %v3571_v53 = vsub.f32 0.0, %v3563_v33 }
0x1c05   :  { %5498 = vpow2.f32 %v3580_v59  ;;  %v3570_v0 = vsub.f32 0.0, %v3562_v55 }
0x1c06   :  { %v5489_v23 = vpop.eup %5488  ;;  %v3586_v51 = vmul.f32 1.442695, %v3571_v53 }
0x1c07   :  { %v5491_v57 = vpop.eup %5490  ;;  %v3584_v42 = vmul.f32 1.442695, %v3570_v0  ;;  %v3597_v14 = vadd.f32 1.0, %v5489_v23  ;;  %v3600_v40 = vmul.f32 -0.5, %v5489_v23  ;;  %v3603_v38 = vand.u32 2147483647, %v5489_v23 }
0x1c08   :  { %5500 = vpow2.f32 %v3586_v51  ;;  %v3588_v58 = vadd.f32 1.0, %v5491_v57  ;;  %v3591_v28 = vmul.f32 -0.5, %v5491_v57  ;;  %v3594_v47 = vand.u32 2147483647, %v5491_v57 }
0x1c09   :  { %5502 = vpow2.f32 %v3584_v42  ;;  %v3601_v12 = vadd.f32 1.0, %v3600_v40  ;;  %vm6650_vm10 = vcmp.lt.f32.partialorder %v3603_v38, 0.0004427343 }
0x1c0a   :  { %v5493_v36 = vpop.eup %5492  ;;  %5504 = vlog2.f32 %v3597_v14  ;;  %v3592_v19 = vadd.f32 1.0, %v3591_v28  ;;  %vm6658_vm12 = vcmp.lt.f32.partialorder %v3594_v47, 0.0004427343 }
0x1c0b   :  { %v5495_v49 = vpop.eup %5494  ;;  %5506 = vlog2.f32 %v3588_v58  ;;  %v3615_v7 = vadd.f32 1.0, %v5493_v36  ;;  %v3618_v54 = vmul.f32 -0.5, %v5493_v36  ;;  %v3621_v22 = vand.u32 2147483647, %v5493_v36 }
0x1c0c   :  { %v3606_v6 = vadd.f32 1.0, %v5495_v49  ;;  %v3609_v44 = vmul.f32 -0.5, %v5495_v49  ;;  %v3612_v56 = vand.u32 2147483647, %v5495_v49  ;;  %v3602_v11 = vmul.f32 %v5489_v23, %v3601_v12 }
0x1c0d   :  { %5508 = vlog2.f32 %v3615_v7  ;;  %v3619_v30 = vadd.f32 1.0, %v3618_v54  ;;  %v3593_v29 = vmul.f32 %v5491_v57, %v3592_v19  ;;  %vm6667_vm14 = vcmp.lt.f32.partialorder %v3621_v22, 0.0004427343 }
0x1c0e   :  { %v5497_v31 = vpop.eup %5496  ;;  %5510 = vlog2.f32 %v3606_v6  ;;  %v3610_v4 = vadd.f32 1.0, %v3609_v44  ;;  %vm6674_vm0 = vcmp.lt.f32.partialorder %v3612_v56, 0.0004427343 }
0x1c0f   :  { %v5499_v62 = vpop.eup %5498  ;;  %v3633_v61 = vadd.f32 1.0, %v5497_v31  ;;  %v3636_v10 = vmul.f32 -0.5, %v5497_v31  ;;  %v3639_v46 = vand.u32 2147483647, %v5497_v31  ;;  %v3620_v33 = vmul.f32 %v5493_v36, %v3619_v30 }
0x1c10   :  { %v3624_v26 = vadd.f32 1.0, %v5499_v62  ;;  %v3627_v60 = vmul.f32 -0.5, %v5499_v62  ;;  %v3630_v5 = vand.u32 2147483647, %v5499_v62  ;;  %v3611_v42 = vmul.f32 %v5495_v49, %v3610_v4 }
0x1c11   :  { %5512 = vlog2.f32 %v3633_v61  ;;  %v3637_v13 = vadd.f32 1.0, %v3636_v10  ;;  %vm6681_vm1 = vcmp.lt.f32.partialorder %v3639_v46, 0.0004427343 }
0x1c12   :  { %v6654_v1 = vpop.eup %5500  ;;  %5514 = vlog2.f32 %v3624_v26  ;;  %v3628_v51 = vadd.f32 1.0, %v3627_v60  ;;  %vm6685_vm2 = vcmp.lt.f32.partialorder %v3630_v5, 0.0004427343 }
0x1c13   :  { %v6662_v24 = vpop.eup %5502  ;;  %v3651_v48 = vadd.f32 1.0, %v6654_v1  ;;  %v3654_v14 = vmul.f32 -0.5, %v6654_v1  ;;  %v3638_v40 = vmul.f32 %v5497_v31, %v3637_v13  ;;  %v3657_v31 = vand.u32 2147483647, %v6654_v1 }
0x1c14   :  { %v5505_v34 = vpop.eup %5504  ;;  %v3642_v55 = vadd.f32 1.0, %v6662_v24  ;;  %v3629_v44 = vmul.f32 %v5499_v62, %v3628_v51  ;;  %v3645_v61 = vmul.f32 -0.5, %v6662_v24  ;;  %v3648_v30 = vand.u32 2147483647, %v6662_v24 }
0x1c15   :  { %v5507_v53 = vpop.eup %5506  ;;  %v3599_v0 = vmul.f32 0.6931472, %v5505_v34  ;;  %5516 = vlog2.f32 %v3651_v48  ;;  %v3655_v19 = vadd.f32 1.0, %v3654_v14  ;;  %vm6718_vm5 = vcmp.lt.f32.partialorder %v3657_v31, 0.0004427343 }
0x1c16   :  { %v3590_v57 = vmul.f32 0.6931472, %v5507_v53  ;;  %5518 = vlog2.f32 %v3642_v55  ;;  %v3646_v5 = vadd.f32 1.0, %v3645_v61  ;;  %vm3649_vm6 = vcmp.lt.f32.partialorder %v3648_v30, 0.0004427343 }
0x1c17   :  { %v5509_v58 = vpop.eup %5508  ;;  %v3605_v36 = vsel %vm6650_vm10, %v3602_v11, %v3599_v0  ;;  %v3656_v0 = vmul.f32 %v6654_v1, %v3655_v19 }
0x1c18   :  { %v5511_v54 = vpop.eup %5510  ;;  %v3661_v49 = vadd.f32 %v3605_v36, %v3533_v9  ;;  %v3596_v6 = vsel %vm6658_vm12, %v3593_v29, %v3590_v57  ;;  %v3617_v38 = vmul.f32 0.6931472, %v5509_v58  ;;  %v3647_v58 = vmul.f32 %v6662_v24, %v3646_v5 }
0x1c19   :  { %v3660_v12 = vadd.f32 %v3596_v6, %v3532_v50  ;;  %v3608_v47 = vmul.f32 0.6931472, %v5511_v54 }
0x1c1a   :  { %v3669_v9 = vsel %vm3541_vm9, %v6606_v27, %v3661_v49  ;;  %v3623_v10 = vsel %vm6667_vm14, %v3620_v33, %v3617_v38  ;;  %vm3934_vm9 = vcmask 15360  }
0x1c1b   :  { %v5513_v22 = vpop.eup %5512  ;;  %v3677_v50 = vmul.f32 0.99, %v3669_v9  ;;  %v3668_v62 = vsel %vm3540_vm11, %v6608_v3, %v3660_v12  ;;  %v3663_v26 = vadd.f32 %v3623_v10, %v3535_v17  ;;  %v3614_v52 = vsel %vm6674_vm0, %v3611_v42, %v3608_v47 }
0x1c1c   :  { %v5515_v56 = vpop.eup %5514  ;;  %v3676_v60 = vmul.f32 0.99, %v3668_v62  ;;  %v3662_v11 = vadd.f32 %v3614_v52, %v3534_v8  ;;  %v3635_v21 = vmul.f32 0.6931472, %v5513_v22 }
0x1c1d   :  { %v6722_v13 = vadd.f32 0.01, %v3677_v50  ;;  %v3671_v17 = vsel %vm3543_vm13, %v6616_v18, %v3663_v26  ;;  %v3626_v46 = vmul.f32 0.6931472, %v5515_v56 }
0x1c1e   :  { %v6728_v48 = vadd.f32 0.01, %v3676_v60  ;;  %v3679_v34 = vmul.f32 0.99, %v3671_v17  ;;  %v3670_v8 = vsel %vm3542_vm15, %v6618_v25, %v3662_v11  ;;  %v3641_v29 = vsel %vm6681_vm1, %v3638_v40, %v3635_v21 }
0x1c1f   :  { %v5517_v33 = vpop.eup %5516  ;;  %3784 = vrot.lane.b32.xlu1 %v6722_v13, %s5591_s2  ;;  %v3678_v59 = vmul.f32 0.99, %v3670_v8  ;;  %v3665_v55 = vadd.f32 %v3641_v29, %v3537_v41  ;;  %v3632_v53 = vsel %vm6685_vm2, %v3629_v44, %v3626_v46  ;;  %5520 = vlog2.f32 %v6722_v13 }
0x1c20   :  { %v5519_v23 = vpop.eup %5518  ;;  %3782 = vrot.lane.b32.xlu0 %v6728_v48, %s5591_s2  ;;  %v6745_v51 = vadd.f32 0.01, %v3679_v34  ;;  %v3664_v57 = vadd.f32 %v3632_v53, %v3536_v39  ;;  %v3653_v42 = vmul.f32 0.6931472, %v5517_v33 }
0x1c21   :  { %v6750_v14 = vadd.f32 0.01, %v3678_v59  ;;  %v3673_v41 = vsel %vm3545_vm3, %v6624_v63, %v3665_v55  ;;  %v3644_v1 = vmul.f32 0.6931472, %v5519_v23  ;;  %v6817_v23 = vld [vmem:[%s7196_s0 + $0x8] sm:$0xff] }
0x1c22   :  { %v3681_v36 = vmul.f32 0.99, %v3673_v41  ;;  %v3672_v40 = vsel %vm3544_vm4, %v6626_v20, %v3664_v57  ;;  %v3659_v39 = vsel %vm6718_vm5, %v3656_v0, %v3653_v42 }
0x1c23   :  { %3788 = vrot.lane.b32.xlu1 %v6745_v51, %s5591_s2  ;;  %v3680_v7 = vmul.f32 0.99, %v3672_v40  ;;  %v3667_v28 = vadd.f32 %v3659_v39, %v3539_v15  ;;  %v3650_v54 = vsel %vm3649_vm6, %v3647_v58, %v3644_v1  ;;  %5522 = vlog2.f32 %v6750_v14  ;;  %v6823_v40 = vld [vmem:[%s7196_s0] sm:$0xff] }
0x1c24   :  { %3786 = vrot.lane.b32.xlu0 %v6750_v14, %s5591_s2  ;;  %v6769_v24 = vadd.f32 0.01, %v3681_v36  ;;  %v3666_v49 = vadd.f32 %v3650_v54, %v3538_v16  ;;  %5524 = vlog2.f32 %v6745_v51 }
0x1c25   :  { %v6776_v6 = vadd.f32 0.01, %v3680_v7  ;;  %v3675_v38 = vsel %vm3547_vm7, %v6634_v35, %v3667_v28  ;;  %5526 = vlog2.f32 %v6728_v48  ;;  %v6829_v7 = vld [vmem:[%s7196_s0 + $0x18] sm:$0xff] }
0x1c26   :  { %v3683_v31 = vmul.f32 0.99, %v3675_v38  ;;  %v3674_v15 = vsel %vm3546_vm8, %v6636_v37, %v3666_v49  ;;  %5528 = vlog2.f32 %v6769_v24  ;;  %v6835_v38 = vld [vmem:[%s7196_s0 + $0x10] sm:$0xff] }
0x1c27   :  { %3792 = vrot.lane.b32.xlu1 %v6769_v24, %s5591_s2  ;;  %v3682_v47 = vmul.f32 0.99, %v3674_v15 }
0x1c28   :  { %3790 = vrot.lane.b32.xlu0 %v6776_v6, %s5591_s2  ;;  %v6786_v12 = vadd.f32 0.01, %v3683_v31 }
0x1c29   :  { %v5521_v16 = vpop.eup %5520  ;;  %v6795_v9 = vadd.f32 0.01, %v3682_v47 }
0x1c2a   :  { %v3841_v44 = vmul.f32 0.6931472, %v5521_v16  ;;  %5530 = vlog2.f32 %v6786_v12 }
0x1c2b   :  { %3760 = vrot.lane.b32.xlu1 %v6624_v63, %s5590_s10  ;;  %5532 = vlog2.f32 %v6776_v6 }
0x1c2c   :  { %3796 = vrot.lane.b32.xlu0 %v6786_v12, %s5591_s2  ;;  %5534 = vlog2.f32 %v6795_v9 }
0x1c2d   :  { %v5523_v61 = vpop.eup %5522 }
0x1c2e   :  { %v3843_v10 = vmul.f32 0.6931472, %v5523_v61  ;;  %v5525_v19 = vpop.eup %5524 }
0x1c2f   :  { %3864 = vrot.lane.b32.xlu1 %v3841_v44, %s5591_s2  ;;  %v5527_v30 = vpop.eup %5526  ;;  %v3845_v22 = vmul.f32 0.6931472, %v5525_v19 }
0x1c30   :  { %3794 = vrot.lane.b32.xlu0 %v6795_v9, %s5591_s2  ;;  %v5529_v50 = vpop.eup %5528  ;;  %v3839_v62 = vmul.f32 0.6931472, %v5527_v30  ;;  %v6841_v30 = vld [vmem:[%s7196_s0 + $0x28] sm:$0xff] }
0x1c31   :  { %v3849_v26 = vmul.f32 0.6931472, %v5529_v50 }
0x1c33   :  { %3866 = vrot.lane.b32.xlu1 %v3843_v10, %s5591_s2 }
0x1c34   :  { %3762 = vrot.lane.b32.xlu0 %v6636_v37, %s5590_s10  ;;  %v5531_v52 = vpop.eup %5530 }
0x1c35   :  { %v5533_v56 = vpop.eup %5532  ;;  %v3853_v60 = vmul.f32 0.6931472, %v5531_v52 }
0x1c36   :  { %v3847_v11 = vmul.f32 0.6931472, %v5533_v56  ;;  %v5535_v21 = vpop.eup %5534 }
0x1c37   :  { %3868 = vrot.lane.b32.xlu1 %v3845_v22, %s5591_s2  ;;  %v3851_v4 = vmul.f32 0.6931472, %v5535_v21 }
0x1c38   :  { %3862 = vrot.lane.b32.xlu0 %v3839_v62, %s5591_s2 }
0x1c3b   :  { %3872 = vrot.lane.b32.xlu1 %v3849_v26, %s5591_s2 }
0x1c3c   :  { %3764 = vrot.lane.b32.xlu0 %v6634_v35, %s5590_s10 }
0x1c3f   :  { %3876 = vrot.lane.b32.xlu1 %v3853_v60, %s5591_s2 }
0x1c40   :  { %3870 = vrot.lane.b32.xlu0 %v3847_v11, %s5591_s2 }
0x1c44   :  { %3874 = vrot.lane.b32.xlu0 %v3851_v4, %s5591_s2 }
0x1c68   :  { %v3753_v17 = vpop.permute.xlu1 %3752 }
0x1c69   :  { %v3751_v5 = vpop.permute.xlu0 %3750  ;;  %v3775_v57 = vsub.f32 %v6817_v23, %v3753_v17 }
0x1c6a   :  { %v3774_v39 = vsub.f32 %v6823_v40, %v3751_v5 }
0x1c6c   :  { %v3757_v46 = vpop.permute.xlu1 %3756 }
0x1c6d   :  { %v3777_v28 = vsub.f32 %v6829_v7, %v3757_v46  ;;  %v5583_v46 = vld [vmem:[%s7196_s0 + $0x20] sm:$0xff] }
0x1c70   :  { %v3755_v34 = vpop.permute.xlu1 %3754 }
0x1c71   :  { %v3759_v8 = vpop.permute.xlu0 %3758  ;;  %v3776_v31 = vsub.f32 %v6835_v38, %v3755_v34 }
0x1c72   :  { %v3778_v5 = vsub.f32 %v5583_v46, %v3759_v8  ;;  %v5584_v8 = vld [vmem:[%s7196_s0 + $0x30] sm:$0xff] }
0x1c91   :  { %v3785_v29 = vpop.permute.xlu1 %3784 }
0x1c92   :  { %5536 = vrcp.f32 %v3785_v29  ;;  %v3783_v33 = vpop.permute.xlu0 %3782 }
0x1c93   :  { %5538 = vrcp.f32 %v3783_v33 }
0x1c95   :  { %v3789_v59 = vpop.permute.xlu1 %3788 }
0x1c96   :  { %5540 = vrcp.f32 %v3789_v59  ;;  %v3787_v55 = vpop.permute.xlu0 %3786 }
0x1c97   :  { %5542 = vrcp.f32 %v3787_v55 }
0x1c99   :  { %v3793_v53 = vpop.permute.xlu1 %3792 }
0x1c9a   :  { %5544 = vrcp.f32 %v3793_v53  ;;  %v3791_v0 = vpop.permute.xlu0 %3790 }
0x1c9b   :  { %5546 = vrcp.f32 %v3791_v0 }
0x1c9c   :  { %v5537_v42 = vpop.eup %5536 }
0x1c9d   :  { %v3761_v41 = vpop.permute.xlu1 %3760  ;;  %v3809_v1 = vmul.f32 %v5537_v42, %v3775_v57  ;;  %v5539_v58 = vpop.eup %5538 }
0x1c9e   :  { %v3797_v36 = vpop.permute.xlu0 %3796  ;;  %v3807_v61 = vmul.f32 %v5539_v58, %v3774_v39  ;;  %v3779_v22 = vsub.f32 %v6841_v30, %v3761_v41 }
0x1c9f   :  { %v3823_v54 = vmul.f32 %v3809_v1, %v3809_v1 }
0x1ca0   :  { %v5541_v49 = vpop.eup %5540  ;;  %v3822_v21 = vmul.f32 %v3807_v61, %v3807_v61 }
0x1ca1   :  { %v5543_v15 = vpop.eup %5542  ;;  %v3831_v16 = vmul.f32 -0.5, %v3823_v54  ;;  %v3865_v47 = vpop.permute.xlu1 %3864  ;;  %v3813_v44 = vmul.f32 %v5541_v49, %v3777_v28 }
0x1ca2   :  { %v3795_v10 = vpop.permute.xlu0 %3794  ;;  %v3811_v19 = vmul.f32 %v5543_v15, %v3776_v31  ;;  %v3830_v55 = vmul.f32 -0.5, %v3822_v21 }
0x1ca3   :  { %v3887_v50 = vsub.f32 %v3831_v16, %v3865_v47  ;;  %5548 = vrcp.f32 %v3795_v10  ;;  %v3825_v26 = vmul.f32 %v3813_v44, %v3813_v44  ;;  %v6855_v47 = vld [vmem:[%s7196_s0 + $0x38] sm:$0xff]  ;;  %s5593_s0 = smov 32  }
0x1ca4   :  { %v5545_v62 = vpop.eup %5544  ;;  %v3824_v11 = vmul.f32 %v3811_v19, %v3811_v19  ;;  %5550 = vrcp.f32 %v3797_v36 }
0x1ca5   :  { %v3817_v52 = vmul.f32 %v5545_v62, %v3779_v22  ;;  %v4434_v56 = vadd.f32 -0.9189385, %v3887_v50  ;;  %v3867_v60 = vpop.permute.xlu1 %3866  ;;  %v5547_v4 = vpop.eup %5546  ;;  %v3833_v34 = vmul.f32 -0.5, %v3825_v26  ;;  %v4254_v62 = vrot.slane %v6535_v43, 6 }
0x1ca6   :  { %v3763_v17 = vpop.permute.xlu0 %3762  ;;  %v3832_v33 = vmul.f32 -0.5, %v3824_v11  ;;  %v3815_v53 = vmul.f32 %v5547_v4, %v3778_v5 }
0x1ca7   :  { %3912 = vrot.lane.b32.xlu1 %v4434_v56, %s5592_s23  ;;  %v3827_v29 = vmul.f32 %v3817_v52, %v3817_v52  ;;  %v3780_v39 = vsub.f32 %v5584_v8, %v3763_v17  ;;  %v4256_v4 = vsub.f32 %v6535_v43, %v4254_v62 }
0x1ca8   :  { %v3888_v36 = vsub.f32 %v3832_v33, %v3867_v60  ;;  %v3826_v49 = vmul.f32 %v3815_v53, %v3815_v53 }
0x1ca9   :  { %v3869_v59 = vpop.permute.xlu1 %3868  ;;  %v3835_v1 = vmul.f32 -0.5, %v3827_v29 }
0x1caa   :  { %v3889_v0 = vsub.f32 %v3833_v34, %v3869_v59  ;;  %v3863_v57 = vpop.permute.xlu0 %3862  ;;  %v4435_v19 = vadd.f32 -0.9189385, %v3888_v36  ;;  %v3834_v50 = vmul.f32 -0.5, %v3826_v49 }
0x1cab   :  { %v3886_v42 = vsub.f32 %v3830_v55, %v3863_v57  ;;  %v4257_v55 = vmul.f32 %v4256_v4, %v4256_v4 }
0x1cac   :  { %v4436_v41 = vadd.f32 -0.9189385, %v3889_v0 }
0x1cad   :  { %v5549_v58 = vpop.eup %5548  ;;  %v4433_v28 = vadd.f32 -0.9189385, %v3886_v42  ;;  %v3873_v54 = vpop.permute.xlu1 %3872 }
0x1cae   :  { %v3891_v31 = vsub.f32 %v3835_v1, %v3873_v54  ;;  %3916 = vrot.lane.b32.xlu1 %v4436_v41, %s5592_s23  ;;  %v3765_v15 = vpop.permute.xlu0 %3764  ;;  %v3819_v16 = vmul.f32 %v5549_v58, %v3780_v39  ;;  %v5551_v61 = vpop.eup %5550 }
0x1caf   :  { %v3781_v44 = vsub.f32 %v6855_v47, %v3765_v15  ;;  %3910 = vrot.lane.b32.xlu0 %v4433_v28, %s5592_s23 }
0x1cb0   :  { %v4438_v10 = vadd.f32 -0.9189385, %v3891_v31  ;;  %v3828_v60 = vmul.f32 %v3819_v16, %v3819_v16 }
0x1cb1   :  { %v3821_v22 = vmul.f32 %v5551_v61, %v3781_v44  ;;  %v3877_v17 = vpop.permute.xlu1 %3876 }
0x1cb2   :  { %3920 = vrot.lane.b32.xlu1 %v4438_v10, %s5592_s23  ;;  %v3871_v26 = vpop.permute.xlu0 %3870  ;;  %v3836_v29 = vmul.f32 -0.5, %v3828_v60 }
0x1cb3   :  { %v3829_v52 = vmul.f32 %v3821_v22, %v3821_v22  ;;  %v3890_v56 = vsub.f32 %v3834_v50, %v3871_v26  ;;  %3914 = vrot.lane.b32.xlu0 %v4435_v19, %s5592_s23 }
0x1cb5   :  { %v3837_v11 = vmul.f32 -0.5, %v3829_v52  ;;  %v4437_v21 = vadd.f32 -0.9189385, %v3890_v56 }
0x1cb6   :  { %v3875_v5 = vpop.permute.xlu0 %3874 }
0x1cb7   :  { %v3893_v34 = vsub.f32 %v3837_v11, %v3877_v17  ;;  %3918 = vrot.lane.b32.xlu0 %v4437_v21, %s5592_s23  ;;  %v3892_v59 = vsub.f32 %v3836_v29, %v3875_v5  ;;  %v3969_v29 = vadd.s32 16, %v5733_v32 }
0x1cb9   :  { %v4440_v33 = vadd.f32 -0.9189385, %v3893_v34  ;;  %v4439_v53 = vadd.f32 -0.9189385, %v3892_v59  ;;  %v3968_v34 = vadd.s32 8, %v5733_v32  ;;  %v3977_v59 = vand.u32 7, %v3969_v29 }
0x1cbb   :  { %3924 = vrot.lane.b32.xlu1 %v4440_v33, %s5592_s23  ;;  %4259 = vrot.lane.b32.xlu0 %v4257_v55, %s5593_s0  ;;  %v3976_v33 = vand.u32 7, %v3968_v34  ;;  %v3975_v55 = vand.u32 7, %v5733_v32  ;;  %vm6900_vm12 = vcmp.ge.s32.totalorder %v3977_v59, 2  ;;  %vm6904_vm13 = vcmp.lt.s32.totalorder %v3977_v59, 4 }
0x1cbc   :  { %vm4009_vm2 = vmand %vm6900_vm12, %vm6904_vm13 }
0x1cbd   :  { %vm6892_vm10 = vcmp.ge.s32.totalorder %v3976_v33, 2  ;;  %vm6896_vm11 = vcmp.lt.s32.totalorder %v3976_v33, 4  ;;  %vm6910_vm14 = vcmp.ge.s32.totalorder %v3975_v55, 2  ;;  %vm6914_vm15 = vcmp.lt.s32.totalorder %v3975_v55, 4 }
0x1cbe   :  { %vm4008_vm0 = vmand %vm6892_vm10, %vm6896_vm11  ;;  %v6974_v33 = vadd.s32 56, %v5733_v32 }
0x1cbf   :  { %4142 = vrot.lane.b32.xlu1 %v6817_v23, %s5592_s23  ;;  %3922 = vrot.lane.b32.xlu0 %v4439_v53, %s5592_s23  ;;  %v4404_v23 = vmul.f32 -0.5, %v6535_v43  ;;  %v3984_v53 = vshra.s32 %v3968_v34, 3  ;;  %vm4007_vm4 = vmand %vm6910_vm14, %vm6914_vm15 }
0x1cc1   :  { %v3023_v0 = vmul.f32 1.442695, %v4404_v23  ;;  %vm4181_vm1 = vcmp.lt.s32.totalorder %v3984_v53, 6 }
0x1cc3   :  { %4144 = vrot.lane.b32.xlu1 %v6835_v38, %s5592_s23  ;;  %4140 = vrot.lane.b32.xlu0 %v6823_v40, %s5592_s23  ;;  %5552 = vpow2.f32 %v3023_v0 }
0x1cc7   :  { %4148 = vrot.lane.b32.xlu1 %v5583_v46, %s5592_s23  ;;  %4146 = vrot.lane.b32.xlu0 %v6829_v7, %s5592_s23 }
0x1ccb   :  { %4152 = vrot.lane.b32.xlu1 %v5584_v8, %s5592_s23  ;;  %4150 = vrot.lane.b32.xlu0 %v6841_v30, %s5592_s23 }
0x1ccd   :  { %v5553_v57 = vpop.eup %5552 }
0x1cce   :  { %v3025_v42 = vadd.f32 1.0, %v5553_v57  ;;  %v3985_v57 = vshra.s32 %v3969_v29, 3 }
0x1cd0   :  { %5554 = vrcp.f32 %v3025_v42  ;;  %vm4182_vm3 = vcmp.lt.s32.totalorder %v3985_v57, 6 }
0x1cda   :  { %v5555_v38 = vpop.eup %5554 }
0x1cdb   :  { %v3028_v41 = vmul.f32 0.99, %v5555_v38  ;;  %v3971_v38 = vadd.s32 32, %v5733_v32 }
0x1cdd   :  { %v3029_v40 = vadd.f32 0.01, %v3028_v41  ;;  %v3983_v41 = vshra.s32 %v5733_v32, 3 }
0x1cdf   :  { %v4247_v1 = vrot.slane %v3029_v40, 2  ;;  %v4253_v58 = vmul.f32 %v3029_v40, %v3029_v40  ;;  %vm4180_vm5 = vcmp.lt.s32.totalorder %v3983_v41, 6 }
0x1ce1   :  { %5556 = vrcp.f32 %v4247_v1  ;;  %v4263_v36 = vmul.f32 2.0, %v4253_v58 }
0x1ce3   :  { %v4265_v39 = vrot.slane %v4263_v36, 6  ;;  %v3979_v36 = vand.u32 7, %v3971_v38 }
0x1ce5   :  { %5558 = vrcp.f32 %v4265_v39  ;;  %vm6946_vm6 = vcmp.ge.s32.totalorder %v3979_v36, 2  ;;  %vm6950_vm7 = vcmp.lt.s32.totalorder %v3979_v36, 4 }
0x1ce6   :  { %vm4011_vm8 = vmand %vm6946_vm6, %vm6950_vm7  ;;  %vm4039_vm7 = vcmask 7168  }
0x1ceb   :  { %v5557_v28 = vpop.eup %5556 }
0x1cec   :  { %v4250_v16 = vmul.f32 %v5557_v28, %v3029_v40  ;;  %v4450_v28 = vsel %vm4181_vm1, 1.0, %v5586_v2 }
0x1cee   :  { %5560 = vlog2.f32 %v4250_v16  ;;  %v3987_v16 = vshra.s32 %v3971_v38, 3 }
0x1cef   :  { %v5559_v26 = vpop.eup %5558 }
0x1cf0   :  { %vm4184_vm10 = vcmp.lt.s32.totalorder %v3987_v16, 6  ;;  %v4070_v59 = vadd.s32 1, %v3987_v16 }
0x1cf8   :  { %v5561_v11 = vpop.eup %5560 }
0x1cf9   :  { %v4252_v4 = vmul.f32 0.6931472, %v5561_v11 }
0x1d19   :  { %v3913_v46 = vpop.permute.xlu1 %3912 }
0x1d1a   :  { %v3938_v7 = vsel %vm3934_vm9, %v3913_v46, 0.0 }
0x1d1b   :  { %3939 = vadd.xlane.f32.xlu0 %v3938_v7  ;;  %v4067_v7 = vadd.s32 1, %v3984_v53 }
0x1d1d   :  { %v4075_v39 = vcvt.s32.f32 %v4067_v7  ;;  %v3990_v7 = vshra.s32 %v6974_v33, 3 }
0x1d1f   :  { %5562 = vrsqrt.f32 %v4075_v39 }
0x1d20   :  { %v3917_v30 = vpop.permute.xlu1 %3916 }
0x1d21   :  { %v3911_v8 = vpop.permute.xlu0 %3910  ;;  %v3944_v49 = vsel %vm3934_vm9, %v3917_v30, 0.0  ;;  %v3970_v30 = vadd.s32 24, %v5733_v32 }
0x1d22   :  { %v3935_v43 = vsel %vm3934_vm9, %v3911_v8, 0.0  ;;  %v6932_v8 = vsel %vm4008_vm0, 1.0, %v5586_v2 }
0x1d23   :  { %3936 = vadd.xlane.f32.xlu1 %v3935_v43  ;;  %v4068_v43 = vadd.s32 1, %v3985_v57  ;;  %v6980_v57 = vsel %vm4011_vm8, 1.0, %v5586_v2 }
0x1d24   :  { %v3921_v15 = vpop.permute.xlu1 %3920 }
0x1d25   :  { %v3915_v54 = vpop.permute.xlu0 %3914  ;;  %v3950_v61 = vsel %vm3934_vm9, %v3921_v15, 0.0  ;;  %v6940_v15 = vsel %vm4007_vm4, 1.0, %v5586_v2 }
0x1d26   :  { %v3941_v31 = vsel %vm3934_vm9, %v3915_v54, 0.0  ;;  %v6936_v54 = vsel %vm4009_vm2, 1.0, %v5586_v2 }
0x1d27   :  { %3945 = vadd.xlane.f32.xlu1 %v3944_v49  ;;  %3942 = vadd.xlane.f32.xlu0 %v3941_v31  ;;  %v4066_v49 = vadd.s32 1, %v3983_v41  ;;  %v4451_v31 = vsel %vm4182_vm3, 1.0, %v5586_v2 }
0x1d29   :  { %v3919_v44 = vpop.permute.xlu0 %3918  ;;  %v4074_v11 = vcvt.s32.f32 %v4066_v49 }
0x1d2a   :  { %v3947_v10 = vsel %vm3934_vm9, %v3919_v44, 0.0 }
0x1d2b   :  { %3951 = vadd.xlane.f32.xlu1 %v3950_v61  ;;  %3948 = vadd.xlane.f32.xlu0 %v3947_v10  ;;  %v3973_v61 = vadd.s32 48, %v5733_v32  ;;  %v4449_v10 = vsel %vm4180_vm5, 1.0, %v5586_v2 }
0x1d2d   :  { %v3925_v19 = vpop.permute.xlu1 %3924  ;;  %v4260_v22 = vpop.permute.xlu0 %4259  ;;  %v3989_v55 = vshra.s32 %v3973_v61, 3 }
0x1d2e   :  { %v4262_v50 = vadd.f32 %v4260_v22, %v4253_v58  ;;  %v3956_v62 = vsel %vm3934_vm9, %v3925_v19, 0.0 }
0x1d2f   :  { %3957 = vadd.xlane.f32.xlu1 %v3956_v62  ;;  %v4076_v62 = vcvt.s32.f32 %v4068_v43  ;;  %v4072_v36 = vadd.s32 1, %v3989_v55  ;;  %vm7019_vm4 = vcmp.lt.s32.totalorder %v3989_v55, 6 }
0x1d30   :  { %v4268_v56 = vmul.f32 %v5559_v26, %v4262_v50  ;;  %v3978_v50 = vand.u32 7, %v3970_v30 }
0x1d31   :  { %v3923_v52 = vpop.permute.xlu0 %3922  ;;  %v4143_v58 = vpop.permute.xlu1 %4142  ;;  %5564 = vrsqrt.f32 %v4076_v62 }
0x1d32   :  { %v3953_v60 = vsel %vm3934_vm9, %v3923_v52, 0.0  ;;  %v4270_v21 = vrot.slane %v4268_v56, 2  ;;  %v3972_v52 = vadd.s32 40, %v5733_v32  ;;  %v4205_v56 = vmul.f32 %v4450_v28, %v6932_v8 }
0x1d33   :  { %3954 = vadd.xlane.f32.xlu0 %v3953_v60  ;;  %v6957_v60 = vmul.f32 %v4451_v31, %v6936_v54  ;;  %vm6965_vm11 = vcmp.ge.s32.totalorder %v3978_v50, 2  ;;  %vm6969_vm12 = vcmp.lt.s32.totalorder %v3978_v50, 4  ;;  %v4165_v0 = vsub.f32 %v6606_v27, %v4143_v58  ;;  %v5563_v50 = vpop.eup %5562 }
0x1d34   :  { %v4272_v17 = vadd.f32 %v4270_v21, %v4252_v4  ;;  %v4204_v21 = vmul.f32 %v4449_v10, %v6940_v15  ;;  %v3986_v4 = vshra.s32 %v3970_v30, 3  ;;  %v3980_v53 = vand.u32 7, %v3972_v52  ;;  %vm4010_vm13 = vmand %vm6965_vm11, %vm6969_vm12 }
0x1d35   :  { %v4141_v46 = vpop.permute.xlu0 %4140  ;;  %v4145_v26 = vpop.permute.xlu1 %4144  ;;  %5566 = vrsqrt.f32 %v4074_v11  ;;  %v4078_v58 = vcvt.s32.f32 %v4070_v59  ;;  %v4173_v28 = vmul.f32 %v4165_v0, %v4165_v0  ;;  %v7012_v31 = vsel %vm4010_vm13, 1.0, %v5586_v2 }
0x1d36   :  { %v4457_v5 = vadd.f32 -0.5, %v4272_v17  ;;  %v3981_v17 = vand.u32 7, %v3973_v61  ;;  %v4069_v32 = vadd.s32 1, %v3986_v4  ;;  %vm4183_vm14 = vcmp.lt.s32.totalorder %v3986_v4, 6 }
0x1d37   :  { %v4166_v40 = vsub.f32 %v6618_v25, %v4145_v26  ;;  %vm6997_vm1 = vcmp.ge.s32.totalorder %v3980_v53, 2  ;;  %vm7001_vm2 = vcmp.lt.s32.totalorder %v3980_v53, 4  ;;  %v4452_v16 = vsel %vm4183_vm14, 1.0, %v5586_v2 }
0x1d38   :  { %vm6987_vm15 = vcmp.ge.s32.totalorder %v3981_v17, 2  ;;  %vm6991_vm0 = vcmp.lt.s32.totalorder %v3981_v17, 4  ;;  %v4077_v61 = vcvt.s32.f32 %v4069_v32  ;;  %vm4012_vm5 = vmand %vm6997_vm1, %vm7001_vm2  ;;  %5568 = vrsqrt.f32 %v4078_v58 }
0x1d39   :  { %v6942_v44 = vpop.permute.xlu0 %4146  ;;  %v4149_v42 = vpop.permute.xlu1 %4148  ;;  %vm4013_vm3 = vmand %vm6987_vm15, %vm6991_vm0  ;;  %v4174_v62 = vmul.f32 %v4166_v40, %v4166_v40  ;;  %v4080_v17 = vcvt.s32.f32 %v4072_v36  ;;  %v4213_v34 = vmul.f32 %v4205_v56, %v4173_v28  ;;  %v4455_v59 = vsel %vm7019_vm4, 1.0, %v5586_v2 }
0x1d3a   :  { %v4168_v11 = vsub.f32 %v6626_v20, %v4149_v42  ;;  %v4167_v4 = vsub.f32 %v6616_v18, %v6942_v44  ;;  %v7039_v29 = vsel %vm4013_vm3, 1.0, %v5586_v2  ;;  %v7047_v44 = vsel %vm4012_vm5, 1.0, %v5586_v2 }
0x1d3b   :  { %v7044_v55 = vpop.eup %5564  ;;  %v4214_v42 = vmul.f32 %v6957_v60, %v4174_v62  ;;  %5570 = vrsqrt.f32 %v4077_v61  ;;  %v4221_v58 = vsel %vm3934_vm9, %v4213_v34, 0.0  ;;  %vm7101_vm12 = vcmp.lt.s32.totalorder %v3990_v7, 6 }
0x1d3c   :  { %v4176_v41 = vmul.f32 %v4168_v11, %v4168_v11  ;;  %v4175_v40 = vmul.f32 %v4167_v4, %v4167_v4  ;;  %5572 = vrsqrt.f32 %v4080_v17  ;;  %v3982_v11 = vand.u32 7, %v6974_v33 }
0x1d3d   :  { %v6976_v23 = vpop.permute.xlu0 %4150  ;;  %v4223_v28 = vsel %vm3934_vm9, %v4214_v42, 0.0  ;;  %vm4278_vm13 = vcmask 254976   ;;  %vm3733_vm14 = vcmask 48128   ;;  %vm4294_vm15 = vcmp.eq.s32.totalorder %v6426_v45, 1 }
0x1d3e   :  { %vm7074_vm8 = vcmp.ge.s32.totalorder %v3982_v11, 2  ;;  %vm4291_vm0 = vcmp.eq.s32.totalorder %v6426_v45, 0  ;;  %vm4298_vm1 = vcmp.eq.s32.totalorder %v6426_v45, 2  ;;  %vm4301_vm2 = vcmp.eq.s32.totalorder %v6426_v45, 3 }
0x1d3f   :  { %vm4304_vm3 = vcmp.eq.s32.totalorder %v6426_v45, 4  ;;  %vm4307_vm4 = vcmask 57344  }
0x1d40   :  { %4275 = vrot.lane.b32.xlu1 %v4457_v5, %s5594_s28  ;;  %v4164_v5 = vsub.f32 %v6608_v3, %v4141_v46  ;;  %v3988_v46 = vshra.s32 %v3972_v52, 3  ;;  %v4073_v52 = vadd.s32 1, %v3990_v7 }
0x1d42   :  { %v4172_v1 = vmul.f32 %v4164_v5, %v4164_v5  ;;  %v4071_v19 = vadd.s32 1, %v3988_v46  ;;  %vm4185_vm6 = vcmp.lt.s32.totalorder %v3988_v46, 6  ;;  %v4153_v5 = vpop.permute.xlu1 %4152  ;;  %v4081_v38 = vcvt.s32.f32 %v4073_v52 }
0x1d43   :  { %v4454_v53 = vsel %vm4185_vm6, 1.0, %v5586_v2  ;;  %v4170_v62 = vsub.f32 %v6636_v37, %v4153_v5 }
0x1d44   :  { %v4212_v26 = vmul.f32 %v4204_v21, %v4172_v1  ;;  %v4207_v21 = vmul.f32 %v4452_v16, %v7012_v31  ;;  %v4079_v56 = vcvt.s32.f32 %v4071_v19  ;;  %v7053_v1 = vmul.f32 %v4455_v59, %v7039_v29 }
0x1d45   :  { %v7057_v36 = vmul.f32 %v4454_v53, %v7047_v44 }
0x1d46   :  { %v4220_v32 = vsel %vm3934_vm9, %v4212_v26, 0.0  ;;  %5574 = vrsqrt.f32 %v4079_v56  ;;  %v4215_v19 = vmul.f32 %v4207_v21, %v4175_v40  ;;  %v4169_v56 = vsub.f32 %v6624_v63, %v6976_v23 }
0x1d47   :  { %v4222_v43 = vadd.f32 %v4221_v58, %v4220_v32  ;;  %5576 = vrsqrt.f32 %v4081_v38 }
0x1d49   :  { %4154 = vrot.lane.b32.xlu0 %v6855_v47, %s5592_s23  ;;  %v4453_v47 = vsel %vm4184_vm10, 1.0, %v5586_v2  ;;  %v4224_v59 = vadd.f32 %v4223_v28, %v4222_v43  ;;  %vm7078_vm10 = vcmp.lt.s32.totalorder %v3982_v11, 4 }
0x1d4a   :  { %v4208_v49 = vmul.f32 %v4453_v47, %v6980_v57  ;;  %v5567_v47 = vpop.eup %5566  ;;  %vm4014_vm11 = vmand %vm7074_vm8, %vm7078_vm10 }
0x1d4b   :  { %v5569_v34 = vpop.eup %5568 }
0x1d4c   :  { %v7063_v10 = vmul.f32 %v4208_v49, %v4176_v41  ;;  %v5571_v23 = vpop.eup %5570 }
0x1d4d   :  { %v7086_v43 = vpop.eup %5572 }
0x1d4e   :  { %v4227_v33 = vsel %vm3934_vm9, %v7063_v10, 0.0 }
0x1da8   :  { %v3940_v39 = vpop.xlane.xlu0 %3939 }
0x1da9   :  { %v3961_v22 = vmul.f32 0.5, %v3940_v39 }
0x1dab   :  { %v4083_v0 = vsub.f32 0.0, %v3961_v22  ;;  %v4032_v60 = vmul.f32 %v6932_v8, %v3961_v22 }
0x1dad   :  { %v4091_v39 = vmul.f32 %v6932_v8, %v4083_v0  ;;  %v4041_v49 = vsel %vm4039_vm7, %v4032_v60, 0.0  ;;  %v4177_v60 = vmul.f32 %v4169_v56, %v4169_v56 }
0x1daf   :  { %v4107_v21 = vmul.f32 %v5563_v50, %v4091_v39  ;;  %v4225_v50 = vsel %vm3934_vm9, %v4215_v19, 0.0  ;;  %v5575_v19 = vpop.eup %5574 }
0x1db0   :  { %v3937_v46 = vpop.xlane.xlu1 %3936 }
0x1db1   :  { %v3960_v30 = vmul.f32 0.5, %v3937_v46 }
0x1db3   :  { %v4031_v16 = vmul.f32 %v6940_v15, %v3960_v30  ;;  %v4082_v61 = vsub.f32 0.0, %v3960_v30 }
0x1db4   :  { %v3946_v26 = vpop.xlane.xlu1 %3945  ;;  %v3943_v52 = vpop.xlane.xlu0 %3942 }
0x1db5   :  { %v4040_v4 = vsel %vm4039_vm7, %v4031_v16, 0.0  ;;  %v4090_v22 = vmul.f32 %v6940_v15, %v4082_v61  ;;  %v3963_v8 = vmul.f32 0.5, %v3946_v26  ;;  %v3962_v17 = vmul.f32 0.5, %v3943_v52 }
0x1db6   :  { %v4042_v32 = vadd.f32 %v4041_v49, %v4040_v4  ;;  %v4178_v61 = vmul.f32 %v4170_v62, %v4170_v62  ;;  %v4115_v26 = vsel %vm4039_vm7, %v4107_v21, 0.0  ;;  %v5577_v49 = vpop.eup %5576  ;;  %v4226_v62 = vadd.f32 %v4225_v50, %v4224_v59 }
0x1db7   :  { %v4106_v53 = vmul.f32 %v5567_v47, %v4090_v22  ;;  %v4034_v5 = vmul.f32 %v7012_v31, %v3963_v8  ;;  %v4085_v0 = vsub.f32 0.0, %v3963_v8  ;;  %v4033_v42 = vmul.f32 %v6936_v54, %v3962_v17 }
0x1db8   :  { %v4084_v38 = vsub.f32 0.0, %v3962_v17  ;;  %v3952_v41 = vpop.xlane.xlu1 %3951  ;;  %v3949_v15 = vpop.xlane.xlu0 %3948  ;;  %v4217_v21 = vmul.f32 %v7057_v36, %v4177_v60  ;;  %v4448_v36 = vsel %vm4014_vm11, 1.0, %v5586_v2 }
0x1db9   :  { %v4114_v47 = vsel %vm4039_vm7, %v4106_v53, 0.0  ;;  %v4093_v58 = vmul.f32 %v7012_v31, %v4085_v0  ;;  %v4043_v30 = vsel %vm4039_vm7, %v4033_v42, 0.0  ;;  %v3965_v16 = vmul.f32 0.5, %v3952_v41 }
0x1dba   :  { %v4044_v39 = vadd.f32 %v4043_v30, %v4042_v32  ;;  %v4092_v28 = vmul.f32 %v6936_v54, %v4084_v38  ;;  %v4045_v52 = vsel %vm4039_vm7, %v4034_v5, 0.0  ;;  %v3964_v11 = vmul.f32 0.5, %v3949_v15 }
0x1dbb   :  { %v4116_v4 = vadd.f32 %v4115_v26, %v4114_v47  ;;  %v4109_v22 = vmul.f32 %v5571_v23, %v4093_v58  ;;  %v4087_v8 = vsub.f32 0.0, %v3965_v16  ;;  %v4036_v32 = vmul.f32 %v7047_v44, %v3965_v16 }
0x1dbc   :  { %v4108_v31 = vmul.f32 %v7044_v55, %v4092_v28  ;;  %v3958_v17 = vpop.xlane.xlu1 %3957  ;;  %v4046_v53 = vadd.f32 %v4045_v52, %v4044_v39  ;;  %v4035_v56 = vmul.f32 %v6980_v57, %v3964_v11  ;;  %v4086_v0 = vsub.f32 0.0, %v3964_v11 }
0x1dbd   :  { %v3967_v54 = vmul.f32 0.5, %v3958_v17  ;;  %v4119_v15 = vsel %vm4039_vm7, %v4109_v22, 0.0  ;;  %v4095_v59 = vmul.f32 %v7047_v44, %v4087_v8  ;;  %v4218_v47 = vmul.f32 %v7053_v1, %v4178_v61 }
0x1dbe   :  { %v4117_v5 = vsel %vm4039_vm7, %v4108_v31, 0.0  ;;  %v4047_v38 = vsel %vm4039_vm7, %v4035_v56, 0.0  ;;  %v4094_v41 = vmul.f32 %v6980_v57, %v4086_v0  ;;  %v4228_v58 = vadd.f32 %v4227_v33, %v4226_v62 }
0x1dbf   :  { %v4118_v42 = vadd.f32 %v4117_v5, %v4116_v4  ;;  %v4089_v40 = vsub.f32 0.0, %v3967_v54  ;;  %v4048_v23 = vadd.f32 %v4047_v38, %v4046_v53  ;;  %v4456_v57 = vsel %vm7101_vm12, 1.0, %v5586_v2 }
0x1dc0   :  { %v3955_v46 = vpop.xlane.xlu0 %3954  ;;  %v4110_v50 = vmul.f32 %v5569_v34, %v4094_v41  ;;  %v4229_v44 = vsel %vm3934_vm9, %v4217_v21, 0.0  ;;  %v4049_v60 = vsel %vm4039_vm7, %v4036_v32, 0.0  ;;  %v4038_v28 = vmul.f32 %v4448_v36, %v3967_v54 }
0x1dc1   :  { %v4120_v7 = vadd.f32 %v4119_v15, %v4118_v42  ;;  %v3966_v30 = vmul.f32 0.5, %v3955_v46  ;;  %v4111_v16 = vmul.f32 %v5575_v19, %v4095_v59  ;;  %v4097_v10 = vmul.f32 %v4448_v36, %v4089_v40 }
0x1dc2   :  { %v4121_v39 = vsel %vm4039_vm7, %v4110_v50, 0.0  ;;  %v4050_v61 = vadd.f32 %v4049_v60, %v4048_v23  ;;  %v4211_v11 = vmul.f32 %v4456_v57, %v4448_v36  ;;  %v4230_v22 = vadd.f32 %v4229_v44, %v4228_v58 }
0x1dc3   :  { %v4037_v26 = vmul.f32 %v7039_v29, %v3966_v30  ;;  %v4088_v34 = vsub.f32 0.0, %v3966_v30  ;;  %v4122_v1 = vadd.f32 %v4121_v39, %v4120_v7  ;;  %v4123_v53 = vsel %vm4039_vm7, %v4111_v16, 0.0 }
0x1dc4   :  { %v4155_v52 = vpop.permute.xlu0 %4154  ;;  %v4053_v19 = vsel %vm4039_vm7, %v4038_v28, 0.0  ;;  %v4113_v56 = vmul.f32 %v5577_v49, %v4097_v10  ;;  %v4231_v54 = vsel %vm3934_vm9, %v4218_v47, 0.0  ;;  %v4276_v49 = vpop.permute.xlu1 %4275 }
0x1dc5   :  { %v4171_v4 = vsub.f32 %v6634_v35, %v4155_v52  ;;  %v4051_v2 = vsel %vm4039_vm7, %v4037_v26, 0.0  ;;  %v4096_v31 = vmul.f32 %v7039_v29, %v4088_v34  ;;  %v4124_v5 = vadd.f32 %v4123_v53, %v4122_v1 }
0x1dc6   :  { %v4052_v8 = vadd.f32 %v4051_v2, %v4050_v61  ;;  %v4232_v42 = vadd.f32 %v4231_v54, %v4230_v22  ;;  %v4127_v38 = vsel %vm4039_vm7, %v4113_v56, 0.0 }
0x1dc7   :  { %v4179_v17 = vmul.f32 %v4171_v4, %v4171_v4  ;;  %v4112_v0 = vmul.f32 %v7086_v43, %v4096_v31  ;;  %v4279_v43 = vsel %vm4278_vm13, %v4276_v49, 0.0 }
0x1dc8   :  { %v4054_v21 = vadd.f32 %v4053_v19, %v4052_v8 }
0x1dc9   :  { %v4219_v62 = vmul.f32 %v4211_v11, %v4179_v17  ;;  %v4125_v55 = vsel %vm4039_vm7, %v4112_v0, 0.0 }
0x1dca   :  { %4055 = vadd.xlane.f32.xlu0 %v4054_v21  ;;  %v4126_v32 = vadd.f32 %v4125_v55, %v4124_v5 }
0x1dcb   :  { %v4233_v29 = vsel %vm3934_vm9, %v4219_v62, 0.0  ;;  %vm3724_vm9 = vcmask 31744  }
0x1dcc   :  { %v4234_v41 = vadd.f32 %v4233_v29, %v4232_v42  ;;  %v4128_v15 = vadd.f32 %v4127_v38, %v4126_v32 }
0x1dce   :  { %4129 = vadd.xlane.f32.xlu1 %v4128_v15  ;;  %4235 = vadd.xlane.f32.xlu0 %v4234_v41 }
0x1dd2   :  { %4280 = vadd.xlane.f32.xlu0 %v4279_v43 }
0x1ddf   :  { %3700 = vrot.lane.b32.xlu1 %v6728_v48, %s5595_s29 }
0x1de3   :  { %3704 = vrot.lane.b32.xlu1 %v6750_v14, %s5595_s29 }
0x1de7   :  { %3706 = vrot.lane.b32.xlu1 %v6745_v51, %s5595_s29 }
0x1de8   :  { %3702 = vrot.lane.b32.xlu0 %v6722_v13, %s5595_s29 }
0x1deb   :  { %3710 = vrot.lane.b32.xlu1 %v6769_v24, %s5595_s29 }
0x1dec   :  { %3708 = vrot.lane.b32.xlu0 %v6776_v6, %s5595_s29 }
0x1def   :  { %3714 = vrot.lane.b32.xlu1 %v6786_v12, %s5595_s29 }
0x1df0   :  { %3712 = vrot.lane.b32.xlu0 %v6795_v9, %s5595_s29 }
0x1e57   :  { %v4056_v59 = vpop.xlane.xlu0 %4055 }
0x1e58   :  { %v4057_v36 = vrot.slane %v4056_v59, 4 }
0x1e5a   :  { %v4058_v40 = vadd.f32 %v4057_v36, %v4056_v59 }
0x1e5b   :  { %v4130_v46 = vpop.xlane.xlu1 %4129  ;;  %v4236_v33 = vpop.xlane.xlu0 %4235 }
0x1e5c   :  { %v4059_v48 = vrot.slane %v4058_v40, 2  ;;  %v4131_v7 = vrot.slane %v4130_v46, 4  ;;  %v4237_v14 = vrot.slane %v4236_v33, 4 }
0x1e5e   :  { %v4132_v51 = vadd.f32 %v4131_v7, %v4130_v46  ;;  %v4238_v23 = vadd.f32 %v4237_v14, %v4236_v33  ;;  %v4060_v13 = vadd.f32 %v4059_v48, %v4058_v40 }
0x1e5f   :  { %v3701_v24 = vpop.permute.xlu1 %3700  ;;  %v4281_v50 = vpop.xlane.xlu0 %4280 }
0x1e60   :  { %v4133_v6 = vrot.slane %v4132_v51, 2  ;;  %v4239_v47 = vrot.slane %v4238_v23, 2  ;;  %v3725_v12 = vsel %vm3724_vm9, %v6608_v3, %v3701_v24  ;;  %v4282_v9 = vrot.slane %v4281_v50, 4 }
0x1e61   :  { %3734 = vst.msk [vmem:[%s7198_s3] sm:$0xff] %vm3733_vm14, %v3725_v12  ;;  %v4061_v58 = vrot.slane %v4060_v13, 1 }
0x1e62   :  { %v4283_v30 = vadd.f32 %v4282_v9, %v4281_v50  ;;  %v4134_v57 = vadd.f32 %v4133_v6, %v4132_v51  ;;  %v4240_v44 = vadd.f32 %v4239_v47, %v4238_v23 }
0x1e63   :  { %v3705_v60 = vpop.permute.xlu1 %3704  ;;  %v3703_v39 = vpop.permute.xlu0 %3702  ;;  %v4062_v28 = vadd.f32 %v4061_v58, %v4060_v13 }
0x1e64   :  { %v4284_v16 = vrot.slane %v4283_v30, 2  ;;  %v3727_v10 = vsel %vm3724_vm9, %v6618_v25, %v3705_v60  ;;  %v3726_v3 = vsel %vm3724_vm9, %v6606_v27, %v3703_v39  ;;  %v4135_v26 = vrot.slane %v4134_v57, 1 }
0x1e65   :  { %3736 = vst.msk [vmem:[%s7198_s3 + $0x10] sm:$0xff] %vm3733_vm14, %v3727_v10  ;;  %3735 = vst.msk [vmem:[%s7198_s3 + $0x8] sm:$0xff] %vm3733_vm14, %v3726_v3  ;;  %v4241_v34 = vrot.slane %v4240_v44, 1 }
0x1e66   :  { %5278 = vpush %v4062_v28  ;;  %v4136_v52 = vadd.f32 %v4135_v26, %v4134_v57  ;;  %v4285_v1 = vadd.f32 %v4284_v16, %v4283_v30 }
0x1e67   :  { %v3707_v61 = vpop.permute.xlu1 %3706  ;;  %v3709_v25 = vpop.permute.xlu0 %3708  ;;  %v4242_v11 = vadd.f32 %v4241_v34, %v4240_v44 }
0x1e68   :  { %v3728_v27 = vsel %vm3724_vm9, %v6616_v18, %v3707_v61  ;;  %v3729_v4 = vsel %vm3724_vm9, %v6626_v20, %v3709_v25  ;;  %5280 = vpush %v4136_v52  ;;  %v4286_v22 = vrot.slane %v4285_v1, 1 }
0x1e69   :  { %3737 = vst.msk [vmem:[%s7198_s3 + $0x18] sm:$0xff] %vm3733_vm14, %v3728_v27  ;;  %3738 = vst.msk [vmem:[%s7198_s3 + $0x20] sm:$0xff] %vm3733_vm14, %v3729_v4 }
0x1e6a   :  { %5282 = vpush %v4242_v11  ;;  %v4287_v2 = vadd.f32 %v4286_v22, %v4285_v1 }
0x1e6b   :  { %v3711_v31 = vpop.permute.xlu1 %3710  ;;  %v3713_v8 = vpop.permute.xlu0 %3712 }
0x1e6c   :  { %v3730_v18 = vsel %vm3724_vm9, %v6624_v63, %v3711_v31  ;;  %v3731_v20 = vsel %vm3724_vm9, %v6636_v37, %v3713_v8  ;;  %5284 = vpush %v4287_v2 }
0x1e6d   :  { %3739 = vst.msk [vmem:[%s7198_s3 + $0x28] sm:$0xff] %vm3733_vm14, %v3730_v18  ;;  %3740 = vst.msk [vmem:[%s7198_s3 + $0x30] sm:$0xff] %vm3733_vm14, %v3731_v20 }
0x1e6f   :  { %v3715_v17 = vpop.permute.xlu1 %3714 }
0x1e70   :  { %v3732_v53 = vsel %vm3724_vm9, %v6634_v35, %v3715_v17 }
0x1e71   :  { %3741 = vst.msk [vmem:[%s7198_s3 + $0x38] sm:$0xff] %vm3733_vm14, %v3732_v53 }
0x1e97   :  { %s5279_s18 = spop %5278 }
0x1e98   :  { %v4064_v63 = vstv %s5279_s18 }
0x1e99   :  { %s5281_s19 = spop %5280  ;;  %v4065_v37 = vmul.f32 0.0625, %v4064_v63 }
0x1e9a   :  { %v4138_v62 = vstv %s5281_s19 }
0x1e9b   :  { %s5283_s20 = spop %5282  ;;  %v4295_v56 = vsub.f32 0.0, %v4065_v37  ;;  %v4139_v32 = vmul.f32 0.0625, %v4138_v62 }
0x1e9c   :  { %v4244_v54 = vstv %s5283_s20 }
0x1e9d   :  { %s5285_s21 = spop %5284  ;;  %v4296_v21 = vsel %vm4294_vm15, %v4295_v56, 0.0  ;;  %v4245_v5 = vmul.f32 0.041666668, %v4244_v54  ;;  %v4305_v49 = vsel %vm4304_vm3, %v4139_v32, 0.0 }
0x1e9e   :  { %v4289_v19 = vstv %s5285_s21 }
0x1e9f   :  { %v4290_v0 = vmul.f32 0.015625, %v4289_v19  ;;  %v4302_v41 = vsel %vm4301_vm2, %v4245_v5, 0.0 }
0x1ea1   :  { %v4292_v35 = vsub.f32 %v4290_v0, %v4065_v37  ;;  %v4299_v29 = vsel %vm4298_vm1, %v4290_v0, 0.0 }
0x1ea3   :  { %v4293_v55 = vsel %vm4291_vm0, %v4292_v35, 0.0 }
0x1ea4   :  { %v4297_v42 = vadd.f32 %v4296_v21, %v4293_v55 }
0x1ea6   :  { %v4300_v38 = vadd.f32 %v4299_v29, %v4297_v42 }
0x1ea8   :  { %v4303_v15 = vadd.f32 %v4302_v41, %v4300_v38 }
0x1eaa   :  { %v4306_v43 = vadd.f32 %v4305_v49, %v4303_v15 }
0x1eac   :  { %4308 = vst.msk [vmem:[%s7199_s4] sm:$0x1] %vm4307_vm4, %v4306_v43 }

</bundles_post_ra>
